<compile_context>
chip_gen: v7x
topology: tpu7x:2x2x1
jax: 0.10.0
libtpu: 0.0.40
codegen_flags: <defaults>
</compile_context>

<pallas_src>
import functools

import jax
import jax.numpy as jnp
from jax import lax
from jax.experimental import pallas as pl
from jax.experimental.pallas import tpu as pltpu


_LANE = 128
_SUBLANE = 8
_ROW_ALIGN = 32                 # lcm of f32(8) / bf16(16) / int8(32) sublane tiles
_CHUNK_ELEMS = 64 * 1024        # f32 elements per in-kernel compute chunk (~256 KiB/value)
_XLA_FASTPATH_ELEMS = 64 * 1024


def _round_up(x, m):
    return ((x + m - 1) // m) * m


def _round_down(x, m):
    return (x // m) * m


@functools.lru_cache(maxsize=1)
def _vmem_capacity_bytes():
    try:
        return int(pltpu.get_tpu_info().vmem_capacity_bytes)
    except Exception:
        return 64 * 1024 * 1024     # conservative (v7x-sized) fallback


def _focal_elementwise(x, t, gamma, alpha):
    """Fused focal-loss math.  EUP budget: exp + approx-recip + log1p per element;
    the exact divide is replaced by the hardware reciprocal + one Newton step (VPU)."""
    x = x.astype(jnp.float32)
    t = t.astype(jnp.float32)
    alpha_w = t * alpha + (1.0 - t) * (1.0 - alpha)

    e = jnp.exp(-jnp.abs(x))                   # shared by sigmoid and the BCE log term
    d = 1.0 + e
    r = pl.reciprocal(d, approx=True)          # EUP fast reciprocal
    r = r * (2.0 - d * r)                      # one Newton-Raphson step, ~1e-7 rel err
    sig = jnp.where(x >= 0.0, r, e * r)        # sigmoid(x)
    pb = sig * t + (1.0 - sig) * (1.0 - t)
    m = 1.0 - pb

    if gamma == 2.0:
        focal = m * m                          # avoid jnp.power -> exp(g*log(m))
    elif gamma == 1.0:
        focal = m
    elif gamma == 0.0:
        focal = jnp.ones_like(m)               # avoids exp(0 * -inf) = NaN at m == 0
    else:
        focal = jnp.power(jnp.maximum(m, 0.0), gamma)

    ce = jnp.maximum(x, 0.0) - x * t + jnp.log1p(e)   # stable BCE-with-logits
    return alpha_w * focal * ce


def _partial_sum_kernel(pred_ref, tgt_ref, out_ref, *, gamma, alpha, n_rows,
                        tile_rows, chunk_rows, mask_tail):
    """'mean'/'sum' path: per-grid-step partial loss sum written as one lane-dense
    (8,128) slab.  The block is consumed in `chunk_rows`-row pieces inside a fori_loop
    so elementwise temporaries stay chunk-sized while the DMA block stays large."""
    nfull, rem = divmod(tile_rows, chunk_rows)
    tile_base = pl.program_id(0) * tile_rows

    def chunk_total(x, t, row_base):
        loss = _focal_elementwise(x, t, gamma, alpha)
        row = jnp.sum(loss, axis=1, keepdims=True)            # class (lane) reduce
        if mask_tail:                                         # static trace-time switch
            rid = row_base + lax.broadcasted_iota(jnp.int32, row.shape, 0)
            row = jnp.where(rid < n_rows, row, 0.0)           # zero the ragged OOB rows
        return jnp.sum(row, keepdims=True)                    # (1, 1)

    if nfull == 1 and rem == 0:
        tot = chunk_total(pred_ref[...], tgt_ref[...], tile_base)
    else:
        tot = jnp.zeros((1, 1), jnp.float32)
        if nfull > 0:
            def body(c, acc):
                r0 = pl.multiple_of(c * chunk_rows, _ROW_ALIGN)
                return acc + chunk_total(pred_ref[pl.ds(r0, chunk_rows), :],
                                         tgt_ref[pl.ds(r0, chunk_rows), :],
                                         tile_base + r0)
            tot = lax.fori_loop(0, nfull, body, tot)
        if rem:
            r0 = nfull * chunk_rows
            tot = tot + chunk_total(pred_ref[r0:tile_rows, :],
                                    tgt_ref[r0:tile_rows, :],
                                    tile_base + r0)

    out_ref[...] = jnp.broadcast_to(tot, out_ref.shape)


def _row_sum_kernel(pred_ref, tgt_ref, out_ref, *, gamma, alpha, tile_rows, chunk_rows):
    """'none' path: per-row class sums.  Rows past N fall in the block's OOB region;
    those stores are dropped by the pipeline, so no masking is needed."""
    nfull, rem = divmod(tile_rows, chunk_rows)

    def do_rows(x, t):
        loss = _focal_elementwise(x, t, gamma, alpha)
        return jnp.sum(loss, axis=1, keepdims=True)

    if nfull == 1 and rem == 0:
        out_ref[...] = do_rows(pred_ref[...], tgt_ref[...])
    else:
        if nfull > 0:
            def body(c, carry):
                r0 = pl.multiple_of(c * chunk_rows, _ROW_ALIGN)
                out_ref[pl.ds(r0, chunk_rows), :] = do_rows(
                    pred_ref[pl.ds(r0, chunk_rows), :],
                    tgt_ref[pl.ds(r0, chunk_rows), :])
                return carry
            lax.fori_loop(0, nfull, body, jnp.int32(0))
        if rem:
            r0 = nfull * chunk_rows
            out_ref[r0:tile_rows, :] = do_rows(pred_ref[r0:tile_rows, :],
                                               tgt_ref[r0:tile_rows, :])


def _sigmoid_focal_loss_xla(prediction, target, gamma, alpha, reduction):
    """Plain-XLA fast path for tiny problems; also serves as the test reference."""
    x = prediction.astype(jnp.float32)
    t = target.astype(jnp.float32)
    alpha_w = t * alpha + (1.0 - t) * (1.0 - alpha)
    pb = jax.nn.sigmoid(x)
    pb = pb * t + (1.0 - pb) * (1.0 - t)
    ce = jnp.maximum(x, 0.0) - x * t + jnp.log1p(jnp.exp(-jnp.abs(x)))
    loss = (alpha_w * (1.0 - pb) ** gamma * ce).sum(-1)
    if reduction == "mean":
        return loss.mean()
    if reduction == "sum":
        return loss.sum()
    return loss


def sigmoid_focal_loss(prediction, target, *, gamma=2.0, alpha=0.25, reduction="mean",
                       block_rows=None, xla_fastpath_elems=_XLA_FASTPATH_ELEMS):
    """Pallas TPU implementation of SigmoidFocalLoss.forward (sum over classes, then
    mean/sum over batch rows, or per-row for reduction='none')."""
    if reduction not in ("mean", "sum", "none"):
        raise ValueError(f"Wrong value for reduction: {reduction}")
    if prediction.ndim != 2 or prediction.shape != target.shape:
        raise ValueError("expected matching 2-D (batch, classes) prediction/target")
    N, C = prediction.shape

    # Tiny problems: kernel-launch overhead dominates; a fused XLA elementwise wins.
    if N * C <= xla_fastpath_elems:
        return _sigmoid_focal_loss_xla(prediction, target, gamma, alpha, reduction)

    p_isize = jnp.dtype(prediction.dtype).itemsize
    t_isize = jnp.dtype(target.dtype).itemsize
    c_lanes = _round_up(C, _LANE)              # physical lanes per row (HBM/VMEM tiling)

    # Per-generation budgets: bigger DMA blocks + higher VMEM ceiling on 128 MiB parts
    # (v5e/v6e); conservative for v7x's 64 MiB VMEM (its 3.2 TB/s HBM keeps steps short).
    big_vmem = _vmem_capacity_bytes() >= 100 * 1024 * 1024
    dma_budget = (24 if big_vmem else 16) * 1024 * 1024      # both inputs, per grid step
    vmem_ceiling = (96 if big_vmem else 52) * 1024 * 1024

    # Inner compute chunk: keeps ~10-12 live f32 elementwise temporaries at ~256 KiB
    # each, independent of the (much larger) DMA block.
    chunk_rows = max(_ROW_ALIGN, _round_down(_CHUNK_ELEMS // c_lanes, _ROW_ALIGN))

    # DMA tile (grid block): as many rows as the per-step HBM budget allows, multiple of
    # chunk_rows.  No host-side padding/copies: the ragged tail is masked in-kernel.
    row_io_bytes = c_lanes * (p_isize + t_isize)
    tile_cap = max(chunk_rows, _round_down(dma_budget // row_io_bytes, chunk_rows))
    if block_rows is not None:
        tile_cap = max(chunk_rows, _round_down(min(block_rows, tile_cap), chunk_rows))

    if N <= tile_cap:
        tile_rows, num_tiles, mask_tail = N, 1, False        # single block == full batch
    else:
        tile_rows = tile_cap
        num_tiles = -(-N // tile_rows)
        mask_tail = (N % tile_rows) != 0

    # Honest VMEM accounting: double-buffered I/O + chunk-sized temporaries + headroom.
    in_io = 2 * tile_rows * row_io_bytes
    out_io = (2 * tile_rows * _LANE * 4) if reduction == "none" \
        else (2 * _SUBLANE * _LANE * 4)
    compute_buf = 12 * min(tile_rows, chunk_rows) * c_lanes * 4
    vmem_limit = int(min(vmem_ceiling,
                         max(24 * 1024 * 1024,
                             in_io + out_io + compute_buf + 4 * 1024 * 1024)))
    compiler_params = pltpu.CompilerParams(
        dimension_semantics=("parallel",),       # keeps megacore sharding on v7x
        vmem_limit_bytes=vmem_limit)
    in_specs = [pl.BlockSpec((tile_rows, C), lambda i: (i, 0)),
                pl.BlockSpec((tile_rows, C), lambda i: (i, 0))]
    # TODO(synk): very large C (per-chunk block of several MiB even at 32 rows) would
    # need a second grid axis over classes with a VMEM row-sum accumulator.

    if reduction == "none":
        # TODO(synk): the (tile_rows, 1) output block is a 1-lane masked store per
        # 8 rows; a lane-dense layout would need an in-kernel transpose — not worth it
        # since the per-row output is only ~1/C of the input traffic.
        kernel = functools.partial(_row_sum_kernel, gamma=gamma, alpha=alpha,
                                   tile_rows=tile_rows, chunk_rows=chunk_rows)
        per_row = pl.pallas_call(
            kernel,
            out_shape=jax.ShapeDtypeStruct((N, 1), jnp.float32),
            grid_spec=pltpu.PrefetchScalarGridSpec(
                num_scalar_prefetch=0,
                grid=(num_tiles,),
                in_specs=in_specs,
                out_specs=pl.BlockSpec((tile_rows, 1), lambda i: (i, 0))),
            compiler_params=compiler_params,
        )(prediction, target)
        return per_row[:, 0]

    kernel = functools.partial(_partial_sum_kernel, gamma=gamma, alpha=alpha, n_rows=N,
                               tile_rows=tile_rows, chunk_rows=chunk_rows,
                               mask_tail=mask_tail)
    slabs = pl.pallas_call(
        kernel,
        out_shape=jax.ShapeDtypeStruct((num_tiles * _SUBLANE, _LANE), jnp.float32),
        grid_spec=pltpu.PrefetchScalarGridSpec(
            num_scalar_prefetch=0,
            grid=(num_tiles,),
            in_specs=in_specs,
            out_specs=pl.BlockSpec((_SUBLANE, _LANE), lambda i: (i, 0))),
        compiler_params=compiler_params,
    )(prediction, target)
    # One lane-dense (8,128) slab per tile, holding that tile's partial sum replicated;
    # reduce the tiny (num_tiles,) vector in XLA.
    total = jnp.sum(slabs[::_SUBLANE, 0])
    if reduction == "mean":
        return total / N
    return total


if __name__ == "__main__":
    key = jax.random.PRNGKey(0)
    k1, k2, k3, k4, k5, k6 = jax.random.split(key, 6)

    def check(name, got, want, rtol=5e-5, atol=1e-5):
        assert bool(jnp.allclose(got, want, rtol=rtol, atol=atol)), (name, got, want)

    # 1) Tiny shape (8 x 32): takes the fused-XLA fast path.
    n1, c1 = 8, 32
    p1 = jax.random.normal(k1, (n1, c1), jnp.float32)
    t1 = jax.random.bernoulli(k2, 0.3, (n1, c1)).astype(jnp.float32)
    ref1 = _sigmoid_focal_loss_xla(p1, t1, 2.0, 0.25, "none")
    check("tiny/mean", jax.block_until_ready(sigmoid_focal_loss(p1, t1)), ref1.mean())
    check("tiny/none",
          jax.block_until_ready(sigmoid_focal_loss(p1, t1, reduction="none")), ref1)

    # 2) Pallas kernel, single grid block, chunked inner loop (640*160 elements).
    n2, c2 = 640, 160
    p2 = jax.random.normal(k3, (n2, c2), jnp.float32)
    t2 = jax.random.bernoulli(k4, 0.3, (n2, c2)).astype(jnp.float32)
    ref2 = _sigmoid_focal_loss_xla(p2, t2, 2.0, 0.25, "none")
    check("single/mean",
          jax.block_until_ready(sigmoid_focal_loss(p2, t2, reduction="mean")), ref2.mean())
    check("single/sum",
          jax.block_until_ready(sigmoid_focal_loss(p2, t2, reduction="sum")), ref2.sum())
    check("single/none",
          jax.block_until_ready(sigmoid_focal_loss(p2, t2, reduction="none")), ref2)

    # 3) Pallas kernel, multi-tile grid with ragged-tail masking (block_rows forces it).
    n3, c3 = 500, 160
    p3 = jax.random.normal(k5, (n3, c3), jnp.float32)
    t3 = jax.random.bernoulli(k6, 0.3, (n3, c3)).astype(jnp.float32)
    ref3 = _sigmoid_focal_loss_xla(p3, t3, 2.0, 0.25, "none")
    check("ragged/mean", jax.block_until_ready(
        sigmoid_focal_loss(p3, t3, reduction="mean", block_rows=256)), ref3.mean())
    check("ragged/sum", jax.block_until_ready(
        sigmoid_focal_loss(p3, t3, reduction="sum", block_rows=256)), ref3.sum())
    check("ragged/none", jax.block_until_ready(
        sigmoid_focal_loss(p3, t3, reduction="none", block_rows=256)), ref3)

    # 4) Narrow (bfloat16) target stream — exact 0/1 values, halves target HBM traffic.
    out_bf16 = jax.block_until_ready(
        sigmoid_focal_loss(p2, t2.astype(jnp.bfloat16), reduction="mean"))
    check("bf16-target/mean", out_bf16, ref2.mean())

    print("KERNEL_OK")
</pallas_src>

<mosaic_0001>
module attributes {stable_mosaic.version = 11 : i64} {
  func.func @_partial_sum_kernel(%arg0: i32, %arg1: memref<640x160xf32, #tpu.memory_space<vmem>>, %arg2: memref<640x160xf32, #tpu.memory_space<vmem>>, %arg3: memref<8x128xf32, #tpu.memory_space<vmem>>) attributes {dimension_semantics = [#tpu.dimension_semantics<parallel>], iteration_bounds = array<i64: 1>, scalar_prefetch = 0 : i64, scratch_operands = 0 : i64, tpu.core_type = #tpu.core_type<tc>, window_params = [{transform_indices = @transform_0, window_bounds = array<i64: 640, 160>}, {transform_indices = @transform_1, window_bounds = array<i64: 640, 160>}, {transform_indices = @transform_2, window_bounds = array<i64: 8, 128>}]} {
    %cst = arith.constant 0.000000e+00 : f32
    %0 = vector.broadcast %cst : f32 to vector<1x1xf32>
    %c0_i32 = arith.constant 0 : i32
    %c2_i32 = arith.constant 2 : i32
    %1 = arith.addi %c0_i32, %c2_i32 : i32
    %c1_i32 = arith.constant 1 : i32
    %2 = scf.for %arg4 = %c0_i32 to %1 step %c1_i32 iter_args(%arg5 = %0) -> (vector<1x1xf32>)  : i32 {
      %c256_i32 = arith.constant 256 : i32
      %56 = arith.muli %arg4, %c256_i32 : i32
      %57 = tpu.assume_multiple %56, 32 : i32
      %58 = arith.index_cast %57 : i32 to index
      %c0_18 = arith.constant 0 : index
      %59 = vector.load %arg1[%58, %c0_18] : memref<640x160xf32, #tpu.memory_space<vmem>>, vector<256x160xf32>
      %60 = arith.index_cast %57 : i32 to index
      %c0_19 = arith.constant 0 : index
      %61 = vector.load %arg2[%60, %c0_19] : memref<640x160xf32, #tpu.memory_space<vmem>>, vector<256x160xf32>
      %cst_20 = arith.constant 2.500000e-01 : f32
      %62 = vector.broadcast %cst_20 : f32 to vector<256x160xf32>
      %63 = arith.mulf %61, %62 : vector<256x160xf32>
      %cst_21 = arith.constant 1.000000e+00 : f32
      %64 = vector.broadcast %cst_21 : f32 to vector<256x160xf32>
      %65 = arith.subf %64, %61 : vector<256x160xf32>
      %cst_22 = arith.constant 7.500000e-01 : f32
      %66 = vector.broadcast %cst_22 : f32 to vector<256x160xf32>
      %67 = arith.mulf %65, %66 : vector<256x160xf32>
      %68 = arith.addf %63, %67 : vector<256x160xf32>
      %69 = math.absf %59 : vector<256x160xf32>
      %cst_23 = arith.constant 0.000000e+00 : f32
      %70 = vector.broadcast %cst_23 : f32 to vector<256x160xf32>
      %71 = arith.subf %70, %69 : vector<256x160xf32>
      %72 = math.exp %71 : vector<256x160xf32>
      %cst_24 = arith.constant 1.000000e+00 : f32
      %73 = vector.broadcast %cst_24 : f32 to vector<256x160xf32>
      %74 = arith.addf %73, %72 : vector<256x160xf32>
      %75 = tpu.reciprocal %74 {approx = true} : vector<256x160xf32> -> vector<256x160xf32>
      %76 = arith.mulf %74, %75 : vector<256x160xf32>
      %cst_25 = arith.constant 2.000000e+00 : f32
      %77 = vector.broadcast %cst_25 : f32 to vector<256x160xf32>
      %78 = arith.subf %77, %76 : vector<256x160xf32>
      %79 = arith.mulf %75, %78 : vector<256x160xf32>
      %cst_26 = arith.constant 0.000000e+00 : f32
      %80 = vector.broadcast %cst_26 : f32 to vector<256x160xf32>
      %81 = arith.cmpf oge, %59, %80 : vector<256x160xf32>
      %82 = arith.mulf %72, %79 : vector<256x160xf32>
      %83 = arith.select %81, %79, %82 : vector<256x160xi1>, vector<256x160xf32>
      %84 = arith.mulf %83, %61 : vector<256x160xf32>
      %cst_27 = arith.constant 1.000000e+00 : f32
      %85 = vector.broadcast %cst_27 : f32 to vector<256x160xf32>
      %86 = arith.subf %85, %83 : vector<256x160xf32>
      %cst_28 = arith.constant 1.000000e+00 : f32
      %87 = vector.broadcast %cst_28 : f32 to vector<256x160xf32>
      %88 = arith.subf %87, %61 : vector<256x160xf32>
      %89 = arith.mulf %86, %88 : vector<256x160xf32>
      %90 = arith.addf %84, %89 : vector<256x160xf32>
      %cst_29 = arith.constant 1.000000e+00 : f32
      %91 = vector.broadcast %cst_29 : f32 to vector<256x160xf32>
      %92 = arith.subf %91, %90 : vector<256x160xf32>
      %93 = arith.mulf %92, %92 : vector<256x160xf32>
      %cst_30 = arith.constant 0.000000e+00 : f32
      %94 = vector.broadcast %cst_30 : f32 to vector<256x160xf32>
      %95 = arith.maximumf %59, %94 : vector<256x160xf32>
      %96 = arith.mulf %59, %61 : vector<256x160xf32>
      %97 = arith.subf %95, %96 : vector<256x160xf32>
      %98 = math.log1p %72 : vector<256x160xf32>
      %99 = arith.addf %97, %98 : vector<256x160xf32>
      %100 = arith.mulf %68, %93 : vector<256x160xf32>
      %101 = arith.mulf %100, %99 : vector<256x160xf32>
      %cst_31 = arith.constant dense<0.000000e+00> : vector<256xf32>
      %102 = vector.multi_reduction <add>, %101, %cst_31 [1] : vector<256x160xf32> to vector<256xf32>
      %103 = vector.shape_cast %102 : vector<256xf32> to vector<256x1xf32>
      %104 = vector.shape_cast %103 : vector<256x1xf32> to vector<1x256x1xf32>
      %cst_32 = arith.constant dense<0.000000e+00> : vector<1xf32>
      %105 = vector.multi_reduction <add>, %104, %cst_32 [1, 2] : vector<1x256x1xf32> to vector<1xf32>
      %106 = vector.shape_cast %105 : vector<1xf32> to vector<1x1x1xf32>
      %107 = vector.extract %106[0, 0, 0] : f32 from vector<1x1x1xf32>
      %108 = vector.broadcast %107 : f32 to vector<1x1xf32>
      %109 = arith.addf %arg5, %108 : vector<1x1xf32>
      scf.yield %109 : vector<1x1xf32>
    }
    %c2_i32_0 = arith.constant 2 : i32
    %c512 = arith.constant 512 : index
    %c0 = arith.constant 0 : index
    %3 = vector.load %arg1[%c512, %c0] : memref<640x160xf32, #tpu.memory_space<vmem>>, vector<128x160xf32>
    %c512_1 = arith.constant 512 : index
    %c0_2 = arith.constant 0 : index
    %4 = vector.load %arg2[%c512_1, %c0_2] : memref<640x160xf32, #tpu.memory_space<vmem>>, vector<128x160xf32>
    %cst_3 = arith.constant 2.500000e-01 : f32
    %5 = vector.broadcast %cst_3 : f32 to vector<128x160xf32>
    %6 = arith.mulf %4, %5 : vector<128x160xf32>
    %cst_4 = arith.constant 1.000000e+00 : f32
    %7 = vector.broadcast %cst_4 : f32 to vector<128x160xf32>
    %8 = arith.subf %7, %4 : vector<128x160xf32>
    %cst_5 = arith.constant 7.500000e-01 : f32
    %9 = vector.broadcast %cst_5 : f32 to vector<128x160xf32>
    %10 = arith.mulf %8, %9 : vector<128x160xf32>
    %11 = arith.addf %6, %10 : vector<128x160xf32>
    %12 = math.absf %3 : vector<128x160xf32>
    %cst_6 = arith.constant 0.000000e+00 : f32
    %13 = vector.broadcast %cst_6 : f32 to vector<128x160xf32>
    %14 = arith.subf %13, %12 : vector<128x160xf32>
    %15 = math.exp %14 : vector<128x160xf32>
    %cst_7 = arith.constant 1.000000e+00 : f32
    %16 = vector.broadcast %cst_7 : f32 to vector<128x160xf32>
    %17 = arith.addf %16, %15 : vector<128x160xf32>
    %18 = tpu.reciprocal %17 {approx = true} : vector<128x160xf32> -> vector<128x160xf32>
    %19 = arith.mulf %17, %18 : vector<128x160xf32>
    %cst_8 = arith.constant 2.000000e+00 : f32
    %20 = vector.broadcast %cst_8 : f32 to vector<128x160xf32>
    %21 = arith.subf %20, %19 : vector<128x160xf32>
    %22 = arith.mulf %18, %21 : vector<128x160xf32>
    %cst_9 = arith.constant 0.000000e+00 : f32
    %23 = vector.broadcast %cst_9 : f32 to vector<128x160xf32>
    %24 = arith.cmpf oge, %3, %23 : vector<128x160xf32>
    %25 = arith.mulf %15, %22 : vector<128x160xf32>
    %26 = arith.select %24, %22, %25 : vector<128x160xi1>, vector<128x160xf32>
    %27 = arith.mulf %26, %4 : vector<128x160xf32>
    %cst_10 = arith.constant 1.000000e+00 : f32
    %28 = vector.broadcast %cst_10 : f32 to vector<128x160xf32>
    %29 = arith.subf %28, %26 : vector<128x160xf32>
    %cst_11 = arith.constant 1.000000e+00 : f32
    %30 = vector.broadcast %cst_11 : f32 to vector<128x160xf32>
    %31 = arith.subf %30, %4 : vector<128x160xf32>
    %32 = arith.mulf %29, %31 : vector<128x160xf32>
    %33 = arith.addf %27, %32 : vector<128x160xf32>
    %cst_12 = arith.constant 1.000000e+00 : f32
    %34 = vector.broadcast %cst_12 : f32 to vector<128x160xf32>
    %35 = arith.subf %34, %33 : vector<128x160xf32>
    %36 = arith.mulf %35, %35 : vector<128x160xf32>
    %cst_13 = arith.constant 0.000000e+00 : f32
    %37 = vector.broadcast %cst_13 : f32 to vector<128x160xf32>
    %38 = arith.maximumf %3, %37 : vector<128x160xf32>
    %39 = arith.mulf %3, %4 : vector<128x160xf32>
    %40 = arith.subf %38, %39 : vector<128x160xf32>
    %41 = math.log1p %15 : vector<128x160xf32>
    %42 = arith.addf %40, %41 : vector<128x160xf32>
    %43 = arith.mulf %11, %36 : vector<128x160xf32>
    %44 = arith.mulf %43, %42 : vector<128x160xf32>
    %cst_14 = arith.constant dense<0.000000e+00> : vector<128xf32>
    %45 = vector.multi_reduction <add>, %44, %cst_14 [1] : vector<128x160xf32> to vector<128xf32>
    %46 = vector.shape_cast %45 : vector<128xf32> to vector<128x1xf32>
    %47 = vector.shape_cast %46 : vector<128x1xf32> to vector<1x128x1xf32>
    %cst_15 = arith.constant dense<0.000000e+00> : vector<1xf32>
    %48 = vector.multi_reduction <add>, %47, %cst_15 [1, 2] : vector<1x128x1xf32> to vector<1xf32>
    %49 = vector.shape_cast %48 : vector<1xf32> to vector<1x1x1xf32>
    %50 = vector.extract %49[0, 0, 0] : f32 from vector<1x1x1xf32>
    %51 = vector.broadcast %50 : f32 to vector<1x1xf32>
    %52 = arith.addf %2, %51 : vector<1x1xf32>
    %53 = vector.shape_cast %52 : vector<1x1xf32> to vector<1x1xf32>
    %54 = vector.broadcast %53 : vector<1x1xf32> to vector<8x128xf32>
    %c0_16 = arith.constant 0 : index
    %c0_17 = arith.constant 0 : index
    %55 = vector.load %arg3[%c0_16, %c0_17] : memref<8x128xf32, #tpu.memory_space<vmem>>, vector<8x128xf32>
    tpu.vector_store %arg3[%c0_16, %c0_17], %54 {strides = array<i32>} : memref<8x128xf32, #tpu.memory_space<vmem>>, vector<8x128xf32>,
    return
  }
  func.func @transform_0(%arg0: i32) -> (i32, i32) {
    %c0_i32 = arith.constant 0 : i32
    %c0_i32_0 = arith.constant 0 : i32
    return %arg0, %c0_i32 : i32, i32
  }
  func.func @transform_1(%arg0: i32) -> (i32, i32) {
    %c0_i32 = arith.constant 0 : i32
    %c0_i32_0 = arith.constant 0 : i32
    return %arg0, %c0_i32 : i32, i32
  }
  func.func @transform_2(%arg0: i32) -> (i32, i32) {
    %c0_i32 = arith.constant 0 : i32
    %c0_i32_0 = arith.constant 0 : i32
    return %arg0, %c0_i32 : i32, i32
  }
}

</mosaic_0001>

<bundles_post_ra>
// kernel: tpu_custom_call.1
= control target key start
LH: loop header
LB: loop body
LE: loop exit
PB: predicated region body
PF: predicated region fallthrough
CT: control target
= control target key end

     0   :  { %7 = vsyncpa [#allocation3], 0  ;;  %v4769_v0 = vmov 0.0   ;;  %s4771_s9 = smov 0   ;;  %s8796_s0 = inlined_call_operand.vmem [shape: f32[640,160], index: 0, kind: input, shape index: {}]   ;;  %s8797_s1 = inlined_call_operand.vmem [shape: f32[640,160], index: 1, kind: input, shape index: {}]   ;;  %s8798_s2 = inlined_call_operand.hbm [shape: f32[8,128], index: 2, kind: output, shape index: {}]  }
   0x1 LB: > { %8820 = vst [vmem:[#allocation5_spill] sm:$0xff] %v4747_v0  ;;  %s4110_s10 = sshll.u32 %s4751_s9, 8  ;;  %vm2523_vm9 = vcmask 261120   ;;  %s17_s9 = sadd.s32 1, %s4751_s9   ;;  %s4751_s9 = sphi %s4771_s9, %s17_s9   ;;  %v4747_v0 = vphi %v4769_v0, %v8962_v0  }
   0x2   : > { %s20_s11 = sshra.s32 %s4110_s10, 3  ;;  %p14_p0 = scmp.ge.s32.totalorder %s17_s9, 2  }
   0x3   : > { %s4114_s12 = sshll.u32 %s20_s11, 4 }
   0x4   : > { %s4783_s15 = scalar_lea.vmem %s8796_s0, %s4114_s12  ;;  %s4799_s18 = scalar_lea.vmem %s8797_s1, %s4114_s12 }
   0x5   : > { %v4786_v1 = vld [vmem:[%s4783_s15] sm:$0xff]  ;;  %v4789_v2 = vld [vmem:[%s4783_s15 + $0x8] sm:$0xff]  ;;  %v4813_v17 = vld [vmem:[%s4783_s15 + $0x10] sm:$0xff] }
   0x6   : > { %v411_v3 = vand.u32 2147483647, %v4786_v1  ;;  %v412_v4 = vand.u32 2147483647, %v4789_v2  ;;  %v4794_v7 = vld [vmem:[%s4783_s15 + $0x20] sm:$0xff]  ;;  %v4802_v9 = vld [vmem:[%s4783_s15 + $0x28] sm:$0xff] }
   0x7   : > { %v415_v11 = vand.u32 2147483647, %v4794_v7  ;;  %v4806_v12 = vld [vmem:[%s4799_s18] sm:$0xff]  ;;  %v416_v13 = vand.u32 2147483647, %v4802_v9  ;;  %v4810_v15 = vld [vmem:[%s4799_s18 + $0x8] sm:$0xff] }
   0x8   : > { %v475_v5 = vsub.f32 0.0, %v411_v3  ;;  %v476_v6 = vsub.f32 0.0, %v412_v4  ;;  %v8804_v18 = vsub.f32 1.0, %v4806_v12  ;;  %v4817_v20 = vld [vmem:[%s4783_s15 + $0x18] sm:$0xff]  ;;  %v155_v21 = vmul.f32 0.25, %v4806_v12  ;;  %v4822_v23 = vld [vmem:[%s4799_s18 + $0x20] sm:$0xff] }
   0x9   : > { %v479_v14 = vsub.f32 0.0, %v415_v11  ;;  %v480_v16 = vsub.f32 0.0, %v416_v13  ;;  %v156_v22 = vmul.f32 0.25, %v4810_v15  ;;  %v4825_v24 = vld [vmem:[%s4799_s18 + $0x28] sm:$0xff]  ;;  %v8803_v26 = vsub.f32 1.0, %v4810_v15  ;;  %v4865_v53 = vld [vmem:[%s4799_s18 + $0x10] sm:$0xff] }
   0xa   : > { %v539_v8 = vmul.f32 1.442695, %v475_v5  ;;  %v541_v10 = vmul.f32 1.442695, %v476_v6  ;;  %v283_v27 = vmul.f32 0.75, %v8804_v18  ;;  %v1563_v29 = vmax.f32 %v4786_v1, 0.0 }
   0xb   : > { %v547_v19 = vmul.f32 1.442695, %v479_v14  ;;  %v549_v25 = vmul.f32 1.442695, %v480_v16  ;;  %v413_v28 = vand.u32 2147483647, %v4813_v17  ;;  %v1627_v36 = vmul.f32 %v4806_v12, %v4786_v1 }
   0xc   : > { %4137 = vpow2.f32 %v539_v8  ;;  %v1564_v30 = vmax.f32 %v4789_v2, 0.0  ;;  %v414_v31 = vand.u32 2147483647, %v4817_v20  ;;  %v284_v32 = vmul.f32 0.75, %v8803_v26  ;;  %v4872_v56 = vld [vmem:[%s4799_s18 + $0x18] sm:$0xff]  ;;  %v4897_v8 = vld [vmem:[%s4783_s15 + $0x30] sm:$0xff] }
   0xd   : > { %4139 = vpow2.f32 %v541_v10  ;;  %v8802_v33 = vsub.f32 1.0, %v4822_v23  ;;  %v8801_v34 = vsub.f32 1.0, %v4825_v24  ;;  %v477_v35 = vsub.f32 0.0, %v413_v28  ;;  %8821 = vst [vmem:[#allocation6_spill] sm:$0xff] %v4897_v8 }
   0xe   : > { %4141 = vpow2.f32 %v547_v19  ;;  %v1628_v37 = vmul.f32 %v4810_v15, %v4789_v2  ;;  %v159_v38 = vmul.f32 0.25, %v4822_v23  ;;  %v478_v39 = vsub.f32 0.0, %v414_v31 }
   0xf   : > { %4143 = vpow2.f32 %v549_v25  ;;  %v160_v41 = vmul.f32 0.25, %v4825_v24  ;;  %v287_v42 = vmul.f32 0.75, %v8802_v33  ;;  %v288_v43 = vmul.f32 0.75, %v8801_v34  ;;  %v4919_v25 = vld [vmem:[%s4783_s15 + $0x38] sm:$0xff] }
  0x10   : > { %v543_v44 = vmul.f32 1.442695, %v477_v35  ;;  %v4852_v46 = vadd.f32 %v283_v27, %v155_v21  ;;  %v1567_v48 = vmax.f32 %v4794_v7, 0.0  ;;  %v1631_v49 = vmul.f32 %v4822_v23, %v4794_v7  ;;  %8822 = vst [vmem:[#allocation7_spill] sm:$0xff] %v4919_v25 }
  0x11   : > { %v1568_v51 = vmax.f32 %v4802_v9, 0.0  ;;  %v1632_v52 = vmul.f32 %v4825_v24, %v4802_v9  ;;  %v4867_v54 = vadd.f32 %v284_v32, %v156_v22  ;;  %v4869_v55 = vsub.f32 %v1563_v29, %v1627_v36 }
  0x12   : > { %4145 = vpow2.f32 %v543_v44  ;;  %v545_v57 = vmul.f32 1.442695, %v478_v39  ;;  %v4875_v58 = vsub.f32 %v1564_v30, %v1628_v37  ;;  %v4877_v59 = vadd.f32 %v287_v42, %v159_v38 }
  0x13   : > { %v4879_v60 = vadd.f32 %v288_v43, %v160_v41  ;;  %v4881_v61 = vsub.f32 %v1567_v48, %v1631_v49  ;;  %v4884_v62 = vmul.f32 0.25, %v4865_v53  ;;  %v8800_v63 = vsub.f32 1.0, %v4865_v53 }
  0x14   : > { %v4890_v4 = vsub.f32 %v1568_v51, %v1632_v52  ;;  %v4893_v5 = vmul.f32 0.25, %v4872_v56  ;;  %v8799_v6 = vsub.f32 1.0, %v4872_v56  ;;  %v417_v29 = vand.u32 2147483647, %v4897_v8 }
  0x15   : > { %v4907_v14 = vmul.f32 0.75, %v8800_v63  ;;  %vm987_vm0 = vcmp.ge.f32.partialorder %v4786_v1, 0.0  ;;  %v4933_v36 = vmul.f32 %v4865_v53, %v4813_v17  ;;  %v418_v37 = vand.u32 2147483647, %v4919_v25 }
  0x16   : > { %v4843_v40 = vpop.eup %4137  ;;  %v4916_v22 = vmul.f32 0.75, %v8799_v6  ;;  %vm988_vm1 = vcmp.ge.f32.partialorder %v4789_v2, 0.0  ;;  %v4946_v43 = vmul.f32 %v4872_v56, %v4817_v20  ;;  %v481_v52 = vsub.f32 0.0, %v417_v29 }
  0x17   : > { %v4850_v45 = vpop.eup %4139  ;;  %v667_v47 = vadd.f32 1.0, %v4843_v40  ;;  %v1758_v11 = vmul.f32 -0.5, %v4843_v40  ;;  %v1761_v16 = vand.u32 2147483647, %v4843_v40  ;;  %v482_v6 = vsub.f32 0.0, %v418_v37 }
  0x18   : > { %v4859_v50 = vadd.f32 1.0, %v4850_v45  ;;  %v4887_v3 = vpop.eup %4141  ;;  %v1767_v19 = vmul.f32 -0.5, %v4850_v45  ;;  %v1770_v30 = vand.u32 2147483647, %v4850_v45  ;;  %vm991_vm5 = vcmp.ge.f32.partialorder %v4794_v7, 0.0 }
  0x19   : > { %4147 = vrcp.f32 %v667_v47  ;;  %v4899_v10 = vpop.eup %4143  ;;  %v4903_v13 = vadd.f32 1.0, %v4887_v3  ;;  %v1794_v27 = vmul.f32 -0.5, %v4887_v3  ;;  %v1759_v35 = vadd.f32 1.0, %v1758_v11 }
  0x1a   : > { %4149 = vrcp.f32 %v4859_v50  ;;  %v4912_v21 = vadd.f32 1.0, %v4899_v10  ;;  %v1803_v31 = vmul.f32 -0.5, %v4899_v10  ;;  %vm4939_vm2 = vcmp.lt.f32.partialorder %v1761_v16, 0.0004427343 }
  0x1b   : > { %4151 = vlog2.f32 %v667_v47  ;;  %v1768_v41 = vadd.f32 1.0, %v1767_v19  ;;  %v1797_v42 = vand.u32 2147483647, %v4887_v3  ;;  %v1795_v48 = vadd.f32 1.0, %v1794_v27 }
  0x1c   : > { %4153 = vlog2.f32 %v4859_v50  ;;  %v4936_v38 = vpop.eup %4145  ;;  %vm4952_vm3 = vcmp.lt.f32.partialorder %v1770_v30, 0.0004427343  ;;  %v1804_v19 = vadd.f32 1.0, %v1803_v31  ;;  %v1760_v27 = vmul.f32 %v4843_v40, %v1759_v35 }
  0x1d   : > { %4155 = vpow2.f32 %v545_v57  ;;  %v4949_v49 = vadd.f32 1.0, %v4936_v38  ;;  %v1776_v51 = vmul.f32 -0.5, %v4936_v38  ;;  %v4961_v29 = vmul.f32 %v4850_v45, %v1768_v41 }
  0x1e   : > { %4157 = vrcp.f32 %v4903_v13  ;;  %vm4963_vm4 = vcmp.lt.f32.partialorder %v1797_v42, 0.0004427343  ;;  %v1806_v30 = vand.u32 2147483647, %v4899_v10  ;;  %v551_v37 = vmul.f32 1.442695, %v481_v52 }
  0x1f   : > { %4159 = vrcp.f32 %v4912_v21  ;;  %v1777_v35 = vadd.f32 1.0, %v1776_v51  ;;  %vm992_vm6 = vcmp.ge.f32.partialorder %v4802_v9, 0.0  ;;  %v4976_v41 = vmul.f32 %v4899_v10, %v1804_v19 }
  0x20   : > { %4161 = vlog2.f32 %v4903_v13  ;;  %vm5000_vm7 = vcmp.lt.f32.partialorder %v1806_v30, 0.0004427343  ;;  %vm989_vm8 = vcmp.ge.f32.partialorder %v4813_v17, 0.0  ;;  %vm990_vm10 = vcmp.ge.f32.partialorder %v4817_v20, 0.0 }
  0x21   : > { %4163 = vlog2.f32 %v4912_v21 }
  0x22   : > { %4165 = vrcp.f32 %v4949_v49 }
  0x23   : > { %v4148_v44 = vpop.eup %4147  ;;  %4167 = vlog2.f32 %v4949_v49 }
  0x24   : > { %v4150_v57 = vpop.eup %4149  ;;  %v795_v11 = vmul.f32 %v4148_v44, %v667_v47 }
  0x25   : > { %v4152_v32 = vpop.eup %4151  ;;  %v796_v28 = vmul.f32 %v4150_v57, %v4859_v50  ;;  %v4972_v50 = vmul.f32 %v4887_v3, %v1795_v48  ;;  %v4983_v48 = vmul.f32 1.442695, %v482_v6 }
  0x26   : > { %v4154_v63 = vpop.eup %4153  ;;  %v859_v34 = vsub.f32 2.0, %v795_v11  ;;  %v1757_v26 = vmul.f32 0.6931472, %v4152_v32 }
  0x27   : > { %v4968_v31 = vpop.eup %4155  ;;  %v860_v33 = vsub.f32 2.0, %v796_v28  ;;  %v1766_v32 = vmul.f32 0.6931472, %v4154_v63 }
  0x28   : > { %v923_v11 = vmul.f32 %v4148_v44, %v859_v34  ;;  %v4979_v42 = vadd.f32 1.0, %v4968_v31  ;;  %v4158_v18 = vpop.eup %4157 }
  0x29   : > { %v924_v0 = vmul.f32 %v4150_v57, %v860_v33  ;;  %v4160_v51 = vpop.eup %4159  ;;  %v799_v44 = vmul.f32 %v4158_v18, %v4903_v13  ;;  %v4991_v33 = vmul.f32 %v4936_v38, %v1777_v35 }
  0x2a   : > { %v1051_v34 = vmul.f32 %v4843_v40, %v923_v11  ;;  %4169 = vrcp.f32 %v4979_v42  ;;  %v4162_v52 = vpop.eup %4161  ;;  %v800_v25 = vmul.f32 %v4160_v51, %v4912_v21  ;;  %v1763_v40 = vsel %vm4939_vm2, %v1760_v27, %v1757_v26 }
  0x2b   : > { %v1052_v19 = vmul.f32 %v4850_v45, %v924_v0  ;;  %4171 = vpow2.f32 %v551_v37  ;;  %v863_v63 = vsub.f32 2.0, %v799_v44  ;;  %v1793_v57 = vmul.f32 0.6931472, %v4162_v52  ;;  %v4164_v1 = vpop.eup %4163 }
  0x2c   : > { %v1115_v6 = vsel %vm987_vm0, %v923_v11, %v1051_v34  ;;  %v864_v8 = vsub.f32 2.0, %v800_v25  ;;  %v1785_v27 = vmul.f32 -0.5, %v4968_v31  ;;  %v4166_v37 = vpop.eup %4165  ;;  %v1772_v25 = vsel %vm4952_vm3, %v4961_v29, %v1766_v32 }
  0x2d   : > { %v1116_v13 = vsel %vm988_vm1, %v924_v0, %v1052_v19  ;;  %v1179_v28 = vmul.f32 %v1115_v6, %v4806_v12  ;;  %v1243_v45 = vsub.f32 1.0, %v1115_v6  ;;  %v927_v26 = vmul.f32 %v4158_v18, %v863_v63 }
  0x2e   : > { %v1180_v35 = vmul.f32 %v1116_v13, %v4810_v15  ;;  %v1244_v39 = vsub.f32 1.0, %v1116_v13  ;;  %v8831_v0 = vsub.f32 1.0, %v4806_v12  ;;  %v2331_v30 = vadd.f32 %v1763_v40, %v4869_v55 }
  0x2f   : > { %v928_v11 = vmul.f32 %v4160_v51, %v864_v8  ;;  %v8832_v34 = vsub.f32 1.0, %v4810_v15  ;;  %v1055_v52 = vmul.f32 %v4887_v3, %v927_v26  ;;  %v797_v18 = vmul.f32 %v4166_v37, %v4949_v49  ;;  %v4168_v49 = vpop.eup %4167 }
  0x30   : > { %v1307_v2 = vmul.f32 %v1243_v45, %v8831_v0  ;;  %v1788_v19 = vand.u32 2147483647, %v4968_v31  ;;  %v1799_v16 = vsel %vm4963_vm4, %v4972_v50, %v1793_v57  ;;  %4173 = vlog2.f32 %v4979_v42 }
  0x31   : > { %v1308_v44 = vmul.f32 %v1244_v39, %v8832_v34  ;;  %v1056_v12 = vmul.f32 %v4899_v10, %v928_v11  ;;  %v1119_v15 = vsel %vm991_vm5, %v927_v26, %v1055_v52  ;;  %v1802_v8 = vmul.f32 0.6931472, %v4164_v1 }
  0x32   : > { %v1371_v6 = vadd.f32 %v1307_v2, %v1179_v28  ;;  %v861_v3 = vsub.f32 2.0, %v797_v18  ;;  %v1183_v10 = vmul.f32 %v1119_v15, %v4822_v23  ;;  %v1247_v51 = vsub.f32 1.0, %v1119_v15 }
  0x33   : > { %v1372_v55 = vadd.f32 %v1308_v44, %v1180_v35  ;;  %v1120_v28 = vsel %vm992_vm6, %v928_v11, %v1056_v12  ;;  %v2332_v13 = vadd.f32 %v1772_v25, %v4875_v58  ;;  %v8833_v45 = vsub.f32 1.0, %v4822_v23 }
  0x34   : > { %v1435_v29 = vsub.f32 1.0, %v1371_v6  ;;  %v4170_v47 = vpop.eup %4169  ;;  %v1184_v32 = vmul.f32 %v1120_v28, %v4825_v24  ;;  %v1248_v40 = vsub.f32 1.0, %v1120_v28  ;;  %v925_v63 = vmul.f32 %v4166_v37, %v861_v3 }
  0x35   : > { %v1436_v50 = vsub.f32 1.0, %v1372_v55  ;;  %v5030_v7 = vpop.eup %4171  ;;  %v1311_v1 = vmul.f32 %v1247_v51, %v8833_v45  ;;  %v798_v9 = vmul.f32 %v4170_v47, %v4979_v42  ;;  %v8834_v39 = vsub.f32 1.0, %v4825_v24 }
  0x36   : > { %v1499_v57 = vmul.f32 %v1435_v29, %v1435_v29  ;;  %v1053_v0 = vmul.f32 %v4936_v38, %v925_v63  ;;  %v1786_v2 = vadd.f32 1.0, %v1785_v27  ;;  %v2335_v34 = vadd.f32 %v1799_v16, %v4881_v61 }
  0x37   : > { %v1500_v35 = vmul.f32 %v1436_v50, %v1436_v50  ;;  %v1312_v26 = vmul.f32 %v1248_v40, %v8834_v39  ;;  %v1375_v37 = vadd.f32 %v1311_v1, %v1183_v10  ;;  %v862_v44 = vsub.f32 2.0, %v798_v9 }
  0x38   : > { %v2395_v11 = vmul.f32 %v1499_v57, %v4852_v46  ;;  %v1808_v23 = vsel %vm5000_vm7, %v4976_v41, %v1802_v8  ;;  %v1117_v24 = vsel %vm989_vm8, %v925_v63, %v1053_v0  ;;  %v1775_v27 = vmul.f32 0.6931472, %v4168_v49 }
  0x39   : > { %v2396_v58 = vmul.f32 %v1500_v35, %v4867_v54  ;;  %v1376_v25 = vadd.f32 %v1312_v26, %v1184_v32  ;;  %v1439_v52 = vsub.f32 1.0, %v1375_v37  ;;  %v926_v18 = vmul.f32 %v4170_v47, %v862_v44 }
  0x3a   : > { %v2459_v42 = vmul.f32 %v2395_v11, %v2331_v30  ;;  %v1181_v12 = vmul.f32 %v1117_v24, %v4865_v53  ;;  %v1245_v61 = vsub.f32 1.0, %v1117_v24  ;;  %v4174_v16 = vpop.eup %4173  ;;  %4175 = vpow2.f32 %v4983_v48 }
  0x3b   : > { %v2460_v6 = vmul.f32 %v2396_v58, %v2332_v13  ;;  %v1440_v46 = vsub.f32 1.0, %v1376_v25  ;;  %v1503_v55 = vmul.f32 %v1439_v52, %v1439_v52  ;;  %v1054_v54 = vmul.f32 %v4968_v31, %v926_v18  ;;  %v97_v25 = vld [vmem:[%s4799_s18 + $0x30] sm:$0xff] }
  0x3c   : > { %v673_v41 = vadd.f32 1.0, %v5030_v7  ;;  %v2336_v30 = vadd.f32 %v1808_v23, %v4890_v4  ;;  %v8835_v8 = vsub.f32 1.0, %v4865_v53  ;;  %v8836_v4 = vand.u32 2147483647, %v4936_v38  ;;  %v5126_v53 = vld [vmem:[%s4799_s18 + $0x40] sm:$0xff] }
  0x3d   : > { %v2524_v21 = vsel %vm2523_vm9, %v2460_v6, 0.0  ;;  %v1504_v15 = vmul.f32 %v1440_v46, %v1440_v46  ;;  %v2399_v29 = vmul.f32 %v1503_v55, %v4877_v59  ;;  %v1118_v28 = vsel %vm990_vm10, %v926_v18, %v1054_v54 }
  0x3e   : > { %v1309_v3 = vmul.f32 %v1245_v61, %v8835_v8  ;;  %v2525_v49 = vadd.f32 %v2524_v21, %v2459_v42  ;;  %4177 = vrcp.f32 %v673_v41  ;;  %v1182_v48 = vmul.f32 %v1118_v28, %v4872_v56  ;;  %v5104_v42 = vld [vmem:[%s4799_s18 + $0x38] sm:$0xff]  ;;  %v8844_v8 = vld [vmem:[#allocation6_spill] sm:$0xff] }
  0x3f   : > { %v2400_v10 = vmul.f32 %v1504_v15, %v4879_v60  ;;  %v1246_v51 = vsub.f32 1.0, %v1118_v28  ;;  %v2463_v50 = vmul.f32 %v2399_v29, %v2335_v34  ;;  %vm5062_vm11 = vcmp.lt.f32.partialorder %v8836_v4, 0.0004427343 }
  0x40   : > { %v1373_v47 = vadd.f32 %v1309_v3, %v1181_v12  ;;  %2526 = vadd.xlane.f32.xlu0 %v2525_v49  ;;  %v1784_v59 = vmul.f32 0.6931472, %v4174_v16  ;;  %v1787_v32 = vmul.f32 %v4968_v31, %v1786_v2  ;;  %v8839_v60 = vsub.f32 1.0, %v4872_v56  ;;  %v5113_v3 = vld [vmem:[%s4783_s15 + $0x50] sm:$0xff]  ;;  %v5116_v49 = vld [vmem:[%s4783_s15 + $0x58] sm:$0xff] }
  0x41   : > { %v2464_v40 = vmul.f32 %v2400_v10, %v2336_v30  ;;  %vm5071_vm12 = vcmp.lt.f32.partialorder %v1788_v19, 0.0004427343  ;;  %v349_v38 = vadd.f32 %v4907_v14, %v4884_v62  ;;  %v8842_v45 = vmax.f32 %v4813_v17, 0.0  ;;  %v5088_v19 = vld [vmem:[%s4783_s15 + $0x40] sm:$0xff]  ;;  %v5091_v62 = vld [vmem:[%s4783_s15 + $0x48] sm:$0xff] }
  0x42   : > { %v1310_v63 = vmul.f32 %v1246_v51, %v8839_v60  ;;  %v1437_v57 = vsub.f32 1.0, %v1373_v47  ;;  %v8843_v9 = vmax.f32 %v4817_v20, 0.0  ;;  %v1781_v31 = vsel %vm5062_vm11, %v4991_v33, %v1775_v27 }
  0x43   : > { %v1693_v1 = vsub.f32 %v8842_v45, %v4933_v36  ;;  %v2532_v56 = vsel %vm2523_vm9, %v2464_v40, 0.0  ;;  %v1790_v17 = vsel %vm5071_vm12, %v1787_v32, %v1784_v59  ;;  %v350_v20 = vadd.f32 %v4916_v22, %v4893_v5 }
  0x44   : > { %v1694_v35 = vsub.f32 %v8843_v9, %v4946_v43  ;;  %v1374_v39 = vadd.f32 %v1310_v63, %v1182_v48  ;;  %v1501_v26 = vmul.f32 %v1437_v57, %v1437_v57  ;;  %v2533_v14 = vadd.f32 %v2532_v56, %v2463_v50  ;;  %v5097_v43 = vpop.eup %4175  ;;  %v8845_v48 = vld [vmem:[#allocation7_spill] sm:$0xff] }
  0x45   : > { %v2333_v0 = vadd.f32 %v1781_v31, %v1693_v1  ;;  %v419_v33 = vand.u32 2147483647, %v5088_v19  ;;  %v420_v11 = vand.u32 2147483647, %v5091_v62  ;;  %v674_v44 = vadd.f32 1.0, %v5097_v43 }
  0x46   : > { %v1438_v36 = vsub.f32 1.0, %v1374_v39  ;;  %2534 = vadd.xlane.f32.xlu1 %v2533_v14  ;;  %v2397_v2 = vmul.f32 %v1501_v26, %v349_v38  ;;  %v2334_v34 = vadd.f32 %v1790_v17, %v1694_v35  ;;  %v225_v27 = vsub.f32 1.0, %v97_v25  ;;  %v5137_v26 = vld [vmem:[%s4799_s18 + $0x48] sm:$0xff] }
  0x47   : > { %v483_v23 = vsub.f32 0.0, %v419_v33  ;;  %4179 = vrcp.f32 %v674_v44  ;;  %v484_v52 = vsub.f32 0.0, %v420_v11  ;;  %v161_v46 = vmul.f32 0.25, %v97_v25 }
  0x48   : > { %v1502_v37 = vmul.f32 %v1438_v36, %v1438_v36  ;;  %v4178_v58 = vpop.eup %4177  ;;  %v2461_v22 = vmul.f32 %v2397_v2, %v2333_v0  ;;  %4181 = vlog2.f32 %v673_v41  ;;  %v226_v12 = vsub.f32 1.0, %v5104_v42 }
  0x49   : > { %v801_v5 = vmul.f32 %v4178_v58, %v673_v41  ;;  %v555_v61 = vmul.f32 1.442695, %v483_v23  ;;  %v557_v16 = vmul.f32 1.442695, %v484_v52  ;;  %v162_v54 = vmul.f32 0.25, %v5104_v42 }
  0x4a   : > { %v2398_v24 = vmul.f32 %v1502_v37, %v350_v20  ;;  %v289_v21 = vmul.f32 0.75, %v225_v27  ;;  %v290_v41 = vmul.f32 0.75, %v226_v12  ;;  %vm993_vm13 = vcmp.ge.f32.partialorder %v8844_v8, 0.0 }
  0x4b   : > { %v865_v6 = vsub.f32 2.0, %v801_v5  ;;  %4183 = vpow2.f32 %v555_v61  ;;  %v1812_v28 = vmul.f32 -0.5, %v5030_v7  ;;  %v1569_v10 = vmax.f32 %v8844_v8, 0.0 }
  0x4c   : > { %v2462_v18 = vmul.f32 %v2398_v24, %v2334_v34  ;;  %4185 = vpow2.f32 %v557_v16  ;;  %v1570_v51 = vmax.f32 %v8845_v48, 0.0  ;;  %v1633_v47 = vmul.f32 %v97_v25, %v8844_v8 }
  0x4d   : > { %v929_v15 = vmul.f32 %v4178_v58, %v865_v6  ;;  %v1634_v50 = vmul.f32 %v5104_v42, %v8845_v48  ;;  %4187 = vlog2.f32 %v674_v44  ;;  %v421_v59 = vand.u32 2147483647, %v5113_v3 }
  0x4e   : > { %v2528_v55 = vsel %vm2523_vm9, %v2462_v18, 0.0  ;;  %v422_v32 = vand.u32 2147483647, %v5116_v49  ;;  %v5130_v40 = vadd.f32 %v289_v21, %v161_v46  ;;  %v5132_v60 = vadd.f32 %v290_v41, %v162_v54 }
  0x4f   : > { %v2529_v30 = vadd.f32 %v2528_v55, %v2461_v22  ;;  %v1057_v29 = vmul.f32 %v5030_v7, %v929_v15  ;;  %vm994_vm14 = vcmp.ge.f32.partialorder %v8845_v48, 0.0  ;;  %v1813_v13 = vadd.f32 1.0, %v1812_v28 }
  0x50   : > { %v1815_v38 = vand.u32 2147483647, %v5030_v7  ;;  %v485_v45 = vsub.f32 0.0, %v421_v59  ;;  %v486_v1 = vsub.f32 0.0, %v422_v32  ;;  %v227_v31 = vsub.f32 1.0, %v5126_v53 }
  0x51   : > { %2530 = vadd.xlane.f32.xlu0 %v2529_v30  ;;  %v1121_v4 = vsel %vm993_vm13, %v929_v15, %v1057_v29  ;;  %v4180_v57 = vpop.eup %4179  ;;  %v1697_v14 = vsub.f32 %v1569_v10, %v1633_v47  ;;  %v5140_v17 = vsub.f32 %v1570_v51, %v1634_v50  ;;  %v1821_v2 = vmul.f32 -0.5, %v5097_v43  ;;  %v5181_v47 = vld [vmem:[%s4799_s18 + $0x58] sm:$0xff] }
  0x52   : > { %v1249_v63 = vsub.f32 1.0, %v1121_v4  ;;  %v4182_v9 = vpop.eup %4181  ;;  %v802_v35 = vmul.f32 %v4180_v57, %v674_v44  ;;  %v1185_v56 = vmul.f32 %v1121_v4, %v97_v25  ;;  %v559_v20 = vmul.f32 1.442695, %v485_v45 }
  0x53   : > { %v561_v36 = vmul.f32 1.442695, %v486_v1  ;;  %v163_v33 = vmul.f32 0.25, %v5126_v53  ;;  %v291_v11 = vmul.f32 0.75, %v227_v31  ;;  %v1811_v37 = vmul.f32 0.6931472, %v4182_v9 }
  0x54   : > { %v1313_v39 = vmul.f32 %v1249_v63, %v225_v27  ;;  %v866_v0 = vsub.f32 2.0, %v802_v35  ;;  %v1814_v34 = vmul.f32 %v5030_v7, %v1813_v13  ;;  %v228_v44 = vsub.f32 1.0, %v5137_v26  ;;  %v5162_v27 = vld [vmem:[%s4799_s18 + $0x50] sm:$0xff] }
  0x55   : > { %4189 = vpow2.f32 %v559_v20  ;;  %v5148_v58 = vpop.eup %4183  ;;  %vm5150_vm15 = vcmp.lt.f32.partialorder %v1815_v38, 0.0004427343  ;;  %v1824_v22 = vand.u32 2147483647, %v5097_v43  ;;  %v164_v52 = vmul.f32 0.25, %v5137_v26 }
  0x56   : > { %v930_v25 = vmul.f32 %v4180_v57, %v866_v0  ;;  %v1377_v23 = vadd.f32 %v1313_v39, %v1185_v56  ;;  %4191 = vpow2.f32 %v561_v36  ;;  %v5154_v5 = vpop.eup %4185  ;;  %v292_v7 = vmul.f32 0.75, %v228_v44  ;;  %v5207_v56 = vld [vmem:[%s4783_s15 + $0x68] sm:$0xff] }
  0x57   : > { %v675_v18 = vadd.f32 1.0, %v5148_v58  ;;  %v1822_v46 = vadd.f32 1.0, %v1821_v2  ;;  %v5165_v61 = vadd.f32 %v291_v11, %v163_v33  ;;  %v676_v16 = vadd.f32 1.0, %v5154_v5  ;;  %v4188_v55 = vpop.eup %4187 }
  0x58   : > { %v1058_v6 = vmul.f32 %v5097_v43, %v930_v25  ;;  %v1817_v54 = vsel %vm5150_vm15, %v1814_v34, %v1811_v37  ;;  %v1571_v21 = vmax.f32 %v5088_v19, 0.0  ;;  %v1635_v15 = vmul.f32 %v5126_v53, %v5088_v19 }
  0x59   : > { %4193 = vrcp.f32 %v675_v18  ;;  %v1441_v41 = vsub.f32 1.0, %v1377_v23  ;;  %v229_v8 = vsub.f32 1.0, %v5162_v27  ;;  %v1572_v10 = vmax.f32 %v5091_v62, 0.0 }
  0x5a   : > { %v1122_v30 = vsel %vm994_vm14, %v930_v25, %v1058_v6  ;;  %4195 = vrcp.f32 %v676_v16  ;;  %v1636_v51 = vmul.f32 %v5137_v26, %v5091_v62  ;;  %v1820_v50 = vmul.f32 0.6931472, %v4188_v55 }
  0x5b   : > { %v1186_v29 = vmul.f32 %v1122_v30, %v5104_v42  ;;  %v1250_v28 = vsub.f32 1.0, %v1122_v30  ;;  %v1823_v4 = vmul.f32 %v5097_v43, %v1822_v46  ;;  %v165_v48 = vmul.f32 0.25, %v5162_v27 }
  0x5c   : > { %v293_v59 = vmul.f32 0.75, %v229_v8  ;;  %vm5189_vm0 = vcmp.lt.f32.partialorder %v1824_v22, 0.0004427343  ;;  %v2337_v57 = vadd.f32 %v1817_v54, %v1697_v14  ;;  %v5193_v13 = vadd.f32 %v292_v7, %v164_v52 }
  0x5d   : > { %v1314_v32 = vmul.f32 %v1250_v28, %v226_v12  ;;  %v1505_v38 = vmul.f32 %v1441_v41, %v1441_v41  ;;  %v5195_v45 = vsub.f32 %v1571_v21, %v1635_v15  ;;  %4197 = vlog2.f32 %v675_v18  ;;  %v5204_v12 = vld [vmem:[%s4783_s15 + $0x60] sm:$0xff] }
  0x5e   : > { %v230_v43 = vsub.f32 1.0, %v5181_v47  ;;  %v5200_v35 = vsub.f32 %v1572_v10, %v1636_v51  ;;  %4199 = vlog2.f32 %v676_v16  ;;  %v166_v42 = vmul.f32 0.25, %v5181_v47 }
  0x5f   : > { %v5198_v1 = vpop.eup %4189  ;;  %v1378_v9 = vadd.f32 %v1314_v32, %v1186_v29  ;;  %v1826_v14 = vsel %vm5189_vm0, %v1823_v4, %v1820_v50  ;;  %v5215_v36 = vadd.f32 %v293_v59, %v165_v48  ;;  %vm995_vm1 = vcmp.ge.f32.partialorder %v5088_v19, 0.0 }
  0x60   : > { %v5209_v39 = vpop.eup %4191  ;;  %v294_v20 = vmul.f32 0.75, %v230_v43  ;;  %v5218_v0 = vadd.f32 1.0, %v5198_v1  ;;  %v1830_v33 = vmul.f32 -0.5, %v5148_v58  ;;  %v1839_v11 = vmul.f32 -0.5, %v5154_v5 }
  0x61   : > { %v1442_v2 = vsub.f32 1.0, %v1378_v9  ;;  %v678_v37 = vadd.f32 1.0, %v5209_v39  ;;  %v2401_v34 = vmul.f32 %v1505_v38, %v5130_v40  ;;  %vm996_vm2 = vcmp.ge.f32.partialorder %v5091_v62, 0.0 }
  0x62   : > { %4201 = vrcp.f32 %v5218_v0  ;;  %v423_v25 = vand.u32 2147483647, %v5204_v12  ;;  %v424_v23 = vand.u32 2147483647, %v5207_v56  ;;  %v2338_v52 = vadd.f32 %v1826_v14, %v5140_v17 }
  0x63   : > { %v4194_v24 = vpop.eup %4193  ;;  %v1506_v22 = vmul.f32 %v1442_v2, %v1442_v2  ;;  %v1833_v7 = vand.u32 2147483647, %v5148_v58  ;;  %4203 = vrcp.f32 %v678_v37  ;;  %v5231_v55 = vadd.f32 %v294_v20, %v166_v42 }
  0x64   : > { %v4196_v6 = vpop.eup %4195  ;;  %v803_v46 = vmul.f32 %v4194_v24, %v675_v18  ;;  %v1573_v40 = vmax.f32 %v5113_v3, 0.0  ;;  %v5236_v54 = vmul.f32 %v5162_v27, %v5113_v3  ;;  %v1831_v30 = vadd.f32 1.0, %v1830_v33 }
  0x65   : > { %v2402_v21 = vmul.f32 %v1506_v22, %v5132_v60  ;;  %v804_v15 = vmul.f32 %v4196_v6, %v676_v16  ;;  %v1840_v41 = vadd.f32 1.0, %v1839_v11  ;;  %v2465_v29 = vmul.f32 %v2401_v34, %v2337_v57 }
  0x66   : > { %v867_v17 = vsub.f32 2.0, %v803_v46  ;;  %v487_v28 = vsub.f32 0.0, %v423_v25  ;;  %v488_v10 = vsub.f32 0.0, %v424_v23  ;;  %vm5239_vm3 = vcmp.lt.f32.partialorder %v1833_v7, 0.0004427343  ;;  %v5302_v23 = vld [vmem:[%s4783_s15 + $0x70] sm:$0xff] }
  0x67   : > { %v2466_v51 = vmul.f32 %v2402_v21, %v2338_v52  ;;  %v868_v50 = vsub.f32 2.0, %v804_v15  ;;  %v1842_v4 = vand.u32 2147483647, %v5154_v5  ;;  %v4198_v48 = vpop.eup %4197  ;;  %4205 = vlog2.f32 %v5218_v0 }
  0x68   : > { %v931_v59 = vmul.f32 %v4194_v24, %v867_v17  ;;  %v563_v60 = vmul.f32 1.442695, %v487_v28  ;;  %v565_v16 = vmul.f32 1.442695, %v488_v10  ;;  %v4200_v32 = vpop.eup %4199  ;;  %v1832_v38 = vmul.f32 %v5148_v58, %v1831_v30 }
  0x69   : > { %v2536_v63 = vsel %vm2523_vm9, %v2466_v51, 0.0  ;;  %v932_v57 = vmul.f32 %v4196_v6, %v868_v50  ;;  %4207 = vlog2.f32 %v678_v37  ;;  %v1841_v14 = vmul.f32 %v5154_v5, %v1840_v41 }
  0x6a   : > { %v2537_v9 = vadd.f32 %v2536_v63, %v2465_v29  ;;  %v1059_v42 = vmul.f32 %v5148_v58, %v931_v59  ;;  %vm997_vm4 = vcmp.ge.f32.partialorder %v5113_v3, 0.0  ;;  %4209 = vpow2.f32 %v563_v60 }
  0x6b   : > { %v1060_v20 = vmul.f32 %v5154_v5, %v932_v57  ;;  %vm998_vm5 = vcmp.ge.f32.partialorder %v5116_v49, 0.0  ;;  %v1848_v2 = vmul.f32 -0.5, %v5198_v1  ;;  %v1857_v33 = vmul.f32 -0.5, %v5209_v39 }
  0x6c   : > { %4211 = vpow2.f32 %v565_v16  ;;  %v4202_v11 = vpop.eup %4201  ;;  %2538 = vadd.xlane.f32.xlu1 %v2537_v9  ;;  %v1123_v34 = vsel %vm995_vm1, %v931_v59, %v1059_v42  ;;  %v1829_v58 = vmul.f32 0.6931472, %v4198_v48  ;;  %v1838_v25 = vmul.f32 0.6931472, %v4200_v32 }
  0x6d   : > { %vm5256_vm6 = vcmp.lt.f32.partialorder %v1842_v4, 0.0004427343  ;;  %v4204_v24 = vpop.eup %4203  ;;  %v1124_v5 = vsel %vm996_vm2, %v932_v57, %v1060_v20  ;;  %v1187_v22 = vmul.f32 %v1123_v34, %v5126_v53  ;;  %v1251_v52 = vsub.f32 1.0, %v1123_v34 }
  0x6e   : > { %v805_v7 = vmul.f32 %v4202_v11, %v5218_v0  ;;  %v1188_v6 = vmul.f32 %v1124_v5, %v5137_v26  ;;  %v1252_v46 = vsub.f32 1.0, %v1124_v5  ;;  %v806_v19 = vmul.f32 %v4204_v24, %v678_v37 }
  0x6f   : > { %v1851_v21 = vand.u32 2147483647, %v5198_v1  ;;  %v1315_v15 = vmul.f32 %v1251_v52, %v227_v31  ;;  %v1849_v41 = vadd.f32 1.0, %v1848_v2  ;;  %v1858_v29 = vadd.f32 1.0, %v1857_v33 }
  0x70   : > { %v869_v30 = vsub.f32 2.0, %v805_v7  ;;  %v1316_v62 = vmul.f32 %v1252_v46, %v228_v44  ;;  %v870_v17 = vsub.f32 2.0, %v806_v19  ;;  %v1574_v28 = vmax.f32 %v5116_v49, 0.0 }
  0x71   : > { %v1638_v0 = vmul.f32 %v5181_v47, %v5116_v49  ;;  %v1379_v10 = vadd.f32 %v1315_v15, %v1187_v22  ;;  %v1835_v37 = vsel %vm5239_vm3, %v1832_v38, %v1829_v58  ;;  %v1844_v53 = vsel %vm5256_vm6, %v1841_v14, %v1838_v25  ;;  %v4206_v51 = vpop.eup %4205 }
  0x72   : > { %v933_v31 = vmul.f32 %v4202_v11, %v869_v30  ;;  %v1380_v50 = vadd.f32 %v1316_v62, %v1188_v6  ;;  %v934_v4 = vmul.f32 %v4204_v24, %v870_v17  ;;  %vm5277_vm7 = vcmp.lt.f32.partialorder %v1851_v21, 0.0004427343  ;;  %v5326_v21 = vld [vmem:[%s4799_s18 + $0x68] sm:$0xff] }
  0x73   : > { %v1860_v44 = vand.u32 2147483647, %v5209_v39  ;;  %v4208_v48 = vpop.eup %4207  ;;  %v1443_v59 = vsub.f32 1.0, %v1379_v10  ;;  %v1850_v18 = vmul.f32 %v5198_v1, %v1849_v41  ;;  %v1859_v16 = vmul.f32 %v5209_v39, %v1858_v29 }
  0x74   : > { %v1061_v60 = vmul.f32 %v5198_v1, %v933_v31  ;;  %v5285_v32 = vpop.eup %4209  ;;  %v1444_v63 = vsub.f32 1.0, %v1380_v50  ;;  %v2339_v57 = vadd.f32 %v1835_v37, %v5195_v45  ;;  %v2340_v38 = vadd.f32 %v1844_v53, %v5200_v35 }
  0x75   : > { %v1062_v9 = vmul.f32 %v5209_v39, %v934_v4  ;;  %v1507_v14 = vmul.f32 %v1443_v59, %v1443_v59  ;;  %v1847_v2 = vmul.f32 0.6931472, %v4206_v51  ;;  %v679_v1 = vadd.f32 1.0, %v5285_v32 }
  0x76   : > { %v5290_v42 = vpop.eup %4211  ;;  %v1125_v20 = vsel %vm997_vm4, %v933_v31, %v1061_v60  ;;  %v1508_v33 = vmul.f32 %v1444_v63, %v1444_v63  ;;  %v1856_v5 = vmul.f32 0.6931472, %v4208_v48  ;;  %vm5309_vm8 = vcmp.lt.f32.partialorder %v1860_v44, 0.0004427343 }
  0x77   : > { %v1126_v11 = vsel %vm998_vm5, %v934_v4, %v1062_v9  ;;  %v1189_v45 = vmul.f32 %v1125_v20, %v5162_v27  ;;  %v1253_v34 = vsub.f32 1.0, %v1125_v20  ;;  %v2403_v35 = vmul.f32 %v1507_v14, %v5165_v61  ;;  %v5317_v27 = vld [vmem:[%s4799_s18 + $0x60] sm:$0xff] }
  0x78   : > { %v1190_v39 = vmul.f32 %v1126_v11, %v5181_v47  ;;  %v1254_v58 = vsub.f32 1.0, %v1126_v11  ;;  %v680_v25 = vadd.f32 1.0, %v5290_v42  ;;  %v2404_v24 = vmul.f32 %v1508_v33, %v5193_v13  ;;  %v5355_v33 = vld [vmem:[%s4783_s15 + $0x80] sm:$0xff] }
  0x79   : > { %v1317_v49 = vmul.f32 %v1253_v34, %v229_v8  ;;  %4213 = vrcp.f32 %v679_v1  ;;  %v2467_v22 = vmul.f32 %v2403_v35, %v2339_v57  ;;  %v1701_v13 = vsub.f32 %v1573_v40, %v5236_v54  ;;  %v5320_v8 = vld [vmem:[%s4783_s15 + $0x78] sm:$0xff] }
  0x7a   : > { %v1318_v61 = vmul.f32 %v1254_v58, %v230_v43  ;;  %4215 = vrcp.f32 %v680_v25  ;;  %v2468_v7 = vmul.f32 %v2404_v24, %v2340_v38  ;;  %v425_v46 = vand.u32 2147483647, %v5302_v23  ;;  %v5363_v35 = vld [vmem:[%s4799_s18 + $0x78] sm:$0xff] }
  0x7b   : > { %v1381_v6 = vadd.f32 %v1317_v49, %v1189_v45  ;;  %v1702_v47 = vsub.f32 %v1574_v28, %v1638_v0  ;;  %v1853_v43 = vsel %vm5277_vm7, %v1850_v18, %v1847_v2  ;;  %v167_v15 = vmul.f32 0.25, %v5317_v27  ;;  %v5352_v2 = vld [vmem:[%s4799_s18 + $0x70] sm:$0xff] }
  0x7c   : > { %v1382_v19 = vadd.f32 %v1318_v61, %v1190_v39  ;;  %v2540_v30 = vsel %vm2523_vm9, %v2468_v7, 0.0  ;;  %v1862_v3 = vsel %vm5309_vm8, %v1859_v16, %v1856_v5  ;;  %v168_v40 = vmul.f32 0.25, %v5326_v21  ;;  %v5366_v39 = vld [vmem:[%s4783_s15 + $0x88] sm:$0xff] }
  0x7d   : > { %v1445_v41 = vsub.f32 1.0, %v1381_v6  ;;  %v2541_v54 = vadd.f32 %v2540_v30, %v2467_v22  ;;  %v231_v62 = vsub.f32 1.0, %v5317_v27  ;;  %v426_v17 = vand.u32 2147483647, %v5320_v8 }
  0x7e   : > { %v1446_v29 = vsub.f32 1.0, %v1382_v19  ;;  %v2341_v0 = vadd.f32 %v1853_v43, %v1701_v13  ;;  %v232_v10 = vsub.f32 1.0, %v5326_v21  ;;  %v489_v37 = vsub.f32 0.0, %v425_v46 }
  0x7f   : > { %v1509_v28 = vmul.f32 %v1445_v41, %v1445_v41  ;;  %2542 = vadd.xlane.f32.xlu0 %v2541_v54  ;;  %v2342_v31 = vadd.f32 %v1862_v3, %v1702_v47  ;;  %v295_v51 = vmul.f32 0.75, %v231_v62  ;;  %v490_v50 = vsub.f32 0.0, %v426_v17 }
  0x80   : > { %v1510_v53 = vmul.f32 %v1446_v29, %v1446_v29  ;;  %v296_v26 = vmul.f32 0.75, %v232_v10  ;;  %4217 = vlog2.f32 %v679_v1  ;;  %v567_v44 = vmul.f32 1.442695, %v489_v37 }
  0x81   : > { %v2405_v4 = vmul.f32 %v1509_v28, %v5215_v36  ;;  %vm999_vm10 = vcmp.ge.f32.partialorder %v5204_v12, 0.0  ;;  %4219 = vlog2.f32 %v680_v25  ;;  %v569_v59 = vmul.f32 1.442695, %v490_v50 }
  0x82   : > { %v2406_v48 = vmul.f32 %v1510_v53, %v5231_v55  ;;  %vm1000_vm11 = vcmp.ge.f32.partialorder %v5207_v56, 0.0  ;;  %v1866_v16 = vmul.f32 -0.5, %v5285_v32  ;;  %4221 = vpow2.f32 %v567_v44 }
  0x83   : > { %v4214_v60 = vpop.eup %4213  ;;  %v2469_v18 = vmul.f32 %v2405_v4, %v2341_v0  ;;  %v1575_v55 = vmax.f32 %v5204_v12, 0.0  ;;  %4223 = vpow2.f32 %v569_v59  ;;  %v5346_v38 = vadd.f32 %v295_v51, %v167_v15 }
  0x84   : > { %v4216_v36 = vpop.eup %4215  ;;  %v2470_v63 = vmul.f32 %v2406_v48, %v2342_v31  ;;  %v807_v57 = vmul.f32 %v4214_v60, %v679_v1  ;;  %v5348_v9 = vadd.f32 %v296_v26, %v168_v40  ;;  %v1576_v20 = vmax.f32 %v5207_v56, 0.0 }
  0x85   : > { %v808_v14 = vmul.f32 %v4216_v36, %v680_v25  ;;  %v1639_v1 = vmul.f32 %v5317_v27, %v5204_v12  ;;  %v1640_v34 = vmul.f32 %v5326_v21, %v5207_v56  ;;  %v1867_v24 = vadd.f32 1.0, %v1866_v16 }
  0x86   : > { %v2544_v11 = vsel %vm2523_vm9, %v2470_v63, 0.0  ;;  %v871_v45 = vsub.f32 2.0, %v807_v57  ;;  %v1875_v49 = vmul.f32 -0.5, %v5290_v42  ;;  %v1869_v22 = vand.u32 2147483647, %v5285_v32 }
  0x87   : > { %v2545_v58 = vadd.f32 %v2544_v11, %v2469_v18  ;;  %v872_v25 = vsub.f32 2.0, %v808_v14  ;;  %v233_v61 = vsub.f32 1.0, %v5352_v2  ;;  %v427_v52 = vand.u32 2147483647, %v5355_v33 }
  0x88   : > { %v935_v5 = vmul.f32 %v4214_v60, %v871_v45  ;;  %v169_v6 = vmul.f32 0.25, %v5352_v2  ;;  %v234_v13 = vsub.f32 1.0, %v5363_v35  ;;  %v428_v46 = vand.u32 2147483647, %v5366_v39 }
  0x89   : > { %2546 = vadd.xlane.f32.xlu1 %v2545_v58  ;;  %v936_v7 = vmul.f32 %v4216_v36, %v872_v25  ;;  %v1703_v47 = vsub.f32 %v1575_v55, %v1639_v1  ;;  %v170_v43 = vmul.f32 0.25, %v5363_v35  ;;  %v297_v15 = vmul.f32 0.75, %v233_v61  ;;  %v5420_v1 = vld [vmem:[%s4799_s18 + $0x80] sm:$0xff] }
  0x8a   : > { %v1063_v19 = vmul.f32 %v5285_v32, %v935_v5  ;;  %v4218_v30 = vpop.eup %4217  ;;  %v1868_v3 = vmul.f32 %v5285_v32, %v1867_v24  ;;  %v1876_v40 = vadd.f32 1.0, %v1875_v49  ;;  %v298_v54 = vmul.f32 0.75, %v234_v13  ;;  %v5427_v24 = vld [vmem:[%s4783_s15 + $0x90] sm:$0xff]  ;;  %v5430_v49 = vld [vmem:[%s4783_s15 + $0x98] sm:$0xff] }
  0x8b   : > { %v1064_v41 = vmul.f32 %v5290_v42, %v936_v7  ;;  %v4220_v29 = vpop.eup %4219  ;;  %vm5385_vm12 = vcmp.lt.f32.partialorder %v1869_v22, 0.0004427343  ;;  %v1878_v0 = vand.u32 2147483647, %v5290_v42  ;;  %v491_v37 = vsub.f32 0.0, %v427_v52  ;;  %v5433_v52 = vld [vmem:[%s4799_s18 + $0x88] sm:$0xff] }
  0x8c   : > { %v1127_v17 = vsel %vm999_vm10, %v935_v5, %v1063_v19  ;;  %v5390_v53 = vpop.eup %4221  ;;  %v492_v50 = vsub.f32 0.0, %v428_v46  ;;  %v1865_v44 = vmul.f32 0.6931472, %v4218_v30  ;;  %v1874_v60 = vmul.f32 0.6931472, %v4220_v29 }
  0x8d   : > { %v1128_v32 = vsel %vm1000_vm11, %v936_v7, %v1064_v41  ;;  %v1191_v31 = vmul.f32 %v1127_v17, %v5317_v27  ;;  %v1255_v51 = vsub.f32 1.0, %v1127_v17  ;;  %v5395_v4 = vpop.eup %4223  ;;  %v681_v48 = vadd.f32 1.0, %v5390_v53 }
  0x8e   : > { %v1192_v12 = vmul.f32 %v1128_v32, %v5326_v21  ;;  %v1256_v26 = vsub.f32 1.0, %v1128_v32  ;;  %v1877_v18 = vmul.f32 %v5290_v42, %v1876_v40  ;;  %v682_v56 = vadd.f32 1.0, %v5395_v4 }
  0x8f   : > { %v1319_v59 = vmul.f32 %v1255_v51, %v231_v62  ;;  %vm5405_vm13 = vcmp.lt.f32.partialorder %v1878_v0, 0.0004427343  ;;  %4225 = vrcp.f32 %v681_v48  ;;  %v571_v63 = vmul.f32 1.442695, %v491_v37 }
  0x90   : > { %v1320_v16 = vmul.f32 %v1256_v26, %v232_v10  ;;  %v1704_v55 = vsub.f32 %v1576_v20, %v1640_v34  ;;  %4227 = vrcp.f32 %v682_v56  ;;  %v573_v27 = vmul.f32 1.442695, %v492_v50 }
  0x91   : > { %v1383_v57 = vadd.f32 %v1319_v59, %v1191_v31  ;;  %v1871_v42 = vsel %vm5385_vm12, %v1868_v3, %v1865_v44  ;;  %v5411_v21 = vadd.f32 %v297_v15, %v169_v6  ;;  %v5413_v10 = vadd.f32 %v298_v54, %v170_v43 }
  0x92   : > { %v1384_v62 = vadd.f32 %v1320_v16, %v1192_v12  ;;  %v1880_v11 = vsel %vm5405_vm13, %v1877_v18, %v1874_v60  ;;  %v1577_v45 = vmax.f32 %v5302_v23, 0.0  ;;  %v1578_v20 = vmax.f32 %v5320_v8, 0.0 }
  0x93   : > { %v1447_v14 = vsub.f32 1.0, %v1383_v57  ;;  %v1641_v58 = vmul.f32 %v5352_v2, %v5302_v23  ;;  %v1642_v25 = vmul.f32 %v5363_v35, %v5320_v8  ;;  %4229 = vpow2.f32 %v571_v63 }
  0x94   : > { %v1448_v34 = vsub.f32 1.0, %v1384_v62  ;;  %v2343_v22 = vadd.f32 %v1871_v42, %v1703_v47  ;;  %v171_v7 = vmul.f32 0.25, %v5420_v1  ;;  %4231 = vpow2.f32 %v573_v27 }
  0x95   : > { %v1511_v5 = vmul.f32 %v1447_v14, %v1447_v14  ;;  %v2344_v46 = vadd.f32 %v1880_v11, %v1704_v55  ;;  %v172_v19 = vmul.f32 0.25, %v5433_v52  ;;  %v235_v43 = vsub.f32 1.0, %v5420_v1 }
  0x96   : > { %v1512_v6 = vmul.f32 %v1448_v34, %v1448_v34  ;;  %4233 = vlog2.f32 %v681_v48  ;;  %v429_v30 = vand.u32 2147483647, %v5427_v24  ;;  %v430_v41 = vand.u32 2147483647, %v5430_v49 }
  0x97   : > { %v2407_v15 = vmul.f32 %v1511_v5, %v5346_v38  ;;  %vm1001_vm14 = vcmp.ge.f32.partialorder %v5302_v23, 0.0  ;;  %v5443_v3 = vsub.f32 %v1577_v45, %v1641_v58  ;;  %v236_v40 = vsub.f32 1.0, %v5433_v52 }
  0x98   : > { %v2408_v47 = vmul.f32 %v1512_v6, %v5348_v9  ;;  %v299_v54 = vmul.f32 0.75, %v235_v43  ;;  %vm1002_vm15 = vcmp.ge.f32.partialorder %v5320_v8, 0.0  ;;  %4235 = vlog2.f32 %v682_v56 }
  0x99   : > { %v2471_v29 = vmul.f32 %v2407_v15, %v2343_v22  ;;  %v493_v38 = vsub.f32 0.0, %v429_v30  ;;  %v494_v17 = vsub.f32 0.0, %v430_v41  ;;  %v4226_v28 = vpop.eup %4225  ;;  %v5449_v37 = vsub.f32 %v1578_v20, %v1642_v25  ;;  %v5489_v15 = vld [vmem:[%s4799_s18 + $0x90] sm:$0xff] }
  0x9a   : > { %v2472_v0 = vmul.f32 %v2408_v47, %v2344_v46  ;;  %v1884_v9 = vmul.f32 -0.5, %v5390_v53  ;;  %v300_v32 = vmul.f32 0.75, %v236_v40  ;;  %v4228_v31 = vpop.eup %4227  ;;  %v809_v51 = vmul.f32 %v4226_v28, %v681_v48 }
  0x9b   : > { %v1893_v50 = vmul.f32 -0.5, %v5395_v4  ;;  %v575_v12 = vmul.f32 1.442695, %v493_v38  ;;  %v577_v26 = vmul.f32 1.442695, %v494_v17  ;;  %v810_v59 = vmul.f32 %v4228_v31, %v682_v56 }
  0x9c   : > { %v2548_v44 = vsel %vm2523_vm9, %v2472_v0, 0.0  ;;  %v5456_v60 = vadd.f32 %v299_v54, %v171_v7  ;;  %v1579_v18 = vmax.f32 %v5355_v33, 0.0  ;;  %v873_v36 = vsub.f32 2.0, %v809_v51  ;;  %v5503_v0 = vld [vmem:[%s4799_s18 + $0x98] sm:$0xff] }
  0x9d   : > { %v2549_v16 = vadd.f32 %v2548_v44, %v2471_v29  ;;  %v1887_v63 = vand.u32 2147483647, %v5390_v53  ;;  %4237 = vpow2.f32 %v575_v12  ;;  %v5460_v57 = vpop.eup %4229  ;;  %v874_v55 = vsub.f32 2.0, %v810_v59 }
  0x9e   : > { %v1885_v48 = vadd.f32 1.0, %v1884_v9  ;;  %v1896_v27 = vand.u32 2147483647, %v5395_v4  ;;  %4239 = vpow2.f32 %v577_v26  ;;  %v5463_v62 = vpop.eup %4231  ;;  %v937_v56 = vmul.f32 %v4226_v28, %v873_v36 }
  0x9f   : > { %2550 = vadd.xlane.f32.xlu0 %v2549_v16  ;;  %v1894_v42 = vadd.f32 1.0, %v1893_v50  ;;  %v683_v14 = vadd.f32 1.0, %v5460_v57  ;;  %v1643_v11 = vmul.f32 %v5420_v1, %v5355_v33  ;;  %v938_v45 = vmul.f32 %v4228_v31, %v874_v55 }
  0xa0   : > { %v5468_v20 = vadd.f32 %v300_v32, %v172_v19  ;;  %v5471_v34 = vadd.f32 1.0, %v5463_v62  ;;  %v1580_v58 = vmax.f32 %v5366_v39, 0.0  ;;  %v4234_v25 = vpop.eup %4233  ;;  %v1065_v5 = vmul.f32 %v5390_v53, %v937_v56 }
  0xa1   : > { %vm5475_vm0 = vcmp.lt.f32.partialorder %v1887_v63, 0.0004427343  ;;  %4241 = vrcp.f32 %v683_v14  ;;  %v1644_v7 = vmul.f32 %v5433_v52, %v5366_v39  ;;  %v1066_v6 = vmul.f32 %v5395_v4, %v938_v45 }
  0xa2   : > { %v1886_v46 = vmul.f32 %v5390_v53, %v1885_v48  ;;  %vm5483_vm1 = vcmp.lt.f32.partialorder %v1896_v27, 0.0004427343  ;;  %4243 = vrcp.f32 %v5471_v34  ;;  %v4236_v30 = vpop.eup %4235  ;;  %v1129_v41 = vsel %vm1001_vm14, %v937_v56, %v1065_v5 }
  0xa3   : > { %v1895_v47 = vmul.f32 %v5395_v4, %v1894_v42  ;;  %v5494_v54 = vsub.f32 %v1579_v18, %v1643_v11  ;;  %v5497_v29 = vmul.f32 0.25, %v5489_v15  ;;  %v1130_v53 = vsel %vm1002_vm15, %v938_v45, %v1066_v6  ;;  %v5547_v6 = vld [vmem:[%s4783_s15 + $0xa0] sm:$0xff] }
  0xa4   : > { %v1193_v38 = vmul.f32 %v1129_v41, %v5352_v2  ;;  %v1257_v17 = vsub.f32 1.0, %v1129_v41  ;;  %v1883_v28 = vmul.f32 0.6931472, %v4234_v25  ;;  %v1194_v9 = vmul.f32 %v1130_v53, %v5363_v35 }
  0xa5   : > { %v1258_v23 = vsub.f32 1.0, %v1130_v53  ;;  %v5506_v32 = vsub.f32 %v1580_v58, %v1644_v7  ;;  %v5509_v4 = vmul.f32 0.25, %v5503_v0  ;;  %v1892_v51 = vmul.f32 0.6931472, %v4236_v30 }
  0xa6   : > { %v1321_v31 = vmul.f32 %v1257_v17, %v233_v61  ;;  %4245 = vlog2.f32 %v683_v14  ;;  %v1902_v8 = vmul.f32 -0.5, %v5460_v57  ;;  %v237_v26 = vsub.f32 1.0, %v5489_v15 }
  0xa7   : > { %v5514_v50 = vpop.eup %4237  ;;  %v1322_v12 = vmul.f32 %v1258_v23, %v234_v13  ;;  %4247 = vlog2.f32 %v5471_v34  ;;  %v238_v44 = vsub.f32 1.0, %v5503_v0  ;;  %v1889_v2 = vsel %vm5475_vm0, %v1886_v46, %v1883_v28 }
  0xa8   : > { %v5521_v59 = vpop.eup %4239  ;;  %v1385_v18 = vadd.f32 %v1321_v31, %v1193_v38  ;;  %v1911_v61 = vmul.f32 -0.5, %v5463_v62  ;;  %v5527_v16 = vadd.f32 1.0, %v5514_v50  ;;  %vm1003_vm2 = vcmp.ge.f32.partialorder %v5355_v33, 0.0 }
  0xa9   : > { %v1386_v36 = vadd.f32 %v1322_v12, %v1194_v9  ;;  %v5532_v35 = vmul.f32 0.75, %v237_v26  ;;  %v5535_v13 = vadd.f32 1.0, %v5521_v59  ;;  %v1581_v63 = vmax.f32 %v5427_v24, 0.0 }
  0xaa   : > { %v1449_v55 = vsub.f32 1.0, %v1385_v18  ;;  %v1898_v48 = vsel %vm5483_vm1, %v1895_v47, %v1892_v51  ;;  %vm1004_vm3 = vcmp.ge.f32.partialorder %v5366_v39, 0.0  ;;  %v1903_v27 = vadd.f32 1.0, %v1902_v8 }
  0xab   : > { %4249 = vrcp.f32 %v5527_v16  ;;  %v4242_v56 = vpop.eup %4241  ;;  %v1450_v42 = vsub.f32 1.0, %v1386_v36  ;;  %v2345_v11 = vadd.f32 %v1889_v2, %v5443_v3  ;;  %v1905_v45 = vand.u32 2147483647, %v5460_v57 }
  0xac   : > { %4251 = vrcp.f32 %v5535_v13  ;;  %v4244_v58 = vpop.eup %4243  ;;  %v1513_v25 = vmul.f32 %v1449_v55, %v1449_v55  ;;  %v811_v5 = vmul.f32 %v4242_v56, %v683_v14  ;;  %v1912_v22 = vadd.f32 1.0, %v1911_v61 }
  0xad   : > { %v1914_v7 = vand.u32 2147483647, %v5463_v62  ;;  %v1514_v46 = vmul.f32 %v1450_v42, %v1450_v42  ;;  %v2346_v19 = vadd.f32 %v1898_v48, %v5449_v37  ;;  %v812_v30 = vmul.f32 %v4244_v58, %v5471_v34  ;;  %v5566_v37 = vld [vmem:[%s4783_s15 + $0xa8] sm:$0xff] }
  0xae   : > { %v1582_v3 = vmax.f32 %v5430_v49, 0.0  ;;  %v2409_v41 = vmul.f32 %v1513_v25, %v5411_v21  ;;  %v875_v47 = vsub.f32 2.0, %v811_v5  ;;  %v5554_v53 = vmul.f32 %v5460_v57, %v1903_v27 }
  0xaf   : > { %v5558_v14 = vmul.f32 %v5489_v15, %v5427_v24  ;;  %v2410_v38 = vmul.f32 %v1514_v46, %v5413_v10  ;;  %v876_v17 = vsub.f32 2.0, %v812_v30  ;;  %vm5561_vm4 = vcmp.lt.f32.partialorder %v1905_v45, 0.0004427343 }
  0xb0   : > { %v431_v34 = vand.u32 2147483647, %v5547_v6  ;;  %v4246_v21 = vpop.eup %4245  ;;  %v2473_v9 = vmul.f32 %v2409_v41, %v2345_v11  ;;  %v939_v23 = vmul.f32 %v4242_v56, %v875_v47  ;;  %v1913_v31 = vmul.f32 %v5463_v62, %v1912_v22 }
  0xb1   : > { %vm5570_vm5 = vcmp.lt.f32.partialorder %v1914_v7, 0.0004427343  ;;  %v4248_v8 = vpop.eup %4247  ;;  %v2474_v10 = vmul.f32 %v2410_v38, %v2346_v19  ;;  %v940_v12 = vmul.f32 %v4244_v58, %v876_v17  ;;  %4253 = vlog2.f32 %v5527_v16 }
  0xb2   : > { %v1920_v18 = vmul.f32 -0.5, %v5514_v50  ;;  %v1067_v2 = vmul.f32 %v5460_v57, %v939_v23  ;;  %vm1005_vm6 = vcmp.ge.f32.partialorder %v5427_v24, 0.0  ;;  %v1923_v61 = vand.u32 2147483647, %v5514_v50 }
  0xb3   : > { %4255 = vlog2.f32 %v5535_v13  ;;  %v432_v36 = vand.u32 2147483647, %v5566_v37  ;;  %v2552_v55 = vsel %vm2523_vm9, %v2474_v10, 0.0  ;;  %v1068_v48 = vmul.f32 %v5463_v62, %v940_v12 }
  0xb4   : > { %v1901_v27 = vmul.f32 0.6931472, %v4246_v21  ;;  %vm1006_vm7 = vcmp.ge.f32.partialorder %v5430_v49, 0.0  ;;  %v495_v56 = vsub.f32 0.0, %v431_v34  ;;  %v2553_v11 = vadd.f32 %v2552_v55, %v2473_v9 }
  0xb5   : > { %v4250_v42 = vpop.eup %4249  ;;  %v1131_v57 = vsel %vm1003_vm2, %v939_v23, %v1067_v2  ;;  %v1910_v45 = vmul.f32 0.6931472, %v4248_v8  ;;  %v496_v58 = vsub.f32 0.0, %v432_v36  ;;  %v1132_v5 = vsel %vm1004_vm3, %v940_v12, %v1068_v48 }
  0xb6   : > { %v4252_v25 = vpop.eup %4251  ;;  %v1195_v22 = vmul.f32 %v1131_v57, %v5420_v1  ;;  %v1259_v7 = vsub.f32 1.0, %v1131_v57  ;;  %v813_v62 = vmul.f32 %v4250_v42, %v5527_v16  ;;  %2554 = vadd.xlane.f32.xlu1 %v2553_v11  ;;  %v1196_v46 = vmul.f32 %v1132_v5, %v5433_v52 }
  0xb7   : > { %v1260_v19 = vsub.f32 1.0, %v1132_v5  ;;  %v814_v30 = vmul.f32 %v4252_v25, %v5535_v13  ;;  %v579_v41 = vmul.f32 1.442695, %v495_v56  ;;  %v1929_v38 = vmul.f32 -0.5, %v5521_v59 }
  0xb8   : > { %v1323_v33 = vmul.f32 %v1259_v7, %v235_v43  ;;  %v877_v47 = vsub.f32 2.0, %v813_v62  ;;  %v581_v39 = vmul.f32 1.442695, %v496_v58  ;;  %v1921_v21 = vadd.f32 1.0, %v1920_v18  ;;  %v5702_v62 = vld [vmem:[%s4799_s18 + $0xb8] sm:$0xff] }
  0xb9   : > { %v1324_v17 = vmul.f32 %v1260_v19, %v236_v40  ;;  %v878_v34 = vsub.f32 2.0, %v814_v30  ;;  %4257 = vpow2.f32 %v579_v41  ;;  %v1646_v23 = vmul.f32 %v5503_v0, %v5430_v49 }
  0xba   : > { %v1387_v16 = vadd.f32 %v1323_v33, %v1195_v22  ;;  %v941_v9 = vmul.f32 %v4250_v42, %v877_v47  ;;  %4259 = vpow2.f32 %v581_v39  ;;  %v1907_v1 = vsel %vm5561_vm4, %v5554_v53, %v1901_v27  ;;  %v5648_v33 = vld [vmem:[%s4783_s15 + $0xb0] sm:$0xff]  ;;  %v5656_v47 = vld [vmem:[%s4799_s18 + $0xa0] sm:$0xff] }
  0xbb   : > { %v1388_v13 = vadd.f32 %v1324_v17, %v1196_v46  ;;  %v1916_v43 = vsel %vm5570_vm5, %v1913_v31, %v1910_v45  ;;  %v942_v8 = vmul.f32 %v4252_v25, %v878_v34  ;;  %v4254_v52 = vpop.eup %4253  ;;  %vm5605_vm8 = vcmp.lt.f32.partialorder %v1923_v61, 0.0004427343  ;;  %v5659_v17 = vld [vmem:[%s4783_s15 + $0xb8] sm:$0xff] }
  0xbc   : > { %v1451_v40 = vsub.f32 1.0, %v1387_v16  ;;  %v1069_v10 = vmul.f32 %v5514_v50, %v941_v9  ;;  %v1932_v18 = vand.u32 2147483647, %v5521_v59  ;;  %v1922_v53 = vmul.f32 %v5514_v50, %v1921_v21 }
  0xbd   : > { %v4256_v2 = vpop.eup %4255  ;;  %v1452_v36 = vsub.f32 1.0, %v1388_v13  ;;  %v1070_v55 = vmul.f32 %v5521_v59, %v942_v8  ;;  %v1930_v28 = vadd.f32 1.0, %v1929_v38  ;;  %v2347_v31 = vadd.f32 %v1907_v1, %v5494_v54 }
  0xbe   : > { %v1515_v51 = vmul.f32 %v1451_v40, %v1451_v40  ;;  %v2348_v48 = vadd.f32 %v1916_v43, %v5506_v32  ;;  %v1133_v61 = vsel %vm1005_vm6, %v941_v9, %v1069_v10  ;;  %v1919_v58 = vmul.f32 0.6931472, %v4254_v52 }
  0xbf   : > { %v1516_v27 = vmul.f32 %v1452_v36, %v1452_v36  ;;  %v1134_v56 = vsel %vm1006_vm7, %v942_v8, %v1070_v55  ;;  %v1197_v42 = vmul.f32 %v1133_v61, %v5489_v15  ;;  %v1261_v11 = vsub.f32 1.0, %v1133_v61 }
  0xc0   : > { %v2411_v57 = vmul.f32 %v1515_v51, %v5456_v60  ;;  %v1198_v50 = vmul.f32 %v1134_v56, %v5503_v0  ;;  %v1262_v45 = vsub.f32 1.0, %v1134_v56  ;;  %v1928_v25 = vmul.f32 0.6931472, %v4256_v2  ;;  %v5680_v51 = vld [vmem:[%s4783_s15 + $0xc0] sm:$0xff] }
  0xc1   : > { %v2412_v54 = vmul.f32 %v1516_v27, %v5468_v20  ;;  %v1325_v32 = vmul.f32 %v1261_v11, %v237_v26  ;;  %v1931_v5 = vmul.f32 %v5521_v59, %v1930_v28  ;;  %v302_v7 = vmul.f32 0.75, %v238_v44 }
  0xc2   : > { %v2475_v22 = vmul.f32 %v2411_v57, %v2347_v31  ;;  %v1326_v60 = vmul.f32 %v1262_v45, %v238_v44  ;;  %vm5629_vm10 = vcmp.lt.f32.partialorder %v1932_v18, 0.0004427343  ;;  %v365_v15 = vadd.f32 %v5532_v35, %v5497_v29  ;;  %v5683_v31 = vld [vmem:[%s4783_s15 + $0xc8] sm:$0xff] }
  0xc3   : > { %v5633_v46 = vpop.eup %4257  ;;  %v2476_v20 = vmul.f32 %v2412_v54, %v2348_v48  ;;  %v1389_v26 = vadd.f32 %v1325_v32, %v1197_v42  ;;  %v1709_v59 = vsub.f32 %v1581_v63, %v5558_v14  ;;  %v1710_v44 = vsub.f32 %v1582_v3, %v1646_v23  ;;  %v5663_v23 = vld [vmem:[%s4799_s18 + $0xa8] sm:$0xff] }
  0xc4   : > { %v5640_v19 = vpop.eup %4259  ;;  %v1390_v0 = vadd.f32 %v1326_v60, %v1198_v50  ;;  %v1925_v30 = vsel %vm5605_vm8, %v1922_v53, %v1919_v58  ;;  %v687_v41 = vadd.f32 1.0, %v5633_v46  ;;  %v1934_v24 = vsel %vm5629_vm10, %v1931_v5, %v1928_v25  ;;  %v5699_v60 = vld [vmem:[%s4799_s18 + $0xb0] sm:$0xff] }
  0xc5   : > { %v2556_v29 = vsel %vm2523_vm9, %v2476_v20, 0.0  ;;  %v1453_v35 = vsub.f32 1.0, %v1389_v26  ;;  %v688_v63 = vadd.f32 1.0, %v5640_v19  ;;  %v366_v49 = vadd.f32 %v302_v7, %v5509_v4 }
  0xc6   : > { %v2557_v14 = vadd.f32 %v2556_v29, %v2475_v22  ;;  %v1454_v3 = vsub.f32 1.0, %v1390_v0  ;;  %4261 = vrcp.f32 %v687_v41  ;;  %v2349_v39 = vadd.f32 %v1925_v30, %v1709_v59 }
  0xc7   : > { %v1517_v38 = vmul.f32 %v1453_v35, %v1453_v35  ;;  %4263 = vrcp.f32 %v688_v63  ;;  %v433_v34 = vand.u32 2147483647, %v5648_v33  ;;  %v2350_v16 = vadd.f32 %v1934_v24, %v1710_v44 }
  0xc8   : > { %2558 = vadd.xlane.f32.xlu0 %v2557_v14  ;;  %v1518_v21 = vmul.f32 %v1454_v3, %v1454_v3  ;;  %v239_v13 = vsub.f32 1.0, %v5656_v47  ;;  %v434_v1 = vand.u32 2147483647, %v5659_v17  ;;  %v175_v8 = vmul.f32 0.25, %v5656_v47 }
  0xc9   : > { %v2413_v9 = vmul.f32 %v1517_v38, %v365_v15  ;;  %v497_v40 = vsub.f32 0.0, %v433_v34  ;;  %v240_v12 = vsub.f32 1.0, %v5663_v23  ;;  %v5672_v2 = vmul.f32 0.25, %v5663_v23 }
  0xca   : > { %v2414_v4 = vmul.f32 %v1518_v21, %v366_v49  ;;  %v303_v52 = vmul.f32 0.75, %v239_v13  ;;  %v498_v18 = vsub.f32 0.0, %v434_v1  ;;  %4265 = vlog2.f32 %v687_v41 }
  0xcb   : > { %v2477_v43 = vmul.f32 %v2413_v9, %v2349_v39  ;;  %v583_v36 = vmul.f32 1.442695, %v497_v40  ;;  %v5677_v53 = vmul.f32 0.75, %v240_v12  ;;  %4267 = vlog2.f32 %v688_v63 }
  0xcc   : > { %v2478_v10 = vmul.f32 %v2414_v4, %v2350_v16  ;;  %v585_v28 = vmul.f32 1.442695, %v498_v18  ;;  %v5685_v61 = vadd.f32 %v303_v52, %v175_v8  ;;  %v1938_v27 = vmul.f32 -0.5, %v5633_v46 }
  0xcd   : > { %4269 = vpow2.f32 %v583_v36  ;;  %vm1007_vm11 = vcmp.ge.f32.partialorder %v5547_v6, 0.0  ;;  %vm1008_vm12 = vcmp.ge.f32.partialorder %v5566_v37, 0.0  ;;  %v1947_v42 = vmul.f32 -0.5, %v5640_v19 }
  0xce   : > { %v2560_v55 = vsel %vm2523_vm9, %v2478_v10, 0.0  ;;  %4271 = vpow2.f32 %v585_v28  ;;  %v1583_v50 = vmax.f32 %v5547_v6, 0.0  ;;  %v435_v45 = vand.u32 2147483647, %v5680_v51 }
  0xcf   : > { %v2561_v48 = vadd.f32 %v2560_v55, %v2477_v43  ;;  %v436_v58 = vand.u32 2147483647, %v5683_v31  ;;  %v1584_v32 = vmax.f32 %v5566_v37, 0.0  ;;  %v1647_v25 = vmul.f32 %v5656_v47, %v5547_v6 }
  0xd0   : > { %v4262_v56 = vpop.eup %4261  ;;  %v1941_v5 = vand.u32 2147483647, %v5633_v46  ;;  %v1939_v7 = vadd.f32 1.0, %v1938_v27  ;;  %v499_v20 = vsub.f32 0.0, %v435_v45  ;;  %v1648_v59 = vmul.f32 %v5663_v23, %v5566_v37 }
  0xd1   : > { %v4264_v11 = vpop.eup %4263  ;;  %2562 = vadd.xlane.f32.xlu1 %v2561_v48  ;;  %v815_v57 = vmul.f32 %v4262_v56, %v687_v41  ;;  %v500_v15 = vsub.f32 0.0, %v436_v58  ;;  %v1948_v0 = vadd.f32 1.0, %v1947_v42  ;;  %v177_v44 = vmul.f32 0.25, %v5699_v60 }
  0xd2   : > { %v816_v54 = vmul.f32 %v4264_v11, %v688_v63  ;;  %v1950_v41 = vand.u32 2147483647, %v5640_v19  ;;  %v587_v29 = vmul.f32 1.442695, %v499_v20  ;;  %v178_v63 = vmul.f32 0.25, %v5702_v62 }
  0xd3   : > { %v879_v22 = vsub.f32 2.0, %v815_v57  ;;  %v589_v35 = vmul.f32 1.442695, %v500_v15  ;;  %v241_v14 = vsub.f32 1.0, %v5699_v60  ;;  %v242_v49 = vsub.f32 1.0, %v5702_v62 }
  0xd4   : > { %v880_v26 = vsub.f32 2.0, %v816_v54  ;;  %v4266_v3 = vpop.eup %4265  ;;  %v1940_v39 = vmul.f32 %v5633_v46, %v1939_v7  ;;  %vm5713_vm13 = vcmp.lt.f32.partialorder %v1941_v5, 0.0004427343  ;;  %4273 = vpow2.f32 %v587_v29 }
  0xd5   : > { %v943_v30 = vmul.f32 %v4262_v56, %v879_v22  ;;  %v4268_v21 = vpop.eup %4267  ;;  %v1949_v9 = vmul.f32 %v5640_v19, %v1948_v0  ;;  %v305_v4 = vmul.f32 0.75, %v241_v14  ;;  %4275 = vpow2.f32 %v589_v35 }
  0xd6   : > { %v944_v24 = vmul.f32 %v4264_v11, %v880_v26  ;;  %vm5725_vm14 = vcmp.lt.f32.partialorder %v1950_v41, 0.0004427343  ;;  %v306_v8 = vmul.f32 0.75, %v242_v49  ;;  %v1585_v52 = vmax.f32 %v5648_v33, 0.0  ;;  %v5783_v41 = vld [vmem:[%s4783_s15 + $0xd0] sm:$0xff] }
  0xd7   : > { %v1071_v38 = vmul.f32 %v5633_v46, %v943_v30  ;;  %v5721_v1 = vpop.eup %4269  ;;  %v1937_v28 = vmul.f32 0.6931472, %v4266_v3  ;;  %v1946_v56 = vmul.f32 0.6931472, %v4268_v21  ;;  %v1649_v37 = vmul.f32 %v5699_v60, %v5648_v33 }
  0xd8   : > { %v1072_v16 = vmul.f32 %v5640_v19, %v944_v24  ;;  %v5732_v40 = vpop.eup %4271  ;;  %v689_v6 = vadd.f32 1.0, %v5721_v1  ;;  %v1586_v11 = vmax.f32 %v5659_v17, 0.0  ;;  %v1650_v57 = vmul.f32 %v5702_v62, %v5659_v17 }
  0xd9   : > { %v1135_v43 = vsel %vm1007_vm11, %v943_v30, %v1071_v38  ;;  %v690_v48 = vadd.f32 1.0, %v5732_v40  ;;  %v1711_v45 = vsub.f32 %v1583_v50, %v1647_v25  ;;  %v1712_v58 = vsub.f32 %v1584_v32, %v1648_v59 }
  0xda   : > { %v1136_v19 = vsel %vm1008_vm12, %v944_v24, %v1072_v16  ;;  %v1199_v10 = vmul.f32 %v1135_v43, %v5656_v47  ;;  %v1263_v18 = vsub.f32 1.0, %v1135_v43  ;;  %4277 = vrcp.f32 %v689_v6  ;;  %v5798_v16 = vld [vmem:[%s4783_s15 + $0xd8] sm:$0xff] }
  0xdb   : > { %v1200_v36 = vmul.f32 %v1136_v19, %v5663_v23  ;;  %v1264_v55 = vsub.f32 1.0, %v1136_v19  ;;  %4279 = vrcp.f32 %v690_v48  ;;  %v368_v47 = vadd.f32 %v5677_v53, %v5672_v2  ;;  %v5765_v2 = vld [vmem:[%s4799_s18 + $0xc8] sm:$0xff] }
  0xdc   : > { %v1327_v27 = vmul.f32 %v1263_v18, %v239_v13  ;;  %v1943_v5 = vsel %vm5713_vm13, %v1940_v39, %v1937_v28  ;;  %v5753_v22 = vadd.f32 %v305_v4, %v177_v44  ;;  %v5755_v23 = vadd.f32 %v306_v8, %v178_v63 }
  0xdd   : > { %v1328_v42 = vmul.f32 %v1264_v55, %v240_v12  ;;  %v5758_v12 = vld [vmem:[%s4799_s18 + $0xc0] sm:$0xff]  ;;  %v1952_v20 = vsel %vm5725_vm14, %v1949_v9, %v1946_v56  ;;  %v5762_v15 = vsub.f32 %v1585_v52, %v1649_v37  ;;  %v5772_v25 = vsub.f32 %v1586_v11, %v1650_v57 }
  0xde   : > { %v1391_v13 = vadd.f32 %v1327_v27, %v1199_v10  ;;  %v5768_v53 = vmul.f32 0.25, %v5758_v12  ;;  %v5770_v50 = vpop.eup %4273  ;;  %4281 = vlog2.f32 %v689_v6  ;;  %v5775_v26 = vmul.f32 0.25, %v5765_v2 }
  0xdf   : > { %v1392_v54 = vadd.f32 %v1328_v42, %v1200_v36  ;;  %v5777_v59 = vpop.eup %4275  ;;  %v2351_v44 = vadd.f32 %v1943_v5, %v1711_v45  ;;  %4283 = vlog2.f32 %v690_v48  ;;  %v5780_v30 = vadd.f32 1.0, %v5770_v50 }
  0xe0   : > { %v1455_v7 = vsub.f32 1.0, %v1391_v13  ;;  %v2352_v35 = vadd.f32 %v1952_v20, %v1712_v58  ;;  %v1956_v24 = vmul.f32 -0.5, %v5721_v1  ;;  %v5787_v63 = vadd.f32 1.0, %v5777_v59 }
  0xe1   : > { %v1456_v32 = vsub.f32 1.0, %v1392_v54  ;;  %vm1009_vm15 = vcmp.ge.f32.partialorder %v5648_v33, 0.0  ;;  %v243_v38 = vsub.f32 1.0, %v5758_v12  ;;  %v244_v39 = vsub.f32 1.0, %v5765_v2 }
  0xe2   : > { %v1519_v0 = vmul.f32 %v1455_v7, %v1455_v7  ;;  %4285 = vrcp.f32 %v5780_v30  ;;  %vm1010_vm0 = vcmp.ge.f32.partialorder %v5659_v17, 0.0  ;;  %v1965_v21 = vmul.f32 -0.5, %v5732_v40 }
  0xe3   : > { %v1520_v29 = vmul.f32 %v1456_v32, %v1456_v32  ;;  %4287 = vrcp.f32 %v5787_v63  ;;  %v437_v9 = vand.u32 2147483647, %v5783_v41  ;;  %v5803_v43 = vmul.f32 0.75, %v243_v38 }
  0xe4   : > { %v2415_v3 = vmul.f32 %v1519_v0, %v5685_v61  ;;  %v4278_v61 = vpop.eup %4277  ;;  %v5807_v46 = vmul.f32 0.75, %v244_v39  ;;  %v1587_v8 = vmax.f32 %v5680_v51, 0.0  ;;  %v1957_v18 = vadd.f32 1.0, %v1956_v24 }
  0xe5   : > { %v2416_v34 = vmul.f32 %v1520_v29, %v368_v47  ;;  %v4280_v52 = vpop.eup %4279  ;;  %v817_v10 = vmul.f32 %v4278_v61, %v689_v6  ;;  %v1959_v36 = vand.u32 2147483647, %v5721_v1  ;;  %v1968_v28 = vand.u32 2147483647, %v5732_v40 }
  0xe6   : > { %v2479_v4 = vmul.f32 %v2415_v3, %v2351_v44  ;;  %v818_v55 = vmul.f32 %v4280_v52, %v690_v48  ;;  %v1588_v27 = vmax.f32 %v5683_v31, 0.0  ;;  %v438_v56 = vand.u32 2147483647, %v5798_v16 }
  0xe7   : > { %v2480_v19 = vmul.f32 %v2416_v34, %v2352_v35  ;;  %v881_v42 = vsub.f32 2.0, %v817_v10  ;;  %v1966_v11 = vadd.f32 1.0, %v1965_v21  ;;  %v501_v57 = vsub.f32 0.0, %v437_v9 }
  0xe8   : > { %v882_v13 = vsub.f32 2.0, %v818_v55  ;;  %4289 = vlog2.f32 %v5780_v30  ;;  %v502_v6 = vsub.f32 0.0, %v438_v56  ;;  %v4282_v45 = vpop.eup %4281  ;;  %v1958_v48 = vmul.f32 %v5721_v1, %v1957_v18 }
  0xe9   : > { %v2564_v37 = vsel %vm2523_vm9, %v2480_v19, 0.0  ;;  %v945_v58 = vmul.f32 %v4278_v61, %v881_v42  ;;  %vm5817_vm1 = vcmp.lt.f32.partialorder %v1959_v36, 0.0004427343  ;;  %v591_v5 = vmul.f32 1.442695, %v501_v57  ;;  %v4284_v7 = vpop.eup %4283 }
  0xea   : > { %v2565_v47 = vadd.f32 %v2564_v37, %v2479_v4  ;;  %v946_v20 = vmul.f32 %v4280_v52, %v882_v13  ;;  %vm5821_vm2 = vcmp.lt.f32.partialorder %v1968_v28, 0.0004427343  ;;  %vm1011_vm3 = vcmp.ge.f32.partialorder %v5680_v51, 0.0 }
  0xeb   : > { %4291 = vlog2.f32 %v5787_v63  ;;  %v593_v0 = vmul.f32 1.442695, %v502_v6  ;;  %v1073_v44 = vmul.f32 %v5721_v1, %v945_v58  ;;  %v1967_v29 = vmul.f32 %v5732_v40, %v1966_v11 }
  0xec   : > { %2566 = vadd.xlane.f32.xlu0 %v2565_v47  ;;  %vm1012_vm4 = vcmp.ge.f32.partialorder %v5683_v31, 0.0  ;;  %v1974_v35 = vmul.f32 -0.5, %v5770_v50  ;;  %4293 = vpow2.f32 %v591_v5  ;;  %v4286_v24 = vpop.eup %4285  ;;  %v1074_v3 = vmul.f32 %v5732_v40, %v946_v20 }
  0xed   : > { %v1977_v34 = vand.u32 2147483647, %v5770_v50  ;;  %v1983_v21 = vmul.f32 -0.5, %v5777_v59  ;;  %4295 = vpow2.f32 %v593_v0  ;;  %v4288_v9 = vpop.eup %4287  ;;  %v1137_v61 = vsel %vm1009_vm15, %v945_v58, %v1073_v44 }
  0xee   : > { %v1955_v1 = vmul.f32 0.6931472, %v4282_v45  ;;  %v1964_v4 = vmul.f32 0.6931472, %v4284_v7  ;;  %v819_v52 = vmul.f32 %v4286_v24, %v5780_v30  ;;  %v1138_v19 = vsel %vm1010_vm0, %v946_v20, %v1074_v3 }
  0xef   : > { %v1201_v10 = vmul.f32 %v1137_v61, %v5699_v60  ;;  %v1265_v18 = vsub.f32 1.0, %v1137_v61  ;;  %v820_v40 = vmul.f32 %v4288_v9, %v5787_v63  ;;  %v1202_v36 = vmul.f32 %v1138_v19, %v5702_v62 }
  0xf0   : > { %v1266_v55 = vsub.f32 1.0, %v1138_v19  ;;  %v883_v28 = vsub.f32 2.0, %v819_v52  ;;  %v1975_v56 = vadd.f32 1.0, %v1974_v35  ;;  %v1651_v30 = vmul.f32 %v5758_v12, %v5680_v51  ;;  %v5901_v51 = vld [vmem:[%s4783_s15 + $0xe8] sm:$0xff] }
  0xf1   : > { %v1329_v33 = vmul.f32 %v1265_v18, %v241_v14  ;;  %v884_v37 = vsub.f32 2.0, %v820_v40  ;;  %v1984_v42 = vadd.f32 1.0, %v1983_v21  ;;  %v1961_v11 = vsel %vm5817_vm1, %v1958_v48, %v1955_v1  ;;  %v5888_v40 = vld [vmem:[%s4783_s15 + $0xe0] sm:$0xff] }
  0xf2   : > { %v1330_v17 = vmul.f32 %v1266_v55, %v242_v49  ;;  %v947_v63 = vmul.f32 %v4286_v24, %v883_v28  ;;  %v1652_v57 = vmul.f32 %v5765_v2, %v5683_v31  ;;  %v4290_v47 = vpop.eup %4289  ;;  %v1970_v60 = vsel %vm5821_vm2, %v1967_v29, %v1964_v4 }
  0xf3   : > { %v1393_v13 = vadd.f32 %v1329_v33, %v1201_v10  ;;  %v948_v14 = vmul.f32 %v4288_v9, %v884_v37  ;;  %v1986_v6 = vand.u32 2147483647, %v5777_v59  ;;  %v1976_v62 = vmul.f32 %v5770_v50, %v1975_v56 }
  0xf4   : > { %v1394_v45 = vadd.f32 %v1330_v17, %v1202_v36  ;;  %v1075_v58 = vmul.f32 %v5770_v50, %v947_v63  ;;  %vm5857_vm5 = vcmp.lt.f32.partialorder %v1977_v34, 0.0004427343  ;;  %v2353_v5 = vadd.f32 %v1961_v11, %v5762_v15  ;;  %v5908_v17 = vld [vmem:[%s4799_s18 + $0xd0] sm:$0xff]  ;;  %v5911_v11 = vld [vmem:[%s4799_s18 + $0xd8] sm:$0xff] }
  0xf5   : > { %v4292_v48 = vpop.eup %4291  ;;  %v1457_v54 = vsub.f32 1.0, %v1393_v13  ;;  %v1076_v7 = vmul.f32 %v5777_v59, %v948_v14  ;;  %v1985_v20 = vmul.f32 %v5777_v59, %v1984_v42  ;;  %v2354_v44 = vadd.f32 %v1970_v60, %v5772_v25 }
  0xf6   : > { %v5864_v32 = vpop.eup %4293  ;;  %v1458_v0 = vsub.f32 1.0, %v1394_v45  ;;  %v1139_v50 = vsel %vm1011_vm3, %v947_v63, %v1075_v58  ;;  %v1973_v29 = vmul.f32 0.6931472, %v4290_v47  ;;  %v1982_v4 = vmul.f32 0.6931472, %v4292_v48 }
  0xf7   : > { %v5869_v35 = vpop.eup %4295  ;;  %v1521_v24 = vmul.f32 %v1457_v54, %v1457_v54  ;;  %v1140_v15 = vsel %vm1012_vm4, %v948_v14, %v1076_v7  ;;  %v1203_v3 = vmul.f32 %v1139_v50, %v5758_v12  ;;  %v1267_v34 = vsub.f32 1.0, %v1139_v50 }
  0xf8   : > { %v1522_v59 = vmul.f32 %v1458_v0, %v1458_v0  ;;  %v1204_v21 = vmul.f32 %v1140_v15, %v5765_v2  ;;  %v1268_v9 = vsub.f32 1.0, %v1140_v15  ;;  %v693_v25 = vadd.f32 1.0, %v5864_v32  ;;  %v5931_v15 = vld [vmem:[%s4783_s15 + $0xf0] sm:$0xff] }
  0xf9   : > { %v2417_v61 = vmul.f32 %v1521_v24, %v5753_v22  ;;  %v1331_v1 = vmul.f32 %v1267_v34, %v243_v38  ;;  %v694_v52 = vadd.f32 1.0, %v5869_v35  ;;  %vm5883_vm6 = vcmp.lt.f32.partialorder %v1986_v6, 0.0004427343 }
  0xfa   : > { %v2418_v19 = vmul.f32 %v1522_v59, %v5755_v23  ;;  %v1332_v10 = vmul.f32 %v1268_v9, %v244_v39  ;;  %4297 = vrcp.f32 %v693_v25  ;;  %v1715_v12 = vsub.f32 %v1587_v8, %v1651_v30  ;;  %v5938_v9 = vld [vmem:[%s4783_s15 + $0xf8] sm:$0xff] }
  0xfb   : > { %v2481_v22 = vmul.f32 %v2417_v61, %v2353_v5  ;;  %v1395_v36 = vadd.f32 %v1331_v1, %v1203_v3  ;;  %4299 = vrcp.f32 %v694_v52  ;;  %v1716_v2 = vsub.f32 %v1588_v27, %v1652_v57 }
  0xfc   : > { %v2482_v38 = vmul.f32 %v2418_v19, %v2354_v44  ;;  %v1396_v23 = vadd.f32 %v1332_v10, %v1204_v21  ;;  %v1979_v39 = vsel %vm5857_vm5, %v1976_v62, %v1973_v29  ;;  %v371_v55 = vadd.f32 %v5803_v43, %v5768_v53  ;;  %v5945_v19 = vld [vmem:[%s4799_s18 + $0xe0] sm:$0xff] }
  0xfd   : > { %v1459_v28 = vsub.f32 1.0, %v1395_v36  ;;  %v1988_v56 = vsel %vm5883_vm6, %v1985_v20, %v1982_v4  ;;  %v439_v8 = vand.u32 2147483647, %v5888_v40  ;;  %v372_v31 = vadd.f32 %v5807_v46, %v5775_v26 }
  0xfe   : > { %v2568_v33 = vsel %vm2523_vm9, %v2482_v38, 0.0  ;;  %v1460_v27 = vsub.f32 1.0, %v1396_v23  ;;  %v2355_v42 = vadd.f32 %v1979_v39, %v1715_v12  ;;  %v2356_v43 = vadd.f32 %v1988_v56, %v1716_v2  ;;  %v5949_v12 = vld [vmem:[%s4799_s18 + $0xe8] sm:$0xff] }
  0xff   : > { %v2569_v37 = vadd.f32 %v2568_v33, %v2481_v22  ;;  %v1523_v30 = vmul.f32 %v1459_v28, %v1459_v28  ;;  %v440_v63 = vand.u32 2147483647, %v5901_v51  ;;  %v5915_v47 = vmul.f32 0.25, %v5908_v17 }
 0x100   : > { %v1524_v53 = vmul.f32 %v1460_v27, %v1460_v27  ;;  %v5918_v13 = vmul.f32 0.25, %v5911_v11  ;;  %v503_v26 = vsub.f32 0.0, %v439_v8  ;;  %v245_v60 = vsub.f32 1.0, %v5908_v17 }
 0x101   : > { %2570 = vadd.xlane.f32.xlu1 %v2569_v37  ;;  %v2419_v57 = vmul.f32 %v1523_v30, %v371_v55  ;;  %4301 = vlog2.f32 %v693_v25  ;;  %v504_v14 = vsub.f32 0.0, %v440_v63  ;;  %v246_v45 = vsub.f32 1.0, %v5911_v11 }
 0x102   : > { %v2420_v46 = vmul.f32 %v1524_v53, %v372_v31  ;;  %4303 = vlog2.f32 %v694_v52  ;;  %v595_v58 = vmul.f32 1.442695, %v503_v26  ;;  %v1589_v48 = vmax.f32 %v5783_v41, 0.0 }
 0x103   : > { %v2483_v6 = vmul.f32 %v2419_v57, %v2355_v42  ;;  %v1590_v54 = vmax.f32 %v5798_v16, 0.0  ;;  %v597_v5 = vmul.f32 1.442695, %v504_v14  ;;  %v1653_v0 = vmul.f32 %v5908_v17, %v5783_v41 }
 0x104   : > { %v4298_v62 = vpop.eup %4297  ;;  %v2484_v49 = vmul.f32 %v2420_v46, %v2356_v43  ;;  %v1992_v44 = vmul.f32 -0.5, %v5864_v32  ;;  %4305 = vpow2.f32 %v595_v58  ;;  %v1654_v24 = vmul.f32 %v5911_v11, %v5798_v16 }
 0x105   : > { %v4300_v7 = vpop.eup %4299  ;;  %v821_v20 = vmul.f32 %v4298_v62, %v693_v25  ;;  %4307 = vpow2.f32 %v597_v5  ;;  %v309_v34 = vmul.f32 0.75, %v245_v60  ;;  %v310_v59 = vmul.f32 0.75, %v246_v45 }
 0x106   : > { %v2572_v50 = vsel %vm2523_vm9, %v2484_v49, 0.0  ;;  %v822_v29 = vmul.f32 %v4300_v7, %v694_v52  ;;  %vm1013_vm7 = vcmp.ge.f32.partialorder %v5783_v41, 0.0  ;;  %v1995_v61 = vand.u32 2147483647, %v5864_v32 }
 0x107   : > { %v2573_v3 = vadd.f32 %v2572_v50, %v2483_v6  ;;  %v885_v21 = vsub.f32 2.0, %v821_v20  ;;  %v2001_v1 = vmul.f32 -0.5, %v5869_v35  ;;  %vm1014_vm8 = vcmp.ge.f32.partialorder %v5798_v16, 0.0 }
 0x108   : > { %v886_v25 = vsub.f32 2.0, %v822_v29  ;;  %v1993_v52 = vadd.f32 1.0, %v1992_v44  ;;  %v441_v10 = vand.u32 2147483647, %v5931_v15  ;;  %v1717_v22 = vsub.f32 %v1589_v48, %v1653_v0 }
 0x109   : > { %2574 = vadd.xlane.f32.xlu0 %v2573_v3  ;;  %v949_v4 = vmul.f32 %v4298_v62, %v885_v21  ;;  %v1718_v36 = vsub.f32 %v1590_v54, %v1654_v24  ;;  %v442_v38 = vand.u32 2147483647, %v5938_v9  ;;  %v183_v2 = vmul.f32 0.25, %v5945_v19  ;;  %v5996_v3 = vld [vmem:[%s4783_s15 + $0x100] sm:$0xff] }
 0x10a   : > { %v950_v18 = vmul.f32 %v4300_v7, %v886_v25  ;;  %v184_v39 = vmul.f32 0.25, %v5949_v12  ;;  %v505_v55 = vsub.f32 0.0, %v441_v10  ;;  %vm5956_vm10 = vcmp.lt.f32.partialorder %v1995_v61, 0.0004427343  ;;  %v5999_v61 = vld [vmem:[%s4783_s15 + $0x108] sm:$0xff] }
 0x10b   : > { %v1077_v23 = vmul.f32 %v5864_v32, %v949_v4  ;;  %v4302_v28 = vpop.eup %4301  ;;  %v2002_v33 = vadd.f32 1.0, %v2001_v1  ;;  %v247_v31 = vsub.f32 1.0, %v5945_v19  ;;  %v1994_v30 = vmul.f32 %v5864_v32, %v1993_v52 }
 0x10c   : > { %v1078_v56 = vmul.f32 %v5869_v35, %v950_v18  ;;  %v4304_v27 = vpop.eup %4303  ;;  %v2004_v42 = vand.u32 2147483647, %v5869_v35  ;;  %v599_v53 = vmul.f32 1.442695, %v505_v55  ;;  %v506_v26 = vsub.f32 0.0, %v442_v38 }
 0x10d   : > { %v1141_v37 = vsel %vm1013_vm7, %v949_v4, %v1077_v23  ;;  %v1991_v58 = vmul.f32 0.6931472, %v4302_v28  ;;  %v2000_v62 = vmul.f32 0.6931472, %v4304_v27  ;;  %v2003_v16 = vmul.f32 %v5869_v35, %v2002_v33 }
 0x10e   : > { %v1142_v43 = vsel %vm1014_vm8, %v950_v18, %v1078_v56  ;;  %v1205_v63 = vmul.f32 %v1141_v37, %v5908_v17  ;;  %v1269_v57 = vsub.f32 1.0, %v1141_v37  ;;  %v5968_v46 = vpop.eup %4305  ;;  %4309 = vpow2.f32 %v599_v53 }
 0x10f   : > { %v1206_v14 = vmul.f32 %v1142_v43, %v5911_v11  ;;  %v1270_v6 = vsub.f32 1.0, %v1142_v43  ;;  %v5971_v41 = vpop.eup %4307  ;;  %v695_v49 = vadd.f32 1.0, %v5968_v46  ;;  %vm5979_vm11 = vcmp.lt.f32.partialorder %v2004_v42, 0.0004427343 }
 0x110   : > { %v1333_v32 = vmul.f32 %v1269_v57, %v245_v60  ;;  %v248_v5 = vsub.f32 1.0, %v5949_v12  ;;  %v696_v7 = vadd.f32 1.0, %v5971_v41  ;;  %v311_v17 = vmul.f32 0.75, %v247_v31 }
 0x111   : > { %v1334_v48 = vmul.f32 %v1270_v6, %v246_v45  ;;  %4311 = vrcp.f32 %v695_v49  ;;  %v601_v35 = vmul.f32 1.442695, %v506_v26  ;;  %v1997_v11 = vsel %vm5956_vm10, %v1994_v30, %v1991_v58 }
 0x112   : > { %v1397_v20 = vadd.f32 %v1333_v32, %v1205_v63  ;;  %v312_v45 = vmul.f32 0.75, %v248_v5  ;;  %4313 = vrcp.f32 %v696_v7  ;;  %v373_v0 = vadd.f32 %v309_v34, %v5915_v47 }
 0x113   : > { %v1398_v60 = vadd.f32 %v1334_v48, %v1206_v14  ;;  %v2006_v50 = vsel %vm5979_vm11, %v2003_v16, %v2000_v62  ;;  %v374_v29 = vadd.f32 %v310_v59, %v5918_v13  ;;  %v2357_v25 = vadd.f32 %v1997_v11, %v1717_v22  ;;  %v6008_v59 = vld [vmem:[%s4799_s18 + $0xf0] sm:$0xff] }
 0x114   : > { %v1461_v44 = vsub.f32 1.0, %v1397_v20  ;;  %4315 = vpow2.f32 %v601_v35  ;;  %v2358_v4 = vadd.f32 %v2006_v50, %v1718_v36  ;;  %v6001_v52 = vadd.f32 %v311_v17, %v183_v2  ;;  %v6016_v36 = vld [vmem:[%s4799_s18 + $0xf8] sm:$0xff] }
 0x115   : > { %v1462_v24 = vsub.f32 1.0, %v1398_v60  ;;  %v6003_v47 = vadd.f32 %v312_v45, %v184_v39  ;;  %v1591_v10 = vmax.f32 %v5888_v40, 0.0  ;;  %v1592_v13 = vmax.f32 %v5901_v51, 0.0 }
 0x116   : > { %v1525_v21 = vmul.f32 %v1461_v44, %v1461_v44  ;;  %v443_v18 = vand.u32 2147483647, %v5996_v3  ;;  %v1655_v23 = vmul.f32 %v5945_v19, %v5888_v40  ;;  %4317 = vlog2.f32 %v695_v49 }
 0x117   : > { %v1526_v1 = vmul.f32 %v1462_v24, %v1462_v24  ;;  %v444_v2 = vand.u32 2147483647, %v5999_v61  ;;  %vm1015_vm12 = vcmp.ge.f32.partialorder %v5888_v40, 0.0  ;;  %v1656_v55 = vmul.f32 %v5949_v12, %v5901_v51 }
 0x118   : > { %v2421_v34 = vmul.f32 %v1525_v21, %v373_v0  ;;  %v6011_v22 = vpop.eup %4309  ;;  %v185_v28 = vmul.f32 0.25, %v6008_v59  ;;  %vm1016_vm13 = vcmp.ge.f32.partialorder %v5901_v51, 0.0  ;;  %4319 = vlog2.f32 %v696_v7  ;;  %v6085_v51 = vld [vmem:[%s4799_s18 + $0x108] sm:$0xff] }
 0x119   : > { %v2422_v38 = vmul.f32 %v1526_v1, %v374_v29  ;;  %v6024_v56 = vadd.f32 1.0, %v6011_v22  ;;  %v249_v33 = vsub.f32 1.0, %v6008_v59  ;;  %v507_v27 = vsub.f32 0.0, %v443_v18 }
 0x11a   : > { %v2485_v39 = vmul.f32 %v2421_v34, %v2357_v25  ;;  %v2010_v30 = vmul.f32 -0.5, %v5968_v46  ;;  %v186_v42 = vmul.f32 0.25, %v6016_v36  ;;  %v250_v53 = vsub.f32 1.0, %v6016_v36 }
 0x11b   : > { %v2486_v8 = vmul.f32 %v2422_v38, %v2358_v4  ;;  %v4312_v37 = vpop.eup %4311  ;;  %4321 = vrcp.f32 %v6024_v56  ;;  %v313_v26 = vmul.f32 0.75, %v249_v33  ;;  %v508_v14 = vsub.f32 0.0, %v444_v2 }
 0x11c   : > { %v4314_v43 = vpop.eup %4313  ;;  %v823_v57 = vmul.f32 %v4312_v37, %v695_v49  ;;  %v314_v32 = vmul.f32 0.75, %v250_v53  ;;  %v603_v62 = vmul.f32 1.442695, %v507_v27  ;;  %v6037_v48 = vsub.f32 %v1591_v10, %v1655_v23 }
 0x11d   : > { %v2576_v63 = vsel %vm2523_vm9, %v2486_v8, 0.0  ;;  %v824_v58 = vmul.f32 %v4314_v43, %v696_v7  ;;  %v2013_v54 = vand.u32 2147483647, %v5968_v46  ;;  %v2019_v20 = vmul.f32 -0.5, %v5971_v41 }
 0x11e   : > { %v2577_v6 = vadd.f32 %v2576_v63, %v2485_v39  ;;  %v887_v16 = vsub.f32 2.0, %v823_v57  ;;  %v6041_v17 = vpop.eup %4315  ;;  %v2011_v35 = vadd.f32 1.0, %v2010_v30  ;;  %v2022_v60 = vand.u32 2147483647, %v5971_v41 }
 0x11f   : > { %v888_v49 = vsub.f32 2.0, %v824_v58  ;;  %4323 = vpow2.f32 %v603_v62  ;;  %v6044_v11 = vsub.f32 %v1592_v13, %v1656_v55  ;;  %v698_v45 = vadd.f32 1.0, %v6041_v17 }
 0x120   : > { %2578 = vadd.xlane.f32.xlu1 %v2577_v6  ;;  %v951_v7 = vmul.f32 %v4312_v37, %v887_v16  ;;  %v605_v0 = vmul.f32 1.442695, %v508_v14  ;;  %v6047_v50 = vadd.f32 %v313_v26, %v185_v28  ;;  %v6049_v29 = vadd.f32 %v314_v32, %v186_v42  ;;  %v4318_v21 = vpop.eup %4317  ;;  %v6075_v37 = vld [vmem:[%s4799_s18 + $0x100] sm:$0xff] }
 0x121   : > { %v952_v44 = vmul.f32 %v4314_v43, %v888_v49  ;;  %v1593_v24 = vmax.f32 %v5931_v15, 0.0  ;;  %vm6053_vm14 = vcmp.lt.f32.partialorder %v2013_v54, 0.0004427343  ;;  %v2020_v4 = vadd.f32 1.0, %v2019_v20 }
 0x122   : > { %v1079_v25 = vmul.f32 %v5968_v46, %v951_v7  ;;  %4325 = vrcp.f32 %v698_v45  ;;  %v2012_v10 = vmul.f32 %v5968_v46, %v2011_v35  ;;  %vm6059_vm15 = vcmp.lt.f32.partialorder %v2022_v60, 0.0004427343  ;;  %v4320_v38 = vpop.eup %4319 }
 0x123   : > { %v1080_v34 = vmul.f32 %v5971_v41, %v952_v44  ;;  %vm1017_vm0 = vcmp.ge.f32.partialorder %v5931_v15, 0.0  ;;  %v1657_v18 = vmul.f32 %v6008_v59, %v5931_v15  ;;  %v1594_v2 = vmax.f32 %v5938_v9, 0.0 }
 0x124   : > { %v1143_v23 = vsel %vm1015_vm12, %v951_v7, %v1079_v25  ;;  %v1658_v39 = vmul.f32 %v6016_v36, %v5938_v9  ;;  %4327 = vpow2.f32 %v605_v0  ;;  %v2009_v27 = vmul.f32 0.6931472, %v4318_v21 }
 0x125   : > { %v4322_v46 = vpop.eup %4321  ;;  %v1144_v55 = vsel %vm1016_vm13, %v952_v44, %v1080_v34  ;;  %v1207_v28 = vmul.f32 %v1143_v23, %v5945_v19  ;;  %v1271_v8 = vsub.f32 1.0, %v1143_v23  ;;  %v2021_v42 = vmul.f32 %v5971_v41, %v2020_v4 }
 0x126   : > { %v1208_v40 = vmul.f32 %v1144_v55, %v5949_v12  ;;  %v1272_v30 = vsub.f32 1.0, %v1144_v55  ;;  %v825_v43 = vmul.f32 %v4322_v46, %v6024_v56  ;;  %v2018_v57 = vmul.f32 0.6931472, %v4320_v38 }
 0x127   : > { %v1335_v63 = vmul.f32 %v1271_v8, %v247_v31  ;;  %v6082_v26 = vsub.f32 %v1593_v24, %v1657_v18  ;;  %v187_v14 = vmul.f32 0.25, %v6075_v37  ;;  %v6091_v32 = vmul.f32 0.25, %v6085_v51 }
 0x128   : > { %v1336_v6 = vmul.f32 %v1272_v30, %v248_v5  ;;  %v889_v58 = vsub.f32 2.0, %v825_v43  ;;  %v251_v41 = vsub.f32 1.0, %v6075_v37  ;;  %v2015_v31 = vsel %vm6053_vm14, %v2012_v10, %v2009_v27  ;;  %v6138_v30 = vld [vmem:[%s4783_s15 + $0x118] sm:$0xff] }
 0x129   : > { %v6094_v62 = vpop.eup %4323  ;;  %v1399_v19 = vadd.f32 %v1335_v63, %v1207_v28  ;;  %v6098_v16 = vsub.f32 %v1594_v2, %v1658_v39  ;;  %4329 = vlog2.f32 %v6024_v56  ;;  %vm1018_vm1 = vcmp.ge.f32.partialorder %v5938_v9, 0.0 }
 0x12a   : > { %v1400_v54 = vadd.f32 %v1336_v6, %v1208_v40  ;;  %v953_v20 = vmul.f32 %v4322_v46, %v889_v58  ;;  %4331 = vlog2.f32 %v698_v45  ;;  %v6103_v12 = vadd.f32 1.0, %v6094_v62 }
 0x12b   : > { %v1463_v5 = vsub.f32 1.0, %v1399_v19  ;;  %v2024_v49 = vsel %vm6059_vm15, %v2021_v42, %v2018_v57  ;;  %v252_v35 = vsub.f32 1.0, %v6085_v51  ;;  %v315_v60 = vmul.f32 0.75, %v251_v41 }
 0x12c   : > { %v4326_v7 = vpop.eup %4325  ;;  %v1464_v0 = vsub.f32 1.0, %v1400_v54  ;;  %v1081_v56 = vmul.f32 %v6011_v22, %v953_v20  ;;  %v2028_v44 = vmul.f32 -0.5, %v6011_v22  ;;  %4333 = vrcp.f32 %v6103_v12 }
 0x12d   : > { %v1527_v24 = vmul.f32 %v1463_v5, %v1463_v5  ;;  %v2359_v21 = vadd.f32 %v2015_v31, %v6037_v48  ;;  %v826_v25 = vmul.f32 %v4326_v7, %v698_v45  ;;  %v2031_v1 = vand.u32 2147483647, %v6011_v22  ;;  %v6124_v45 = vld [vmem:[%s4783_s15 + $0x110] sm:$0xff] }
 0x12e   : > { %v6115_v4 = vpop.eup %4327  ;;  %v1528_v34 = vmul.f32 %v1464_v0, %v1464_v0  ;;  %v2360_v10 = vadd.f32 %v2024_v49, %v6044_v11  ;;  %v1145_v13 = vsel %vm1017_vm0, %v953_v20, %v1081_v56  ;;  %v2037_v18 = vmul.f32 -0.5, %v6041_v17 }
 0x12f   : > { %v2423_v38 = vmul.f32 %v1527_v24, %v6001_v52  ;;  %v890_v23 = vsub.f32 2.0, %v826_v25  ;;  %v1209_v2 = vmul.f32 %v1145_v13, %v6008_v59  ;;  %v1273_v48 = vsub.f32 1.0, %v1145_v13 }
 0x130   : > { %v2424_v39 = vmul.f32 %v1528_v34, %v6003_v47  ;;  %v2029_v46 = vadd.f32 1.0, %v2028_v44  ;;  %v2040_v55 = vand.u32 2147483647, %v6041_v17  ;;  %v700_v11 = vadd.f32 1.0, %v6115_v4 }
 0x131   : > { %v2487_v15 = vmul.f32 %v2423_v38, %v2359_v21  ;;  %v954_v28 = vmul.f32 %v4326_v7, %v890_v23  ;;  %v1337_v8 = vmul.f32 %v1273_v48, %v249_v33  ;;  %v6133_v52 = vmul.f32 0.75, %v252_v35  ;;  %v6175_v23 = vld [vmem:[%s4799_s18 + $0x110] sm:$0xff] }
 0x132   : > { %v2488_v27 = vmul.f32 %v2424_v39, %v2360_v10  ;;  %v6135_v40 = vadd.f32 %v315_v60, %v187_v14  ;;  %4335 = vrcp.f32 %v700_v11  ;;  %v445_v47 = vand.u32 2147483647, %v6124_v45 }
 0x133   : > { %v4330_v42 = vpop.eup %4329  ;;  %v1082_v43 = vmul.f32 %v6041_v17, %v954_v28  ;;  %v1401_v63 = vadd.f32 %v1337_v8, %v1209_v2  ;;  %vm6142_vm2 = vcmp.lt.f32.partialorder %v2031_v1, 0.0004427343  ;;  %v2038_v59 = vadd.f32 1.0, %v2037_v18 }
 0x134   : > { %v4332_v33 = vpop.eup %4331  ;;  %v2580_v6 = vsel %vm2523_vm9, %v2488_v27, 0.0  ;;  %v2030_v14 = vmul.f32 %v6011_v22, %v2029_v46  ;;  %vm6148_vm3 = vcmp.lt.f32.partialorder %v2040_v55, 0.0004427343  ;;  %vm1019_vm4 = vcmp.ge.f32.partialorder %v5996_v3, 0.0  ;;  %v6181_v55 = vld [vmem:[%s4799_s18 + $0x118] sm:$0xff] }
 0x135   : > { %v1595_v19 = vmax.f32 %v5996_v3, 0.0  ;;  %v2581_v31 = vadd.f32 %v2580_v6, %v2487_v15  ;;  %v1146_v54 = vsel %vm1018_vm1, %v954_v28, %v1082_v43  ;;  %v1465_v20 = vsub.f32 1.0, %v1401_v63 }
 0x136   : > { %v446_v5 = vand.u32 2147483647, %v6138_v30  ;;  %v4334_v49 = vpop.eup %4333  ;;  %v1210_v60 = vmul.f32 %v1146_v54, %v6016_v36  ;;  %v1274_v7 = vsub.f32 1.0, %v1146_v54  ;;  %v2027_v22 = vmul.f32 0.6931472, %v4330_v42 }
 0x137   : > { %v509_v0 = vsub.f32 0.0, %v445_v47  ;;  %2582 = vadd.xlane.f32.xlu0 %v2581_v31  ;;  %v2036_v56 = vmul.f32 0.6931472, %v4332_v33  ;;  %v2039_v44 = vmul.f32 %v6041_v17, %v2038_v59  ;;  %v827_v24 = vmul.f32 %v4334_v49, %v6103_v12  ;;  %v6196_v31 = vld [vmem:[%s4783_s15 + $0x120] sm:$0xff] }
 0x138   : > { %v510_v21 = vsub.f32 0.0, %v446_v5  ;;  %v1338_v9 = vmul.f32 %v1274_v7, %v250_v53  ;;  %v1596_v25 = vmax.f32 %v5999_v61, 0.0  ;;  %4337 = vlog2.f32 %v6103_v12 }
 0x139   : > { %v607_v1 = vmul.f32 1.442695, %v509_v0  ;;  %v1529_v34 = vmul.f32 %v1465_v20, %v1465_v20  ;;  %v891_v10 = vsub.f32 2.0, %v827_v24  ;;  %4339 = vlog2.f32 %v700_v11 }
 0x13a   : > { %v609_v13 = vmul.f32 1.442695, %v510_v21  ;;  %v1402_v18 = vadd.f32 %v1338_v9, %v1210_v60  ;;  %v2033_v17 = vsel %vm6142_vm2, %v2030_v14, %v2027_v22  ;;  %vm1020_vm5 = vcmp.ge.f32.partialorder %v5999_v61, 0.0 }
 0x13b   : > { %v6169_v36 = vmul.f32 %v6075_v37, %v5996_v3  ;;  %4341 = vpow2.f32 %v607_v1  ;;  %v2042_v53 = vsel %vm6148_vm3, %v2039_v44, %v2036_v56  ;;  %v955_v12 = vmul.f32 %v4334_v49, %v891_v10 }
 0x13c   : > { %v2046_v38 = vmul.f32 -0.5, %v6094_v62  ;;  %4343 = vpow2.f32 %v609_v13  ;;  %v4336_v2 = vpop.eup %4335  ;;  %v1466_v48 = vsub.f32 1.0, %v1402_v18  ;;  %v1660_v39 = vmul.f32 %v6085_v51, %v5999_v61 }
 0x13d   : > { %v2055_v46 = vmul.f32 -0.5, %v6115_v4  ;;  %v189_v15 = vmul.f32 0.25, %v6175_v23  ;;  %v2361_v28 = vadd.f32 %v2033_v17, %v6082_v26  ;;  %v2425_v8 = vmul.f32 %v1529_v34, %v6047_v50 }
 0x13e   : > { %v828_v27 = vmul.f32 %v4336_v2, %v700_v11  ;;  %v1083_v47 = vmul.f32 %v6094_v62, %v955_v12  ;;  %v1530_v42 = vmul.f32 %v1466_v48, %v1466_v48  ;;  %v2362_v43 = vadd.f32 %v2042_v53, %v6098_v16  ;;  %v6199_v16 = vld [vmem:[%s4783_s15 + $0x128] sm:$0xff] }
 0x13f   : > { %v2049_v63 = vand.u32 2147483647, %v6094_v62  ;;  %v253_v57 = vsub.f32 1.0, %v6175_v23  ;;  %v2047_v6 = vadd.f32 1.0, %v2046_v38  ;;  %v254_v26 = vsub.f32 1.0, %v6181_v55 }
 0x140   : > { %v892_v59 = vsub.f32 2.0, %v828_v27  ;;  %v1147_v33 = vsel %vm1019_vm4, %v955_v12, %v1083_v47  ;;  %v2426_v50 = vmul.f32 %v1530_v42, %v6049_v29  ;;  %v2056_v58 = vadd.f32 1.0, %v2055_v46 }
 0x141   : > { %v1211_v11 = vmul.f32 %v1147_v33, %v6075_v37  ;;  %v1275_v14 = vsub.f32 1.0, %v1147_v33  ;;  %v2489_v54 = vmul.f32 %v2425_v8, %v2361_v28  ;;  %v190_v5 = vmul.f32 0.25, %v6181_v55 }
 0x142   : > { %v956_v20 = vmul.f32 %v4336_v2, %v892_v59  ;;  %v317_v49 = vmul.f32 0.75, %v253_v57  ;;  %v4338_v60 = vpop.eup %4337  ;;  %v2490_v7 = vmul.f32 %v2426_v50, %v2362_v43  ;;  %vm6206_vm6 = vcmp.lt.f32.partialorder %v2049_v63, 0.0004427343  ;;  %v6259_v50 = vld [vmem:[%s4799_s18 + $0x120] sm:$0xff] }
 0x143   : > { %v1339_v29 = vmul.f32 %v1275_v14, %v251_v41  ;;  %v318_v0 = vmul.f32 0.75, %v254_v26  ;;  %v4340_v56 = vpop.eup %4339  ;;  %v2048_v24 = vmul.f32 %v6094_v62, %v2047_v6  ;;  %v447_v21 = vand.u32 2147483647, %v6196_v31  ;;  %v6265_v14 = vld [vmem:[%s4783_s15 + $0x130] sm:$0xff] }
 0x144   : > { %v1084_v44 = vmul.f32 %v6115_v4, %v956_v20  ;;  %v448_v9 = vand.u32 2147483647, %v6199_v16  ;;  %v2584_v37 = vsel %vm2523_vm9, %v2490_v7, 0.0  ;;  %v2057_v34 = vmul.f32 %v6115_v4, %v2056_v58 }
 0x145   : > { %v6216_v1 = vpop.eup %4341  ;;  %v1403_v41 = vadd.f32 %v1339_v29, %v1211_v11  ;;  %v2058_v10 = vand.u32 2147483647, %v6115_v4  ;;  %v2585_v18 = vadd.f32 %v2584_v37, %v2489_v54  ;;  %v2045_v62 = vmul.f32 0.6931472, %v4338_v60  ;;  %v6262_v11 = vld [vmem:[%s4799_s18 + $0x128] sm:$0xff] }
 0x146   : > { %v6221_v13 = vpop.eup %4343  ;;  %v1148_v17 = vsel %vm1020_vm5, %v956_v20, %v1084_v44  ;;  %v701_v53 = vadd.f32 1.0, %v6216_v1  ;;  %v2054_v46 = vmul.f32 0.6931472, %v4340_v56  ;;  %v511_v28 = vsub.f32 0.0, %v447_v21 }
 0x147   : > { %v1212_v12 = vmul.f32 %v1148_v17, %v6085_v51  ;;  %v1276_v38 = vsub.f32 1.0, %v1148_v17  ;;  %v1467_v2 = vsub.f32 1.0, %v1403_v41  ;;  %v702_v48 = vadd.f32 1.0, %v6221_v13  ;;  %2586 = vadd.xlane.f32.xlu1 %v2585_v18 }
 0x148   : > { %4345 = vrcp.f32 %v701_v53  ;;  %v512_v4 = vsub.f32 0.0, %v448_v9  ;;  %v1723_v27 = vsub.f32 %v1595_v19, %v6169_v36  ;;  %vm6233_vm7 = vcmp.lt.f32.partialorder %v2058_v10, 0.0004427343 }
 0x149   : > { %v1340_v8 = vmul.f32 %v1276_v38, %v252_v35  ;;  %4347 = vrcp.f32 %v702_v48  ;;  %v380_v42 = vadd.f32 %v6133_v52, %v6091_v32  ;;  %v1531_v43 = vmul.f32 %v1467_v2, %v1467_v2 }
 0x14a   : > { %v1724_v63 = vsub.f32 %v1596_v25, %v1660_v39  ;;  %v2051_v51 = vsel %vm6206_vm6, %v2048_v24, %v2045_v62  ;;  %v6243_v35 = vadd.f32 %v317_v49, %v189_v15  ;;  %v6245_v19 = vadd.f32 %v318_v0, %v190_v5  ;;  %v6252_v25 = vld [vmem:[%s4783_s15 + $0x138] sm:$0xff] }
 0x14b   : > { %v1404_v3 = vadd.f32 %v1340_v8, %v1212_v12  ;;  %v1597_v36 = vmax.f32 %v6124_v45, 0.0  ;;  %v2060_v32 = vsel %vm6233_vm7, %v2057_v34, %v2054_v46  ;;  %v1598_v52 = vmax.f32 %v6138_v30, 0.0 }
 0x14c   : > { %v611_v61 = vmul.f32 1.442695, %v511_v28  ;;  %v613_v59 = vmul.f32 1.442695, %v512_v4  ;;  %v2363_v33 = vadd.f32 %v2051_v51, %v1723_v27  ;;  %v1661_v6 = vmul.f32 %v6175_v23, %v6124_v45 }
 0x14d   : > { %v1468_v39 = vsub.f32 1.0, %v1404_v3  ;;  %v1662_v15 = vmul.f32 %v6181_v55, %v6138_v30  ;;  %v2427_v58 = vmul.f32 %v1531_v43, %v6135_v40  ;;  %v191_v54 = vmul.f32 0.25, %v6259_v50 }
 0x14e   : > { %v192_v20 = vmul.f32 0.25, %v6262_v11  ;;  %4349 = vpow2.f32 %v611_v61  ;;  %v2364_v49 = vadd.f32 %v2060_v32, %v1724_v63  ;;  %v2064_v60 = vmul.f32 -0.5, %v6216_v1 }
 0x14f   : > { %v1532_v5 = vmul.f32 %v1468_v39, %v1468_v39  ;;  %4351 = vpow2.f32 %v613_v59  ;;  %vm1021_vm8 = vcmp.ge.f32.partialorder %v6124_v45, 0.0  ;;  %v255_v7 = vsub.f32 1.0, %v6259_v50 }
 0x150   : > { %4353 = vlog2.f32 %v701_v53  ;;  %v449_v29 = vand.u32 2147483647, %v6265_v14  ;;  %v450_v22 = vand.u32 2147483647, %v6252_v25  ;;  %vm1022_vm10 = vcmp.ge.f32.partialorder %v6138_v30, 0.0 }
 0x151   : > { %v2428_v40 = vmul.f32 %v1532_v5, %v380_v42  ;;  %4355 = vlog2.f32 %v702_v48  ;;  %v2073_v0 = vmul.f32 -0.5, %v6221_v13  ;;  %v256_v56 = vsub.f32 1.0, %v6262_v11 }
 0x152   : > { %v4346_v44 = vpop.eup %4345  ;;  %v2491_v24 = vmul.f32 %v2427_v58, %v2363_v33  ;;  %v319_v21 = vmul.f32 0.75, %v255_v7  ;;  %v513_v9 = vsub.f32 0.0, %v449_v29  ;;  %v514_v37 = vsub.f32 0.0, %v450_v22  ;;  %v6320_v29 = vld [vmem:[%s4799_s18 + $0x130] sm:$0xff] }
 0x153   : > { %v4348_v41 = vpop.eup %4347  ;;  %v2492_v34 = vmul.f32 %v2428_v40, %v2364_v49  ;;  %v829_v10 = vmul.f32 %v4346_v44, %v701_v53  ;;  %v2065_v18 = vadd.f32 1.0, %v2064_v60  ;;  %v320_v17 = vmul.f32 0.75, %v256_v56 }
 0x154   : > { %v830_v62 = vmul.f32 %v4348_v41, %v702_v48  ;;  %v2067_v12 = vand.u32 2147483647, %v6216_v1  ;;  %v615_v38 = vmul.f32 1.442695, %v513_v9  ;;  %v617_v2 = vmul.f32 1.442695, %v514_v37 }
 0x155   : > { %v2588_v46 = vsel %vm2523_vm9, %v2492_v34, 0.0  ;;  %v893_v28 = vsub.f32 2.0, %v829_v10  ;;  %v2074_v4 = vadd.f32 1.0, %v2073_v0  ;;  %v2076_v8 = vand.u32 2147483647, %v6221_v13 }
 0x156   : > { %v2589_v27 = vadd.f32 %v2588_v46, %v2491_v24  ;;  %v894_v47 = vsub.f32 2.0, %v830_v62  ;;  %v6285_v42 = vsub.f32 %v1597_v36, %v1661_v6  ;;  %4357 = vpow2.f32 %v615_v38 }
 0x157   : > { %v957_v53 = vmul.f32 %v4346_v44, %v893_v28  ;;  %v6287_v43 = vsub.f32 %v1598_v52, %v1662_v15  ;;  %v6289_v63 = vadd.f32 %v319_v21, %v191_v54  ;;  %4359 = vpow2.f32 %v617_v2 }
 0x158   : > { %v6291_v48 = vpop.eup %4349  ;;  %2590 = vadd.xlane.f32.xlu0 %v2589_v27  ;;  %v958_v51 = vmul.f32 %v4348_v41, %v894_v47  ;;  %v2066_v3 = vmul.f32 %v6216_v1, %v2065_v18  ;;  %vm6294_vm11 = vcmp.lt.f32.partialorder %v2067_v12, 0.0004427343  ;;  %v6298_v61 = vadd.f32 %v320_v17, %v192_v20 }
 0x159   : > { %v6300_v36 = vpop.eup %4351  ;;  %v1085_v52 = vmul.f32 %v6216_v1, %v957_v53  ;;  %v2075_v59 = vmul.f32 %v6221_v13, %v2074_v4  ;;  %vm6304_vm12 = vcmp.lt.f32.partialorder %v2076_v8, 0.0004427343  ;;  %v703_v33 = vadd.f32 1.0, %v6291_v48 }
 0x15a   : > { %v4354_v6 = vpop.eup %4353  ;;  %v1086_v15 = vmul.f32 %v6221_v13, %v958_v51  ;;  %v704_v58 = vadd.f32 1.0, %v6300_v36  ;;  %v1599_v54 = vmax.f32 %v6196_v31, 0.0  ;;  %v1600_v20 = vmax.f32 %v6199_v16, 0.0  ;;  %v6323_v13 = vld [vmem:[%s4799_s18 + $0x138] sm:$0xff] }
 0x15b   : > { %v4356_v5 = vpop.eup %4355  ;;  %v1149_v1 = vsel %vm1021_vm8, %v957_v53, %v1085_v52  ;;  %4361 = vrcp.f32 %v703_v33  ;;  %v1663_v49 = vmul.f32 %v6259_v50, %v6196_v31  ;;  %v1664_v60 = vmul.f32 %v6262_v11, %v6199_v16 }
 0x15c   : > { %v1150_v22 = vsel %vm1022_vm10, %v958_v51, %v1086_v15  ;;  %v1213_v40 = vmul.f32 %v1149_v1, %v6175_v23  ;;  %v1277_v0 = vsub.f32 1.0, %v1149_v1  ;;  %4363 = vrcp.f32 %v704_v58 }
 0x15d   : > { %v1214_v45 = vmul.f32 %v1150_v22, %v6181_v55  ;;  %v1278_v44 = vsub.f32 1.0, %v1150_v22  ;;  %v2063_v24 = vmul.f32 0.6931472, %v4354_v6  ;;  %v6330_v21 = vmul.f32 0.25, %v6320_v29 }
 0x15e   : > { %v1341_v9 = vmul.f32 %v1277_v0, %v253_v57  ;;  %v2072_v37 = vmul.f32 0.6931472, %v4356_v5  ;;  %v257_v41 = vsub.f32 1.0, %v6320_v29  ;;  %v258_v30 = vsub.f32 1.0, %v6323_v13  ;;  %v6391_v0 = vld [vmem:[%s4783_s15 + $0x148] sm:$0xff] }
 0x15f   : > { %v1342_v34 = vmul.f32 %v1278_v44, %v254_v26  ;;  %v6338_v10 = vsub.f32 %v1599_v54, %v1663_v49  ;;  %v6340_v18 = vsub.f32 %v1600_v20, %v1664_v60  ;;  %v6343_v17 = vmul.f32 0.25, %v6323_v13  ;;  %v6380_v54 = vld [vmem:[%s4783_s15 + $0x140] sm:$0xff] }
 0x160   : > { %v6345_v62 = vpop.eup %4357  ;;  %v1405_v12 = vadd.f32 %v1341_v9, %v1213_v40  ;;  %4365 = vlog2.f32 %v703_v33  ;;  %v6349_v23 = vmul.f32 0.75, %v257_v41  ;;  %v6353_v57 = vmul.f32 0.75, %v258_v30 }
 0x161   : > { %v6355_v55 = vpop.eup %4359  ;;  %v1406_v26 = vadd.f32 %v1342_v34, %v1214_v45  ;;  %v2069_v38 = vsel %vm6294_vm11, %v2066_v3, %v2063_v24  ;;  %v2082_v2 = vmul.f32 -0.5, %v6291_v48  ;;  %v6361_v46 = vadd.f32 1.0, %v6345_v62 }
 0x162   : > { %v1469_v28 = vsub.f32 1.0, %v1405_v12  ;;  %v2078_v4 = vsel %vm6304_vm12, %v2075_v59, %v2072_v37  ;;  %4367 = vlog2.f32 %v704_v58  ;;  %v6366_v8 = vadd.f32 1.0, %v6355_v55 }
 0x163   : > { %v1470_v27 = vsub.f32 1.0, %v1406_v26  ;;  %vm1023_vm13 = vcmp.ge.f32.partialorder %v6196_v31, 0.0  ;;  %v2091_v47 = vmul.f32 -0.5, %v6300_v36  ;;  %4369 = vrcp.f32 %v6361_v46 }
 0x164   : > { %v1601_v53 = vmax.f32 %v6265_v14, 0.0  ;;  %v1533_v51 = vmul.f32 %v1469_v28, %v1469_v28  ;;  %v2365_v3 = vadd.f32 %v2069_v38, %v6285_v42  ;;  %vm1024_vm14 = vcmp.ge.f32.partialorder %v6199_v16, 0.0 }
 0x165   : > { %4371 = vrcp.f32 %v6366_v8  ;;  %v1665_v32 = vmul.f32 %v6320_v29, %v6265_v14  ;;  %v4362_v52 = vpop.eup %4361  ;;  %v1534_v59 = vmul.f32 %v1470_v27, %v1470_v27  ;;  %v2366_v39 = vadd.f32 %v2078_v4, %v6287_v43 }
 0x166   : > { %v2083_v6 = vadd.f32 1.0, %v2082_v2  ;;  %v1602_v15 = vmax.f32 %v6252_v25, 0.0  ;;  %v4364_v20 = vpop.eup %4363  ;;  %v2429_v42 = vmul.f32 %v1533_v51, %v6243_v35  ;;  %v831_v5 = vmul.f32 %v4362_v52, %v703_v33 }
 0x167   : > { %v2085_v1 = vand.u32 2147483647, %v6291_v48  ;;  %v2094_v49 = vand.u32 2147483647, %v6300_v36  ;;  %v2430_v60 = vmul.f32 %v1534_v59, %v6245_v19  ;;  %v832_v22 = vmul.f32 %v4364_v20, %v704_v58 }
 0x168   : > { %v2092_v40 = vadd.f32 1.0, %v2091_v47  ;;  %v6388_v43 = vmul.f32 %v6323_v13, %v6252_v25  ;;  %v2493_v45 = vmul.f32 %v2429_v42, %v2365_v3  ;;  %v895_v44 = vsub.f32 2.0, %v831_v5 }
 0x169   : > { %v6393_v24 = vsub.f32 %v1601_v53, %v1665_v32  ;;  %v451_v35 = vand.u32 2147483647, %v6380_v54  ;;  %v2494_v33 = vmul.f32 %v2430_v60, %v2366_v39  ;;  %v896_v9 = vsub.f32 2.0, %v832_v22 }
 0x16a   : > { %v2084_v37 = vmul.f32 %v6291_v48, %v2083_v6  ;;  %4373 = vlog2.f32 %v6361_v46  ;;  %v4366_v19 = vpop.eup %4365  ;;  %v959_v58 = vmul.f32 %v4362_v52, %v895_v44  ;;  %vm6398_vm15 = vcmp.lt.f32.partialorder %v2085_v1, 0.0004427343 }
 0x16b   : > { %vm6402_vm0 = vcmp.lt.f32.partialorder %v2094_v49, 0.0004427343  ;;  %v452_v26 = vand.u32 2147483647, %v6391_v0  ;;  %v2592_v38 = vsel %vm2523_vm9, %v2494_v33, 0.0  ;;  %v960_v2 = vmul.f32 %v4364_v20, %v896_v9 }
 0x16c   : > { %v2093_v28 = vmul.f32 %v6300_v36, %v2092_v40  ;;  %vm1025_vm1 = vcmp.ge.f32.partialorder %v6265_v14, 0.0  ;;  %v2100_v4 = vmul.f32 -0.5, %v6345_v62  ;;  %v4368_v27 = vpop.eup %4367  ;;  %v2593_v47 = vadd.f32 %v2592_v38, %v2493_v45 }
 0x16d   : > { %v1087_v53 = vmul.f32 %v6291_v48, %v959_v58  ;;  %vm1026_vm2 = vcmp.ge.f32.partialorder %v6252_v25, 0.0  ;;  %4375 = vlog2.f32 %v6366_v8  ;;  %v515_v51 = vsub.f32 0.0, %v451_v35  ;;  %v4370_v3 = vpop.eup %4369 }
 0x16e   : > { %v1088_v32 = vmul.f32 %v6300_v36, %v960_v2  ;;  %v2081_v52 = vmul.f32 0.6931472, %v4366_v19  ;;  %v2103_v59 = vand.u32 2147483647, %v6345_v62  ;;  %v2109_v39 = vmul.f32 -0.5, %v6355_v55  ;;  %2594 = vadd.xlane.f32.xlu1 %v2593_v47 }
 0x16f   : > { %v4372_v6 = vpop.eup %4371  ;;  %v1151_v20 = vsel %vm1023_vm13, %v959_v58, %v1087_v53  ;;  %v833_v48 = vmul.f32 %v4370_v3, %v6361_v46  ;;  %v516_v42 = vsub.f32 0.0, %v452_v26  ;;  %v619_v5 = vmul.f32 1.442695, %v515_v51 }
 0x170   : > { %v1152_v1 = vsel %vm1024_vm14, %v960_v2, %v1088_v32  ;;  %v1215_v49 = vmul.f32 %v1151_v20, %v6259_v50  ;;  %v1279_v36 = vsub.f32 1.0, %v1151_v20  ;;  %v834_v60 = vmul.f32 %v4372_v6, %v6366_v8 }
 0x171   : > { %v1216_v22 = vmul.f32 %v1152_v1, %v6262_v11  ;;  %v1280_v40 = vsub.f32 1.0, %v1152_v1  ;;  %v897_v45 = vsub.f32 2.0, %v833_v48  ;;  %v2101_v44 = vadd.f32 1.0, %v2100_v4 }
 0x172   : > { %v1343_v31 = vmul.f32 %v1279_v36, %v255_v7  ;;  %v2090_v35 = vmul.f32 0.6931472, %v4368_v27  ;;  %v898_v46 = vsub.f32 2.0, %v834_v60  ;;  %4377 = vpow2.f32 %v619_v5  ;;  %v6474_v60 = vld [vmem:[%s4783_s15 + $0x158] sm:$0xff] }
 0x173   : > { %v1344_v16 = vmul.f32 %v1280_v40, %v256_v56  ;;  %v961_v33 = vmul.f32 %v4370_v3, %v897_v45  ;;  %v2112_v9 = vand.u32 2147483647, %v6355_v55  ;;  %v621_v19 = vmul.f32 1.442695, %v516_v42 }
 0x174   : > { %v4374_v58 = vpop.eup %4373  ;;  %v1407_v8 = vadd.f32 %v1343_v31, %v1215_v49  ;;  %v2087_v26 = vsel %vm6398_vm15, %v2084_v37, %v2081_v52  ;;  %v962_v38 = vmul.f32 %v4372_v6, %v898_v46  ;;  %vm6432_vm3 = vcmp.lt.f32.partialorder %v2103_v59, 0.0004427343  ;;  %v6467_v49 = vld [vmem:[%s4783_s15 + $0x150] sm:$0xff]  ;;  %v6485_v31 = vld [vmem:[%s4799_s18 + $0x140] sm:$0xff]  ;;  %v6489_v46 = vld [vmem:[%s4799_s18 + $0x148] sm:$0xff] }
 0x175   : > { %v1408_v50 = vadd.f32 %v1344_v16, %v1216_v22  ;;  %v1089_v7 = vmul.f32 %v6345_v62, %v961_v33  ;;  %v2110_v4 = vadd.f32 1.0, %v2109_v39  ;;  %4379 = vpow2.f32 %v621_v19 }
 0x176   : > { %v1471_v11 = vsub.f32 1.0, %v1407_v8  ;;  %v2096_v56 = vsel %vm6402_vm0, %v2093_v28, %v2090_v35  ;;  %v1090_v27 = vmul.f32 %v6355_v55, %v962_v38  ;;  %v2102_v47 = vmul.f32 %v6345_v62, %v2101_v44 }
 0x177   : > { %v4376_v34 = vpop.eup %4375  ;;  %v1472_v37 = vsub.f32 1.0, %v1408_v50  ;;  %v2367_v53 = vadd.f32 %v2087_v26, %v6338_v10  ;;  %v1153_v51 = vsel %vm1025_vm1, %v961_v33, %v1089_v7  ;;  %v2099_v3 = vmul.f32 0.6931472, %v4374_v58 }
 0x178   : > { %v1535_v32 = vmul.f32 %v1471_v11, %v1471_v11  ;;  %v1154_v52 = vsel %vm1026_vm2, %v962_v38, %v1090_v27  ;;  %v1217_v59 = vmul.f32 %v1153_v51, %v6320_v29  ;;  %v1281_v12 = vsub.f32 1.0, %v1153_v51 }
 0x179   : > { %v1536_v28 = vmul.f32 %v1472_v37, %v1472_v37  ;;  %v2368_v39 = vadd.f32 %v2096_v56, %v6340_v18  ;;  %v1218_v62 = vmul.f32 %v1154_v52, %v6323_v13  ;;  %v1282_v6 = vsub.f32 1.0, %v1154_v52  ;;  %v6506_v37 = vld [vmem:[%s4783_s15 + $0x168] sm:$0xff] }
 0x17a   : > { %v2431_v10 = vmul.f32 %v1535_v32, %v6289_v63  ;;  %v1345_v14 = vmul.f32 %v1281_v12, %v257_v41  ;;  %v2108_v20 = vmul.f32 0.6931472, %v4376_v34  ;;  %v2111_v48 = vmul.f32 %v6355_v55, %v2110_v4  ;;  %v6503_v34 = vld [vmem:[%s4783_s15 + $0x160] sm:$0xff] }
 0x17b   : > { %v2432_v42 = vmul.f32 %v1536_v28, %v6298_v61  ;;  %v1346_v5 = vmul.f32 %v1282_v6, %v258_v30  ;;  %v2105_v18 = vsel %vm6432_vm3, %v2102_v47, %v2099_v3  ;;  %vm6458_vm4 = vcmp.lt.f32.partialorder %v2112_v9, 0.0004427343  ;;  %v6517_v28 = vld [vmem:[%s4799_s18 + $0x150] sm:$0xff] }
 0x17c   : > { %v6462_v63 = vpop.eup %4377  ;;  %v2495_v29 = vmul.f32 %v2431_v10, %v2367_v53  ;;  %v385_v41 = vadd.f32 %v6349_v23, %v6330_v21  ;;  %v1409_v55 = vadd.f32 %v1345_v14, %v1217_v59  ;;  %v1730_v30 = vsub.f32 %v1602_v15, %v6388_v43 }
 0x17d   : > { %v2496_v61 = vmul.f32 %v2432_v42, %v2368_v39  ;;  %v1410_v13 = vadd.f32 %v1346_v5, %v1218_v62  ;;  %v707_v36 = vadd.f32 1.0, %v6462_v63  ;;  %v386_v22 = vadd.f32 %v6353_v57, %v6343_v17 }
 0x17e   : > { %v1473_v40 = vsub.f32 1.0, %v1409_v55  ;;  %v2114_v21 = vsel %vm6458_vm4, %v2111_v48, %v2108_v20  ;;  %v2369_v23 = vadd.f32 %v2105_v18, %v6393_v24  ;;  %v453_v15 = vand.u32 2147483647, %v6467_v49  ;;  %v6528_v48 = vld [vmem:[%s4799_s18 + $0x158] sm:$0xff] }
 0x17f   : > { %v6481_v45 = vpop.eup %4379  ;;  %v2596_v44 = vsel %vm2523_vm9, %v2496_v61, 0.0  ;;  %v1474_v25 = vsub.f32 1.0, %v1410_v13  ;;  %4381 = vrcp.f32 %v707_v36  ;;  %v454_v57 = vand.u32 2147483647, %v6474_v60 }
 0x180   : > { %v2597_v43 = vadd.f32 %v2596_v44, %v2495_v29  ;;  %v1537_v35 = vmul.f32 %v1473_v40, %v1473_v40  ;;  %v708_v17 = vadd.f32 1.0, %v6481_v45  ;;  %v2370_v24 = vadd.f32 %v2114_v21, %v1730_v30 }
 0x181   : > { %v1538_v16 = vmul.f32 %v1474_v25, %v1474_v25  ;;  %v259_v9 = vsub.f32 1.0, %v6485_v31  ;;  %v195_v58 = vmul.f32 0.25, %v6485_v31  ;;  %v260_v8 = vsub.f32 1.0, %v6489_v46 }
 0x182   : > { %2598 = vadd.xlane.f32.xlu0 %v2597_v43  ;;  %v2433_v33 = vmul.f32 %v1537_v35, %v385_v41  ;;  %4383 = vrcp.f32 %v708_v17  ;;  %v517_v2 = vsub.f32 0.0, %v453_v15  ;;  %v518_v50 = vsub.f32 0.0, %v454_v57 }
 0x183   : > { %v2434_v19 = vmul.f32 %v1538_v16, %v386_v22  ;;  %v323_v38 = vmul.f32 0.75, %v259_v9  ;;  %v196_v4 = vmul.f32 0.25, %v6489_v46  ;;  %v324_v11 = vmul.f32 0.75, %v260_v8 }
 0x184   : > { %v2497_v26 = vmul.f32 %v2433_v33, %v2369_v23  ;;  %4385 = vlog2.f32 %v707_v36  ;;  %v623_v56 = vmul.f32 1.442695, %v517_v2  ;;  %v625_v27 = vmul.f32 1.442695, %v518_v50 }
 0x185   : > { %v2498_v7 = vmul.f32 %v2434_v19, %v2370_v24  ;;  %4387 = vlog2.f32 %v708_v17  ;;  %v6508_v51 = vadd.f32 %v323_v38, %v195_v58  ;;  %v6510_v32 = vadd.f32 %v324_v11, %v196_v4 }
 0x186   : > { %4389 = vpow2.f32 %v623_v56  ;;  %vm1027_vm5 = vcmp.ge.f32.partialorder %v6380_v54, 0.0  ;;  %v2118_v52 = vmul.f32 -0.5, %v6462_v63  ;;  %vm1028_vm6 = vcmp.ge.f32.partialorder %v6391_v0, 0.0 }
 0x187   : > { %v2600_v47 = vsel %vm2523_vm9, %v2498_v7, 0.0  ;;  %4391 = vpow2.f32 %v625_v27  ;;  %v2127_v12 = vmul.f32 -0.5, %v6481_v45  ;;  %v455_v39 = vand.u32 2147483647, %v6503_v34 }
 0x188   : > { %v2601_v53 = vadd.f32 %v2600_v47, %v2497_v26  ;;  %v456_v62 = vand.u32 2147483647, %v6506_v37  ;;  %v1603_v6 = vmax.f32 %v6380_v54, 0.0  ;;  %v1604_v10 = vmax.f32 %v6391_v0, 0.0 }
 0x189   : > { %v4382_v3 = vpop.eup %4381  ;;  %v1667_v14 = vmul.f32 %v6485_v31, %v6380_v54  ;;  %v1668_v20 = vmul.f32 %v6489_v46, %v6391_v0  ;;  %v197_v18 = vmul.f32 0.25, %v6517_v28  ;;  %v519_v1 = vsub.f32 0.0, %v455_v39  ;;  %v6572_v39 = vld [vmem:[%s4799_s18 + $0x160] sm:$0xff] }
 0x18a   : > { %2602 = vadd.xlane.f32.xlu1 %v2601_v53  ;;  %v835_v59 = vmul.f32 %v4382_v3, %v707_v36  ;;  %v520_v29 = vsub.f32 0.0, %v456_v62  ;;  %v2119_v55 = vadd.f32 1.0, %v2118_v52  ;;  %v2121_v61 = vand.u32 2147483647, %v6462_v63 }
 0x18b   : > { %v261_v13 = vsub.f32 1.0, %v6517_v28  ;;  %v2128_v36 = vadd.f32 1.0, %v2127_v12  ;;  %v262_v22 = vsub.f32 1.0, %v6528_v48  ;;  %v627_v40 = vmul.f32 1.442695, %v519_v1 }
 0x18c   : > { %v4384_v42 = vpop.eup %4383  ;;  %v899_v5 = vsub.f32 2.0, %v835_v59  ;;  %v1731_v23 = vsub.f32 %v1603_v6, %v1667_v14  ;;  %v198_v44 = vmul.f32 0.25, %v6528_v48  ;;  %v629_v25 = vmul.f32 1.442695, %v520_v29 }
 0x18d   : > { %v836_v41 = vmul.f32 %v4384_v42, %v708_v17  ;;  %v325_v35 = vmul.f32 0.75, %v261_v13  ;;  %v326_v17 = vmul.f32 0.75, %v262_v22  ;;  %4393 = vpow2.f32 %v627_v40 }
 0x18e   : > { %v963_v30 = vmul.f32 %v4382_v3, %v899_v5  ;;  %v4386_v15 = vpop.eup %4385  ;;  %v2120_v24 = vmul.f32 %v6462_v63, %v2119_v55  ;;  %vm6541_vm7 = vcmp.lt.f32.partialorder %v2121_v61, 0.0004427343  ;;  %4395 = vpow2.f32 %v629_v25  ;;  %v6605_v61 = vld [vmem:[%s4783_s15 + $0x170] sm:$0xff] }
 0x18f   : > { %v900_v21 = vsub.f32 2.0, %v836_v41  ;;  %v4388_v57 = vpop.eup %4387  ;;  %v2129_v26 = vmul.f32 %v6481_v45, %v2128_v36  ;;  %v2130_v38 = vand.u32 2147483647, %v6481_v45  ;;  %v1605_v2 = vmax.f32 %v6467_v49, 0.0 }
 0x190   : > { %v1091_v43 = vmul.f32 %v6462_v63, %v963_v30  ;;  %v6545_v19 = vpop.eup %4389  ;;  %v1606_v54 = vmax.f32 %v6474_v60, 0.0  ;;  %v1669_v27 = vmul.f32 %v6517_v28, %v6467_v49  ;;  %v1670_v47 = vmul.f32 %v6528_v48, %v6474_v60 }
 0x191   : > { %v964_v16 = vmul.f32 %v4384_v42, %v900_v21  ;;  %v6552_v50 = vpop.eup %4391  ;;  %v709_v11 = vadd.f32 1.0, %v6545_v19  ;;  %v2117_v3 = vmul.f32 0.6931472, %v4386_v15  ;;  %v2126_v12 = vmul.f32 0.6931472, %v4388_v57 }
 0x192   : > { %v1155_v58 = vsel %vm1027_vm5, %v963_v30, %v1091_v43  ;;  %v6558_v56 = vadd.f32 1.0, %v6552_v50  ;;  %v1732_v6 = vsub.f32 %v1604_v10, %v1668_v20  ;;  %vm6574_vm8 = vcmp.lt.f32.partialorder %v2130_v38, 0.0004427343 }
 0x193   : > { %v1092_v63 = vmul.f32 %v6481_v45, %v964_v16  ;;  %v1219_v7 = vmul.f32 %v1155_v58, %v6485_v31  ;;  %v1283_v4 = vsub.f32 1.0, %v1155_v58  ;;  %4397 = vrcp.f32 %v709_v11  ;;  %v6581_v31 = vld [vmem:[%s4799_s18 + $0x168] sm:$0xff] }
 0x194   : > { %4399 = vrcp.f32 %v6558_v56  ;;  %v6578_v0 = vadd.f32 %v325_v35, %v197_v18  ;;  %v6585_v42 = vadd.f32 %v326_v17, %v198_v44  ;;  %v6588_v5 = vmul.f32 0.25, %v6572_v39  ;;  %v6615_v44 = vld [vmem:[%s4783_s15 + $0x178] sm:$0xff] }
 0x195   : > { %v1156_v45 = vsel %vm1028_vm6, %v964_v16, %v1092_v63  ;;  %v1347_v53 = vmul.f32 %v1283_v4, %v259_v9  ;;  %v6591_v1 = vmul.f32 0.25, %v6581_v31  ;;  %v2123_v20 = vsel %vm6541_vm7, %v2120_v24, %v2117_v3 }
 0x196   : > { %v1220_v52 = vmul.f32 %v1156_v45, %v6489_v46  ;;  %v1284_v59 = vsub.f32 1.0, %v1156_v45  ;;  %v6595_v18 = vsub.f32 %v1605_v2, %v1669_v27  ;;  %v263_v29 = vsub.f32 1.0, %v6572_v39 }
 0x197   : > { %v1411_v62 = vadd.f32 %v1347_v53, %v1219_v7  ;;  %v6598_v41 = vpop.eup %4393  ;;  %v6602_v55 = vsub.f32 %v1606_v54, %v1670_v47  ;;  %4401 = vlog2.f32 %v709_v11  ;;  %v264_v40 = vsub.f32 1.0, %v6581_v31 }
 0x198   : > { %v1348_v9 = vmul.f32 %v1284_v59, %v260_v8  ;;  %v2132_v8 = vsel %vm6574_vm8, %v2129_v26, %v2126_v12  ;;  %v6607_v30 = vpop.eup %4395  ;;  %4403 = vlog2.f32 %v6558_v56  ;;  %v6612_v21 = vadd.f32 1.0, %v6598_v41 }
 0x199   : > { %v1475_v10 = vsub.f32 1.0, %v1411_v62  ;;  %v2371_v15 = vadd.f32 %v2123_v20, %v1731_v23  ;;  %v2136_v43 = vmul.f32 -0.5, %v6545_v19  ;;  %v6619_v35 = vadd.f32 1.0, %v6607_v30 }
 0x19a   : > { %v1412_v46 = vadd.f32 %v1348_v9, %v1220_v52  ;;  %v2372_v17 = vadd.f32 %v2132_v8, %v1732_v6  ;;  %vm1029_vm10 = vcmp.ge.f32.partialorder %v6467_v49, 0.0  ;;  %4405 = vrcp.f32 %v6612_v21 }
 0x19b   : > { %v1539_v36 = vmul.f32 %v1475_v10, %v1475_v10  ;;  %v457_v16 = vand.u32 2147483647, %v6605_v61  ;;  %vm1030_vm11 = vcmp.ge.f32.partialorder %v6474_v60, 0.0  ;;  %v2145_v33 = vmul.f32 -0.5, %v6552_v50 }
 0x19c   : > { %v1476_v25 = vsub.f32 1.0, %v1412_v46  ;;  %4407 = vrcp.f32 %v6619_v35  ;;  %v458_v23 = vand.u32 2147483647, %v6615_v44  ;;  %v2139_v26 = vand.u32 2147483647, %v6545_v19 }
 0x19d   : > { %v2435_v57 = vmul.f32 %v1539_v36, %v6508_v51  ;;  %v4398_v58 = vpop.eup %4397  ;;  %v6632_v51 = vmul.f32 0.75, %v263_v29  ;;  %v6636_v38 = vmul.f32 0.75, %v264_v40  ;;  %v1607_v2 = vmax.f32 %v6503_v34, 0.0 }
 0x19e   : > { %v1540_v24 = vmul.f32 %v1476_v25, %v1476_v25  ;;  %v4400_v63 = vpop.eup %4399  ;;  %v837_v4 = vmul.f32 %v4398_v58, %v709_v11  ;;  %v2137_v54 = vadd.f32 1.0, %v2136_v43  ;;  %v1608_v27 = vmax.f32 %v6506_v37, 0.0 }
 0x19f   : > { %v2499_v47 = vmul.f32 %v2435_v57, %v2371_v15  ;;  %v838_v45 = vmul.f32 %v4400_v63, %v6558_v56  ;;  %v2148_v53 = vand.u32 2147483647, %v6552_v50  ;;  %v521_v3 = vsub.f32 0.0, %v457_v16 }
 0x1a0   : > { %v2436_v7 = vmul.f32 %v1540_v24, %v6510_v32  ;;  %v901_v59 = vsub.f32 2.0, %v837_v4  ;;  %v2146_v12 = vadd.f32 1.0, %v2145_v33  ;;  %v522_v62 = vsub.f32 0.0, %v458_v23 }
 0x1a1   : > { %v902_v6 = vsub.f32 2.0, %v838_v45  ;;  %vm6643_vm12 = vcmp.lt.f32.partialorder %v2139_v26, 0.0004427343  ;;  %4409 = vlog2.f32 %v6612_v21  ;;  %v631_v32 = vmul.f32 1.442695, %v521_v3  ;;  %v4402_v11 = vpop.eup %4401 }
 0x1a2   : > { %v2500_v52 = vmul.f32 %v2436_v7, %v2372_v17  ;;  %v965_v10 = vmul.f32 %v4398_v58, %v901_v59  ;;  %v2138_v56 = vmul.f32 %v6545_v19, %v2137_v54  ;;  %v633_v20 = vmul.f32 1.442695, %v522_v62  ;;  %v4404_v46 = vpop.eup %4403 }
 0x1a3   : > { %v966_v36 = vmul.f32 %v4400_v63, %v902_v6  ;;  %vm6650_vm13 = vcmp.lt.f32.partialorder %v2148_v53, 0.0004427343  ;;  %vm1031_vm14 = vcmp.ge.f32.partialorder %v6503_v34, 0.0  ;;  %4411 = vlog2.f32 %v6619_v35 }
 0x1a4   : > { %v2604_v9 = vsel %vm2523_vm9, %v2500_v52, 0.0  ;;  %v1093_v15 = vmul.f32 %v6545_v19, %v965_v10  ;;  %v2147_v43 = vmul.f32 %v6552_v50, %v2146_v12  ;;  %vm1032_vm15 = vcmp.ge.f32.partialorder %v6506_v37, 0.0  ;;  %v4406_v57 = vpop.eup %4405 }
 0x1a5   : > { %v2605_v8 = vadd.f32 %v2604_v9, %v2499_v47  ;;  %v2154_v17 = vmul.f32 -0.5, %v6598_v41  ;;  %4413 = vpow2.f32 %v631_v32  ;;  %v1094_v16 = vmul.f32 %v6552_v50, %v966_v36 }
 0x1a6   : > { %v2157_v24 = vand.u32 2147483647, %v6598_v41  ;;  %v2163_v33 = vmul.f32 -0.5, %v6607_v30  ;;  %4415 = vpow2.f32 %v633_v20  ;;  %v4408_v23 = vpop.eup %4407  ;;  %v1157_v19 = vsel %vm1029_vm10, %v965_v10, %v1093_v15 }
 0x1a7   : > { %2606 = vadd.xlane.f32.xlu0 %v2605_v8  ;;  %v2135_v58 = vmul.f32 0.6931472, %v4402_v11  ;;  %v2144_v26 = vmul.f32 0.6931472, %v4404_v46  ;;  %v839_v63 = vmul.f32 %v4406_v57, %v6612_v21  ;;  %v1158_v7 = vsel %vm1030_vm11, %v966_v36, %v1094_v16 }
 0x1a8   : > { %v1221_v4 = vmul.f32 %v1157_v19, %v6517_v28  ;;  %v1285_v54 = vsub.f32 1.0, %v1157_v19  ;;  %v840_v50 = vmul.f32 %v4408_v23, %v6619_v35  ;;  %v1222_v47 = vmul.f32 %v1158_v7, %v6528_v48 }
 0x1a9   : > { %v1286_v45 = vsub.f32 1.0, %v1158_v7  ;;  %v903_v53 = vsub.f32 2.0, %v839_v63  ;;  %v2155_v3 = vadd.f32 1.0, %v2154_v17  ;;  %v1671_v21 = vmul.f32 %v6572_v39, %v6503_v34  ;;  %v6730_v34 = vld [vmem:[%s4783_s15 + $0x188] sm:$0xff] }
 0x1aa   : > { %v1349_v49 = vmul.f32 %v1285_v54, %v261_v13  ;;  %v904_v52 = vsub.f32 2.0, %v840_v50  ;;  %v2164_v59 = vadd.f32 1.0, %v2163_v33  ;;  %v2141_v12 = vsel %vm6643_vm12, %v2138_v56, %v2135_v58  ;;  %v6717_v50 = vld [vmem:[%s4783_s15 + $0x180] sm:$0xff] }
 0x1ab   : > { %v1350_v60 = vmul.f32 %v1286_v45, %v262_v22  ;;  %v967_v35 = vmul.f32 %v4406_v57, %v903_v53  ;;  %v1672_v62 = vmul.f32 %v6581_v31, %v6506_v37  ;;  %v4410_v6 = vpop.eup %4409  ;;  %v2150_v28 = vsel %vm6650_vm13, %v2147_v43, %v2144_v26 }
 0x1ac   : > { %v1413_v32 = vadd.f32 %v1349_v49, %v1221_v4  ;;  %v968_v13 = vmul.f32 %v4408_v23, %v904_v52  ;;  %v2166_v11 = vand.u32 2147483647, %v6607_v30  ;;  %v2156_v48 = vmul.f32 %v6598_v41, %v2155_v3 }
 0x1ad   : > { %v1414_v9 = vadd.f32 %v1350_v60, %v1222_v47  ;;  %v1095_v10 = vmul.f32 %v6598_v41, %v967_v35  ;;  %vm6686_vm0 = vcmp.lt.f32.partialorder %v2157_v24, 0.0004427343  ;;  %v4412_v14 = vpop.eup %4411  ;;  %v2373_v20 = vadd.f32 %v2141_v12, %v6595_v18  ;;  %v6737_v60 = vld [vmem:[%s4799_s18 + $0x170] sm:$0xff]  ;;  %v6740_v12 = vld [vmem:[%s4799_s18 + $0x178] sm:$0xff] }
 0x1ae   : > { %v1477_v56 = vsub.f32 1.0, %v1413_v32  ;;  %v1096_v46 = vmul.f32 %v6607_v30, %v968_v13  ;;  %v2165_v8 = vmul.f32 %v6607_v30, %v2164_v59  ;;  %v2374_v15 = vadd.f32 %v2150_v28, %v6602_v55 }
 0x1af   : > { %v6693_v36 = vpop.eup %4413  ;;  %v1478_v25 = vsub.f32 1.0, %v1414_v9  ;;  %v1159_v41 = vsel %vm1031_vm14, %v967_v35, %v1095_v10  ;;  %v2153_v43 = vmul.f32 0.6931472, %v4410_v6  ;;  %v2162_v26 = vmul.f32 0.6931472, %v4412_v14 }
 0x1b0   : > { %v6698_v17 = vpop.eup %4415  ;;  %v1541_v57 = vmul.f32 %v1477_v56, %v1477_v56  ;;  %v1160_v18 = vsel %vm1032_vm15, %v968_v13, %v1096_v46  ;;  %v1223_v16 = vmul.f32 %v1159_v41, %v6572_v39  ;;  %v1287_v24 = vsub.f32 1.0, %v1159_v41 }
 0x1b1   : > { %v1542_v30 = vmul.f32 %v1478_v25, %v1478_v25  ;;  %v1224_v33 = vmul.f32 %v1160_v18, %v6581_v31  ;;  %v1288_v23 = vsub.f32 1.0, %v1160_v18  ;;  %v713_v55 = vadd.f32 1.0, %v6693_v36  ;;  %v6760_v18 = vld [vmem:[%s4783_s15 + $0x190] sm:$0xff] }
 0x1b2   : > { %v2437_v19 = vmul.f32 %v1541_v57, %v6578_v0  ;;  %v1351_v58 = vmul.f32 %v1287_v24, %v263_v29  ;;  %v714_v63 = vadd.f32 1.0, %v6698_v17  ;;  %vm6712_vm1 = vcmp.lt.f32.partialorder %v2166_v11, 0.0004427343 }
 0x1b3   : > { %v2438_v7 = vmul.f32 %v1542_v30, %v6585_v42  ;;  %v1352_v4 = vmul.f32 %v1288_v23, %v264_v40  ;;  %4417 = vrcp.f32 %v713_v55  ;;  %v1735_v39 = vsub.f32 %v1607_v2, %v1671_v21 }
 0x1b4   : > { %v2501_v0 = vmul.f32 %v2437_v19, %v2373_v20  ;;  %v1415_v47 = vadd.f32 %v1351_v58, %v1223_v16  ;;  %4419 = vrcp.f32 %v714_v63  ;;  %v1736_v31 = vsub.f32 %v1608_v27, %v1672_v62 }
 0x1b5   : > { %v2502_v29 = vmul.f32 %v2438_v7, %v2374_v15  ;;  %v1416_v42 = vadd.f32 %v1352_v4, %v1224_v33  ;;  %v2159_v40 = vsel %vm6686_vm0, %v2156_v48, %v2153_v43  ;;  %v391_v45 = vadd.f32 %v6632_v51, %v6588_v5  ;;  %v6766_v33 = vld [vmem:[%s4783_s15 + $0x198] sm:$0xff]  ;;  %v6774_v7 = vld [vmem:[%s4799_s18 + $0x180] sm:$0xff] }
 0x1b6   : > { %v1479_v53 = vsub.f32 1.0, %v1415_v47  ;;  %v2168_v3 = vsel %vm6712_vm1, %v2165_v8, %v2162_v26  ;;  %v459_v2 = vand.u32 2147483647, %v6717_v50  ;;  %v392_v37 = vadd.f32 %v6636_v38, %v6591_v1 }
 0x1b7   : > { %v2608_v49 = vsel %vm2523_vm9, %v2502_v29, 0.0  ;;  %v1480_v27 = vsub.f32 1.0, %v1416_v42  ;;  %v2375_v59 = vadd.f32 %v2159_v40, %v1735_v39  ;;  %v2376_v51 = vadd.f32 %v2168_v3, %v1736_v31  ;;  %v6778_v39 = vld [vmem:[%s4799_s18 + $0x188] sm:$0xff] }
 0x1b8   : > { %v2609_v52 = vadd.f32 %v2608_v49, %v2501_v0  ;;  %v1543_v21 = vmul.f32 %v1479_v53, %v1479_v53  ;;  %v460_v35 = vand.u32 2147483647, %v6730_v34  ;;  %v6744_v6 = vmul.f32 0.25, %v6737_v60 }
 0x1b9   : > { %v1544_v5 = vmul.f32 %v1480_v27, %v1480_v27  ;;  %v6747_v32 = vmul.f32 0.25, %v6740_v12  ;;  %v523_v1 = vsub.f32 0.0, %v459_v2  ;;  %v265_v28 = vsub.f32 1.0, %v6737_v60 }
 0x1ba   : > { %2610 = vadd.xlane.f32.xlu1 %v2609_v52  ;;  %v2439_v62 = vmul.f32 %v1543_v21, %v391_v45  ;;  %4421 = vlog2.f32 %v713_v55  ;;  %v524_v13 = vsub.f32 0.0, %v460_v35  ;;  %v266_v9 = vsub.f32 1.0, %v6740_v12 }
 0x1bb   : > { %v2440_v38 = vmul.f32 %v1544_v5, %v392_v37  ;;  %4423 = vlog2.f32 %v714_v63  ;;  %v635_v10 = vmul.f32 1.442695, %v523_v1  ;;  %v1609_v14 = vmax.f32 %v6605_v61, 0.0 }
 0x1bc   : > { %v2503_v11 = vmul.f32 %v2439_v62, %v2375_v59  ;;  %v1610_v56 = vmax.f32 %v6615_v44, 0.0  ;;  %v637_v20 = vmul.f32 1.442695, %v524_v13  ;;  %v1673_v25 = vmul.f32 %v6737_v60, %v6605_v61 }
 0x1bd   : > { %v4418_v48 = vpop.eup %4417  ;;  %v2504_v22 = vmul.f32 %v2440_v38, %v2376_v51  ;;  %v2172_v15 = vmul.f32 -0.5, %v6693_v36  ;;  %4425 = vpow2.f32 %v635_v10  ;;  %v1674_v57 = vmul.f32 %v6740_v12, %v6615_v44 }
 0x1be   : > { %v4420_v46 = vpop.eup %4419  ;;  %v841_v8 = vmul.f32 %v4418_v48, %v713_v55  ;;  %4427 = vpow2.f32 %v637_v20  ;;  %v329_v24 = vmul.f32 0.75, %v265_v28  ;;  %vm1033_vm2 = vcmp.ge.f32.partialorder %v6605_v61, 0.0 }
 0x1bf   : > { %v2612_v41 = vsel %vm2523_vm9, %v2504_v22, 0.0  ;;  %v842_v43 = vmul.f32 %v4420_v46, %v714_v63  ;;  %v330_v23 = vmul.f32 0.75, %v266_v9  ;;  %v2175_v19 = vand.u32 2147483647, %v6693_v36 }
 0x1c0   : > { %v2613_v16 = vadd.f32 %v2612_v41, %v2503_v11  ;;  %v905_v30 = vsub.f32 2.0, %v841_v8  ;;  %v2181_v58 = vmul.f32 -0.5, %v6698_v17  ;;  %vm1034_vm3 = vcmp.ge.f32.partialorder %v6615_v44, 0.0 }
 0x1c1   : > { %v906_v55 = vsub.f32 2.0, %v842_v43  ;;  %v2173_v63 = vadd.f32 1.0, %v2172_v15  ;;  %v461_v4 = vand.u32 2147483647, %v6760_v18  ;;  %v1737_v0 = vsub.f32 %v1609_v14, %v1673_v25 }
 0x1c2   : > { %2614 = vadd.xlane.f32.xlu0 %v2613_v16  ;;  %v969_v26 = vmul.f32 %v4418_v48, %v905_v30  ;;  %v1738_v47 = vsub.f32 %v1610_v56, %v1674_v57  ;;  %v462_v29 = vand.u32 2147483647, %v6766_v33  ;;  %v203_v31 = vmul.f32 0.25, %v6774_v7  ;;  %v6825_v16 = vld [vmem:[%s4783_s15 + $0x1a0] sm:$0xff] }
 0x1c3   : > { %v970_v54 = vmul.f32 %v4420_v46, %v906_v55  ;;  %v204_v40 = vmul.f32 0.25, %v6778_v39  ;;  %v525_v45 = vsub.f32 0.0, %v461_v4  ;;  %vm6785_vm4 = vcmp.lt.f32.partialorder %v2175_v19, 0.0004427343  ;;  %v6828_v19 = vld [vmem:[%s4783_s15 + $0x1a8] sm:$0xff] }
 0x1c4   : > { %v1097_v42 = vmul.f32 %v6693_v36, %v969_v26  ;;  %v4422_v53 = vpop.eup %4421  ;;  %v2182_v49 = vadd.f32 1.0, %v2181_v58  ;;  %v267_v37 = vsub.f32 1.0, %v6774_v7  ;;  %v2174_v21 = vmul.f32 %v6693_v36, %v2173_v63 }
 0x1c5   : > { %v1098_v3 = vmul.f32 %v6698_v17, %v970_v54  ;;  %v4424_v27 = vpop.eup %4423  ;;  %v2184_v59 = vand.u32 2147483647, %v6698_v17  ;;  %v639_v5 = vmul.f32 1.442695, %v525_v45  ;;  %v526_v1 = vsub.f32 0.0, %v462_v29 }
 0x1c6   : > { %v1161_v52 = vsel %vm1033_vm2, %v969_v26, %v1097_v42  ;;  %v2171_v10 = vmul.f32 0.6931472, %v4422_v53  ;;  %v2180_v48 = vmul.f32 0.6931472, %v4424_v27  ;;  %v2183_v44 = vmul.f32 %v6698_v17, %v2182_v49 }
 0x1c7   : > { %v1162_v51 = vsel %vm1034_vm3, %v970_v54, %v1098_v3  ;;  %v1225_v35 = vmul.f32 %v1161_v52, %v6737_v60  ;;  %v1289_v62 = vsub.f32 1.0, %v1161_v52  ;;  %v6797_v38 = vpop.eup %4425  ;;  %4429 = vpow2.f32 %v639_v5 }
 0x1c8   : > { %v1226_v13 = vmul.f32 %v1162_v51, %v6740_v12  ;;  %v1290_v11 = vsub.f32 1.0, %v1162_v51  ;;  %v6800_v61 = vpop.eup %4427  ;;  %v715_v22 = vadd.f32 1.0, %v6797_v38  ;;  %vm6808_vm5 = vcmp.lt.f32.partialorder %v2184_v59, 0.0004427343 }
 0x1c9   : > { %v1353_v36 = vmul.f32 %v1289_v62, %v265_v28  ;;  %v268_v20 = vsub.f32 1.0, %v6778_v39  ;;  %v716_v46 = vadd.f32 1.0, %v6800_v61  ;;  %v331_v60 = vmul.f32 0.75, %v267_v37 }
 0x1ca   : > { %v1354_v14 = vmul.f32 %v1290_v11, %v266_v9  ;;  %4431 = vrcp.f32 %v715_v22  ;;  %v641_v17 = vmul.f32 1.442695, %v526_v1  ;;  %v2177_v12 = vsel %vm6785_vm4, %v2174_v21, %v2171_v10 }
 0x1cb   : > { %v1417_v8 = vadd.f32 %v1353_v36, %v1225_v35  ;;  %v332_v9 = vmul.f32 0.75, %v268_v20  ;;  %4433 = vrcp.f32 %v716_v46  ;;  %v393_v25 = vadd.f32 %v329_v24, %v6744_v6 }
 0x1cc   : > { %v1418_v28 = vadd.f32 %v1354_v14, %v1226_v13  ;;  %v2186_v41 = vsel %vm6808_vm5, %v2183_v44, %v2180_v48  ;;  %v394_v43 = vadd.f32 %v330_v23, %v6747_v32  ;;  %v2377_v55 = vadd.f32 %v2177_v12, %v1737_v0  ;;  %v6837_v23 = vld [vmem:[%s4799_s18 + $0x190] sm:$0xff] }
 0x1cd   : > { %v1481_v15 = vsub.f32 1.0, %v1417_v8  ;;  %4435 = vpow2.f32 %v641_v17  ;;  %v2378_v26 = vadd.f32 %v2186_v41, %v1738_v47  ;;  %v6830_v63 = vadd.f32 %v331_v60, %v203_v31  ;;  %v6845_v47 = vld [vmem:[%s4799_s18 + $0x198] sm:$0xff] }
 0x1ce   : > { %v1482_v57 = vsub.f32 1.0, %v1418_v28  ;;  %v6832_v6 = vadd.f32 %v332_v9, %v204_v40  ;;  %v1611_v4 = vmax.f32 %v6717_v50, 0.0  ;;  %v1612_v32 = vmax.f32 %v6730_v34, 0.0 }
 0x1cf   : > { %v1545_v30 = vmul.f32 %v1481_v15, %v1481_v15  ;;  %v463_v54 = vand.u32 2147483647, %v6825_v16  ;;  %v1675_v42 = vmul.f32 %v6774_v7, %v6717_v50  ;;  %4437 = vlog2.f32 %v715_v22 }
 0x1d0   : > { %v1546_v58 = vmul.f32 %v1482_v57, %v1482_v57  ;;  %v464_v31 = vand.u32 2147483647, %v6828_v19  ;;  %vm1035_vm6 = vcmp.ge.f32.partialorder %v6717_v50, 0.0  ;;  %v1676_v45 = vmul.f32 %v6778_v39, %v6730_v34 }
 0x1d1   : > { %v2441_v24 = vmul.f32 %v1545_v30, %v393_v25  ;;  %v6840_v0 = vpop.eup %4429  ;;  %v205_v53 = vmul.f32 0.25, %v6837_v23  ;;  %vm1036_vm7 = vcmp.ge.f32.partialorder %v6730_v34, 0.0  ;;  %4439 = vlog2.f32 %v716_v46  ;;  %v6914_v34 = vld [vmem:[%s4799_s18 + $0x1a8] sm:$0xff] }
 0x1d2   : > { %v2442_v29 = vmul.f32 %v1546_v58, %v394_v43  ;;  %v6853_v3 = vadd.f32 1.0, %v6840_v0  ;;  %v269_v49 = vsub.f32 1.0, %v6837_v23  ;;  %v527_v27 = vsub.f32 0.0, %v463_v54 }
 0x1d3   : > { %v2505_v40 = vmul.f32 %v2441_v24, %v2377_v55  ;;  %v2190_v21 = vmul.f32 -0.5, %v6797_v38  ;;  %v206_v59 = vmul.f32 0.25, %v6845_v47  ;;  %v270_v5 = vsub.f32 1.0, %v6845_v47 }
 0x1d4   : > { %v2506_v2 = vmul.f32 %v2442_v29, %v2378_v26  ;;  %v4432_v52 = vpop.eup %4431  ;;  %4441 = vrcp.f32 %v6853_v3  ;;  %v333_v1 = vmul.f32 0.75, %v269_v49  ;;  %v528_v13 = vsub.f32 0.0, %v464_v31 }
 0x1d5   : > { %v4434_v51 = vpop.eup %4433  ;;  %v843_v62 = vmul.f32 %v4432_v52, %v715_v22  ;;  %v334_v36 = vmul.f32 0.75, %v270_v5  ;;  %v643_v48 = vmul.f32 1.442695, %v527_v27  ;;  %v6866_v14 = vsub.f32 %v1611_v4, %v1675_v42 }
 0x1d6   : > { %v2616_v35 = vsel %vm2523_vm9, %v2506_v2, 0.0  ;;  %v844_v10 = vmul.f32 %v4434_v51, %v716_v46  ;;  %v2193_v56 = vand.u32 2147483647, %v6797_v38  ;;  %v2199_v8 = vmul.f32 -0.5, %v6800_v61 }
 0x1d7   : > { %v2617_v11 = vadd.f32 %v2616_v35, %v2505_v40  ;;  %v907_v44 = vsub.f32 2.0, %v843_v62  ;;  %v6870_v60 = vpop.eup %4435  ;;  %v2191_v17 = vadd.f32 1.0, %v2190_v21  ;;  %v2202_v28 = vand.u32 2147483647, %v6800_v61 }
 0x1d8   : > { %v908_v22 = vsub.f32 2.0, %v844_v10  ;;  %4443 = vpow2.f32 %v643_v48  ;;  %v6873_v12 = vsub.f32 %v1612_v32, %v1676_v45  ;;  %v718_v9 = vadd.f32 1.0, %v6870_v60 }
 0x1d9   : > { %2618 = vadd.xlane.f32.xlu1 %v2617_v11  ;;  %v971_v46 = vmul.f32 %v4432_v52, %v907_v44  ;;  %v645_v25 = vmul.f32 1.442695, %v528_v13  ;;  %v6876_v41 = vadd.f32 %v333_v1, %v205_v53  ;;  %v6878_v43 = vadd.f32 %v334_v36, %v206_v59  ;;  %v4438_v30 = vpop.eup %4437  ;;  %v6904_v52 = vld [vmem:[%s4799_s18 + $0x1a0] sm:$0xff] }
 0x1da   : > { %v972_v15 = vmul.f32 %v4434_v51, %v908_v22  ;;  %v1613_v57 = vmax.f32 %v6760_v18, 0.0  ;;  %vm6882_vm8 = vcmp.lt.f32.partialorder %v2193_v56, 0.0004427343  ;;  %v2200_v26 = vadd.f32 1.0, %v2199_v8 }
 0x1db   : > { %v1099_v55 = vmul.f32 %v6797_v38, %v971_v46  ;;  %4445 = vrcp.f32 %v718_v9  ;;  %v2192_v4 = vmul.f32 %v6797_v38, %v2191_v17  ;;  %vm6888_vm10 = vcmp.lt.f32.partialorder %v2202_v28, 0.0004427343  ;;  %v4440_v29 = vpop.eup %4439 }
 0x1dc   : > { %v1100_v24 = vmul.f32 %v6800_v61, %v972_v15  ;;  %vm1037_vm11 = vcmp.ge.f32.partialorder %v6760_v18, 0.0  ;;  %v1677_v54 = vmul.f32 %v6837_v23, %v6760_v18  ;;  %v1614_v31 = vmax.f32 %v6766_v33, 0.0 }
 0x1dd   : > { %v1163_v42 = vsel %vm1035_vm6, %v971_v46, %v1099_v55  ;;  %v1678_v40 = vmul.f32 %v6845_v47, %v6766_v33  ;;  %4447 = vpow2.f32 %v645_v25  ;;  %v2189_v27 = vmul.f32 0.6931472, %v4438_v30 }
 0x1de   : > { %v4442_v38 = vpop.eup %4441  ;;  %v1164_v45 = vsel %vm1036_vm7, %v972_v15, %v1100_v24  ;;  %v1227_v53 = vmul.f32 %v1163_v42, %v6774_v7  ;;  %v1291_v2 = vsub.f32 1.0, %v1163_v42  ;;  %v2201_v59 = vmul.f32 %v6800_v61, %v2200_v26 }
 0x1df   : > { %v1228_v50 = vmul.f32 %v1164_v45, %v6778_v39  ;;  %v1292_v21 = vsub.f32 1.0, %v1164_v45  ;;  %v845_v51 = vmul.f32 %v4442_v38, %v6853_v3  ;;  %v2198_v62 = vmul.f32 0.6931472, %v4440_v29 }
 0x1e0   : > { %v1355_v35 = vmul.f32 %v1291_v2, %v267_v37  ;;  %v6911_v1 = vsub.f32 %v1613_v57, %v1677_v54  ;;  %v207_v13 = vmul.f32 0.25, %v6904_v52  ;;  %v6920_v36 = vmul.f32 0.25, %v6914_v34 }
 0x1e1   : > { %v1356_v11 = vmul.f32 %v1292_v21, %v268_v20  ;;  %v909_v10 = vsub.f32 2.0, %v845_v51  ;;  %v271_v61 = vsub.f32 1.0, %v6904_v52  ;;  %v2195_v37 = vsel %vm6882_vm8, %v2192_v4, %v2189_v27  ;;  %v6967_v21 = vld [vmem:[%s4783_s15 + $0x1b8] sm:$0xff] }
 0x1e2   : > { %v6923_v48 = vpop.eup %4443  ;;  %v1419_v7 = vadd.f32 %v1355_v35, %v1227_v53  ;;  %v6927_v44 = vsub.f32 %v1614_v31, %v1678_v40  ;;  %4449 = vlog2.f32 %v6853_v3  ;;  %vm1038_vm12 = vcmp.ge.f32.partialorder %v6766_v33, 0.0 }
 0x1e3   : > { %v1420_v56 = vadd.f32 %v1356_v11, %v1228_v50  ;;  %v973_v8 = vmul.f32 %v4442_v38, %v909_v10  ;;  %4451 = vlog2.f32 %v718_v9  ;;  %v6932_v39 = vadd.f32 1.0, %v6923_v48 }
 0x1e4   : > { %v1483_v20 = vsub.f32 1.0, %v1419_v7  ;;  %v2204_v22 = vsel %vm6888_vm10, %v2201_v59, %v2198_v62  ;;  %v272_v17 = vsub.f32 1.0, %v6914_v34  ;;  %v335_v28 = vmul.f32 0.75, %v271_v61 }
 0x1e5   : > { %v4446_v46 = vpop.eup %4445  ;;  %v1484_v25 = vsub.f32 1.0, %v1420_v56  ;;  %v1101_v3 = vmul.f32 %v6840_v0, %v973_v8  ;;  %v2208_v15 = vmul.f32 -0.5, %v6840_v0  ;;  %4453 = vrcp.f32 %v6932_v39 }
 0x1e6   : > { %v1547_v57 = vmul.f32 %v1483_v20, %v1483_v20  ;;  %v2379_v30 = vadd.f32 %v2195_v37, %v6866_v14  ;;  %v846_v55 = vmul.f32 %v4446_v46, %v718_v9  ;;  %v2211_v58 = vand.u32 2147483647, %v6840_v0  ;;  %v6953_v9 = vld [vmem:[%s4783_s15 + $0x1b0] sm:$0xff] }
 0x1e7   : > { %v6944_v26 = vpop.eup %4447  ;;  %v1548_v24 = vmul.f32 %v1484_v25, %v1484_v25  ;;  %v2380_v4 = vadd.f32 %v2204_v22, %v6873_v12  ;;  %v1165_v32 = vsel %vm1037_vm11, %v973_v8, %v1101_v3  ;;  %v2217_v54 = vmul.f32 -0.5, %v6870_v60 }
 0x1e8   : > { %v2443_v29 = vmul.f32 %v1547_v57, %v6830_v63  ;;  %v910_v42 = vsub.f32 2.0, %v846_v55  ;;  %v1229_v31 = vmul.f32 %v1165_v32, %v6837_v23  ;;  %v1293_v14 = vsub.f32 1.0, %v1165_v32 }
 0x1e9   : > { %v2444_v40 = vmul.f32 %v1548_v24, %v6832_v6  ;;  %v2209_v38 = vadd.f32 1.0, %v2208_v15  ;;  %v2220_v45 = vand.u32 2147483647, %v6870_v60  ;;  %v720_v12 = vadd.f32 1.0, %v6944_v26 }
 0x1ea   : > { %v2507_v18 = vmul.f32 %v2443_v29, %v2379_v30  ;;  %v974_v53 = vmul.f32 %v4446_v46, %v910_v42  ;;  %v1357_v2 = vmul.f32 %v1293_v14, %v269_v49  ;;  %v6962_v63 = vmul.f32 0.75, %v272_v17  ;;  %v7004_v42 = vld [vmem:[%s4799_s18 + $0x1b0] sm:$0xff] }
 0x1eb   : > { %v2508_v27 = vmul.f32 %v2444_v40, %v2380_v4  ;;  %v6964_v50 = vadd.f32 %v335_v28, %v207_v13  ;;  %4455 = vrcp.f32 %v720_v12  ;;  %v465_v6 = vand.u32 2147483647, %v6953_v9 }
 0x1ec   : > { %v4450_v59 = vpop.eup %4449  ;;  %v1102_v51 = vmul.f32 %v6870_v60, %v974_v53  ;;  %v1421_v35 = vadd.f32 %v1357_v2, %v1229_v31  ;;  %vm6971_vm13 = vcmp.lt.f32.partialorder %v2211_v58, 0.0004427343  ;;  %v2218_v23 = vadd.f32 1.0, %v2217_v54 }
 0x1ed   : > { %v4452_v49 = vpop.eup %4451  ;;  %v2620_v11 = vsel %vm2523_vm9, %v2508_v27, 0.0  ;;  %v2210_v13 = vmul.f32 %v6840_v0, %v2209_v38  ;;  %vm6977_vm14 = vcmp.lt.f32.partialorder %v2220_v45, 0.0004427343  ;;  %vm1039_vm15 = vcmp.ge.f32.partialorder %v6825_v16, 0.0  ;;  %v7010_v45 = vld [vmem:[%s4799_s18 + $0x1b8] sm:$0xff] }
 0x1ee   : > { %v1615_v7 = vmax.f32 %v6825_v16, 0.0  ;;  %v2621_v37 = vadd.f32 %v2620_v11, %v2507_v18  ;;  %v1166_v56 = vsel %vm1038_vm12, %v974_v53, %v1102_v51  ;;  %v1485_v8 = vsub.f32 1.0, %v1421_v35 }
 0x1ef   : > { %v466_v20 = vand.u32 2147483647, %v6967_v21  ;;  %v4454_v22 = vpop.eup %4453  ;;  %v1230_v28 = vmul.f32 %v1166_v56, %v6845_v47  ;;  %v1294_v46 = vsub.f32 1.0, %v1166_v56  ;;  %v2207_v0 = vmul.f32 0.6931472, %v4450_v59 }
 0x1f0   : > { %v529_v25 = vsub.f32 0.0, %v465_v6  ;;  %2622 = vadd.xlane.f32.xlu0 %v2621_v37  ;;  %v2216_v3 = vmul.f32 0.6931472, %v4452_v49  ;;  %v2219_v15 = vmul.f32 %v6870_v60, %v2218_v23  ;;  %v847_v57 = vmul.f32 %v4454_v22, %v6932_v39  ;;  %v7025_v37 = vld [vmem:[%s4783_s15 + $0x1c0] sm:$0xff] }
 0x1f1   : > { %v530_v30 = vsub.f32 0.0, %v466_v20  ;;  %v1358_v33 = vmul.f32 %v1294_v46, %v270_v5  ;;  %v1616_v55 = vmax.f32 %v6828_v19, 0.0  ;;  %4457 = vlog2.f32 %v6932_v39 }
 0x1f2   : > { %v647_v58 = vmul.f32 1.442695, %v529_v25  ;;  %v1549_v24 = vmul.f32 %v1485_v8, %v1485_v8  ;;  %v911_v4 = vsub.f32 2.0, %v847_v57  ;;  %4459 = vlog2.f32 %v720_v12 }
 0x1f3   : > { %v649_v32 = vmul.f32 1.442695, %v530_v30  ;;  %v1422_v54 = vadd.f32 %v1358_v33, %v1230_v28  ;;  %v2213_v60 = vsel %vm6971_vm13, %v2210_v13, %v2207_v0  ;;  %vm1040_vm0 = vcmp.ge.f32.partialorder %v6828_v19, 0.0 }
 0x1f4   : > { %v6998_v47 = vmul.f32 %v6904_v52, %v6825_v16  ;;  %4461 = vpow2.f32 %v647_v58  ;;  %v2222_v5 = vsel %vm6977_vm14, %v2219_v15, %v2216_v3  ;;  %v975_v39 = vmul.f32 %v4454_v22, %v911_v4 }
 0x1f5   : > { %v2226_v29 = vmul.f32 -0.5, %v6923_v48  ;;  %4463 = vpow2.f32 %v649_v32  ;;  %v4456_v31 = vpop.eup %4455  ;;  %v1486_v14 = vsub.f32 1.0, %v1422_v54  ;;  %v1680_v40 = vmul.f32 %v6914_v34, %v6828_v19 }
 0x1f6   : > { %v2235_v38 = vmul.f32 -0.5, %v6944_v26  ;;  %v209_v18 = vmul.f32 0.25, %v7004_v42  ;;  %v2381_v53 = vadd.f32 %v2213_v60, %v6911_v1  ;;  %v2445_v2 = vmul.f32 %v1549_v24, %v6876_v41 }
 0x1f7   : > { %v848_v27 = vmul.f32 %v4456_v31, %v720_v12  ;;  %v1103_v6 = vmul.f32 %v6923_v48, %v975_v39  ;;  %v1550_v59 = vmul.f32 %v1486_v14, %v1486_v14  ;;  %v2382_v51 = vadd.f32 %v2222_v5, %v6927_v44  ;;  %v7028_v44 = vld [vmem:[%s4783_s15 + $0x1c8] sm:$0xff] }
 0x1f8   : > { %v2229_v35 = vand.u32 2147483647, %v6923_v48  ;;  %v273_v62 = vsub.f32 1.0, %v7004_v42  ;;  %v2227_v11 = vadd.f32 1.0, %v2226_v29  ;;  %v274_v1 = vsub.f32 1.0, %v7010_v45 }
 0x1f9   : > { %v912_v23 = vsub.f32 2.0, %v848_v27  ;;  %v1167_v49 = vsel %vm1039_vm15, %v975_v39, %v1103_v6  ;;  %v2446_v41 = vmul.f32 %v1550_v59, %v6878_v43  ;;  %v2236_v10 = vadd.f32 1.0, %v2235_v38 }
 0x1fa   : > { %v1231_v12 = vmul.f32 %v1167_v49, %v6904_v52  ;;  %v1295_v13 = vsub.f32 1.0, %v1167_v49  ;;  %v2509_v56 = vmul.f32 %v2445_v2, %v2381_v53  ;;  %v210_v20 = vmul.f32 0.25, %v7010_v45 }
 0x1fb   : > { %v976_v8 = vmul.f32 %v4456_v31, %v912_v23  ;;  %v337_v22 = vmul.f32 0.75, %v273_v62  ;;  %v4458_v28 = vpop.eup %4457  ;;  %v2510_v46 = vmul.f32 %v2446_v41, %v2382_v51  ;;  %vm7035_vm1 = vcmp.lt.f32.partialorder %v2229_v35, 0.0004427343  ;;  %v7088_v41 = vld [vmem:[%s4799_s18 + $0x1c0] sm:$0xff] }
 0x1fc   : > { %v1359_v43 = vmul.f32 %v1295_v13, %v271_v61  ;;  %v338_v25 = vmul.f32 0.75, %v274_v1  ;;  %v4460_v3 = vpop.eup %4459  ;;  %v2228_v57 = vmul.f32 %v6923_v48, %v2227_v11  ;;  %v467_v30 = vand.u32 2147483647, %v7025_v37  ;;  %v7094_v13 = vld [vmem:[%s4783_s15 + $0x1d0] sm:$0xff] }
 0x1fd   : > { %v1104_v15 = vmul.f32 %v6944_v26, %v976_v8  ;;  %v468_v33 = vand.u32 2147483647, %v7028_v44  ;;  %v2624_v52 = vsel %vm2523_vm9, %v2510_v46, 0.0  ;;  %v2237_v24 = vmul.f32 %v6944_v26, %v2236_v10 }
 0x1fe   : > { %v7045_v58 = vpop.eup %4461  ;;  %v1423_v61 = vadd.f32 %v1359_v43, %v1231_v12  ;;  %v2238_v4 = vand.u32 2147483647, %v6944_v26  ;;  %v2625_v54 = vadd.f32 %v2624_v52, %v2509_v56  ;;  %v2225_v48 = vmul.f32 0.6931472, %v4458_v28  ;;  %v7091_v12 = vld [vmem:[%s4799_s18 + $0x1c8] sm:$0xff] }
 0x1ff   : > { %v7050_v32 = vpop.eup %4463  ;;  %v1168_v60 = vsel %vm1040_vm0, %v976_v8, %v1104_v15  ;;  %v721_v5 = vadd.f32 1.0, %v7045_v58  ;;  %v2234_v38 = vmul.f32 0.6931472, %v4460_v3  ;;  %v531_v53 = vsub.f32 0.0, %v467_v30 }
 0x200   : > { %v1232_v39 = vmul.f32 %v1168_v60, %v6914_v34  ;;  %v1296_v29 = vsub.f32 1.0, %v1168_v60  ;;  %v1487_v31 = vsub.f32 1.0, %v1423_v61  ;;  %v722_v14 = vadd.f32 1.0, %v7050_v32  ;;  %2626 = vadd.xlane.f32.xlu1 %v2625_v54 }
 0x201   : > { %4465 = vrcp.f32 %v721_v5  ;;  %v532_v26 = vsub.f32 0.0, %v468_v33  ;;  %v1743_v27 = vsub.f32 %v1615_v7, %v6998_v47  ;;  %vm7062_vm2 = vcmp.lt.f32.partialorder %v2238_v4, 0.0004427343 }
 0x202   : > { %v1360_v2 = vmul.f32 %v1296_v29, %v272_v17  ;;  %4467 = vrcp.f32 %v722_v14  ;;  %v400_v59 = vadd.f32 %v6962_v63, %v6920_v36  ;;  %v1551_v51 = vmul.f32 %v1487_v31, %v1487_v31 }
 0x203   : > { %v1744_v35 = vsub.f32 %v1616_v55, %v1680_v40  ;;  %v2231_v34 = vsel %vm7035_vm1, %v2228_v57, %v2225_v48  ;;  %v7072_v17 = vadd.f32 %v337_v22, %v209_v18  ;;  %v7074_v7 = vadd.f32 %v338_v25, %v210_v20  ;;  %v7081_v55 = vld [vmem:[%s4783_s15 + $0x1d8] sm:$0xff] }
 0x204   : > { %v1424_v16 = vadd.f32 %v1360_v2, %v1232_v39  ;;  %v1617_v47 = vmax.f32 %v6953_v9, 0.0  ;;  %v2240_v36 = vsel %vm7062_vm2, %v2237_v24, %v2234_v38  ;;  %v1618_v63 = vmax.f32 %v6967_v21, 0.0 }
 0x205   : > { %v651_v19 = vmul.f32 1.442695, %v531_v53  ;;  %v653_v23 = vmul.f32 1.442695, %v532_v26  ;;  %v2383_v49 = vadd.f32 %v2231_v34, %v1743_v27  ;;  %v1681_v11 = vmul.f32 %v7004_v42, %v6953_v9 }
 0x206   : > { %v1488_v40 = vsub.f32 1.0, %v1424_v16  ;;  %v1682_v18 = vmul.f32 %v7010_v45, %v6967_v21  ;;  %v2447_v10 = vmul.f32 %v1551_v51, %v6964_v50  ;;  %v211_v56 = vmul.f32 0.25, %v7088_v41 }
 0x207   : > { %v212_v8 = vmul.f32 0.25, %v7091_v12  ;;  %4469 = vpow2.f32 %v651_v19  ;;  %v2384_v22 = vadd.f32 %v2240_v36, %v1744_v35  ;;  %v2244_v28 = vmul.f32 -0.5, %v7045_v58 }
 0x208   : > { %v1552_v20 = vmul.f32 %v1488_v40, %v1488_v40  ;;  %4471 = vpow2.f32 %v653_v23  ;;  %vm1041_vm3 = vcmp.ge.f32.partialorder %v6953_v9, 0.0  ;;  %v275_v46 = vsub.f32 1.0, %v7088_v41 }
 0x209   : > { %4473 = vlog2.f32 %v721_v5  ;;  %v469_v43 = vand.u32 2147483647, %v7094_v13  ;;  %v470_v0 = vand.u32 2147483647, %v7081_v55  ;;  %vm1042_vm4 = vcmp.ge.f32.partialorder %v6967_v21, 0.0 }
 0x20a   : > { %v2448_v50 = vmul.f32 %v1552_v20, %v400_v59  ;;  %4475 = vlog2.f32 %v722_v14  ;;  %v2253_v25 = vmul.f32 -0.5, %v7050_v32  ;;  %v276_v3 = vsub.f32 1.0, %v7091_v12 }
 0x20b   : > { %v4466_v15 = vpop.eup %4465  ;;  %v2511_v57 = vmul.f32 %v2447_v10, %v2383_v49  ;;  %v339_v30 = vmul.f32 0.75, %v275_v46  ;;  %v533_v33 = vsub.f32 0.0, %v469_v43  ;;  %v534_v52 = vsub.f32 0.0, %v470_v0  ;;  %v7149_v43 = vld [vmem:[%s4799_s18 + $0x1d0] sm:$0xff] }
 0x20c   : > { %v4468_v61 = vpop.eup %4467  ;;  %v2512_v24 = vmul.f32 %v2448_v50, %v2384_v22  ;;  %v849_v4 = vmul.f32 %v4466_v15, %v721_v5  ;;  %v2245_v54 = vadd.f32 1.0, %v2244_v28  ;;  %v340_v60 = vmul.f32 0.75, %v276_v3 }
 0x20d   : > { %v850_v48 = vmul.f32 %v4468_v61, %v722_v14  ;;  %v2247_v39 = vand.u32 2147483647, %v7045_v58  ;;  %v655_v29 = vmul.f32 1.442695, %v533_v33  ;;  %v657_v31 = vmul.f32 1.442695, %v534_v52 }
 0x20e   : > { %v2628_v38 = vsel %vm2523_vm9, %v2512_v24, 0.0  ;;  %v913_v53 = vsub.f32 2.0, %v849_v4  ;;  %v2254_v26 = vadd.f32 1.0, %v2253_v25  ;;  %v2256_v2 = vand.u32 2147483647, %v7050_v32 }
 0x20f   : > { %v2629_v27 = vadd.f32 %v2628_v38, %v2511_v57  ;;  %v914_v6 = vsub.f32 2.0, %v850_v48  ;;  %v7114_v59 = vsub.f32 %v1617_v47, %v1681_v11  ;;  %4477 = vpow2.f32 %v655_v29 }
 0x210   : > { %v977_v5 = vmul.f32 %v4466_v15, %v913_v53  ;;  %v7116_v51 = vsub.f32 %v1618_v63, %v1682_v18  ;;  %v7118_v35 = vadd.f32 %v339_v30, %v211_v56  ;;  %4479 = vpow2.f32 %v657_v31 }
 0x211   : > { %v7120_v14 = vpop.eup %4469  ;;  %2630 = vadd.xlane.f32.xlu0 %v2629_v27  ;;  %v978_v34 = vmul.f32 %v4468_v61, %v914_v6  ;;  %v2246_v16 = vmul.f32 %v7045_v58, %v2245_v54  ;;  %vm7123_vm5 = vcmp.lt.f32.partialorder %v2247_v39, 0.0004427343  ;;  %v7127_v19 = vadd.f32 %v340_v60, %v212_v8 }
 0x212   : > { %v7129_v47 = vpop.eup %4471  ;;  %v1105_v63 = vmul.f32 %v7045_v58, %v977_v5  ;;  %v2255_v23 = vmul.f32 %v7050_v32, %v2254_v26  ;;  %vm7133_vm6 = vcmp.lt.f32.partialorder %v2256_v2, 0.0004427343  ;;  %v723_v49 = vadd.f32 1.0, %v7120_v14 }
 0x213   : > { %v4474_v11 = vpop.eup %4473  ;;  %v1106_v18 = vmul.f32 %v7050_v32, %v978_v34  ;;  %v724_v10 = vadd.f32 1.0, %v7129_v47  ;;  %v1619_v56 = vmax.f32 %v7025_v37, 0.0  ;;  %v1620_v8 = vmax.f32 %v7028_v44, 0.0  ;;  %v7152_v32 = vld [vmem:[%s4799_s18 + $0x1d8] sm:$0xff] }
 0x214   : > { %v4476_v20 = vpop.eup %4475  ;;  %v1169_v58 = vsel %vm1041_vm3, %v977_v5, %v1105_v63  ;;  %4481 = vrcp.f32 %v723_v49  ;;  %v1683_v22 = vmul.f32 %v7088_v41, %v7025_v37  ;;  %v1684_v28 = vmul.f32 %v7091_v12, %v7028_v44 }
 0x215   : > { %v1170_v0 = vsel %vm1042_vm4, %v978_v34, %v1106_v18  ;;  %v1233_v50 = vmul.f32 %v1169_v58, %v7004_v42  ;;  %v1297_v25 = vsub.f32 1.0, %v1169_v58  ;;  %4483 = vrcp.f32 %v724_v10 }
 0x216   : > { %v1234_v9 = vmul.f32 %v1170_v0, %v7010_v45  ;;  %v1298_v15 = vsub.f32 1.0, %v1170_v0  ;;  %v2243_v57 = vmul.f32 0.6931472, %v4474_v11  ;;  %v7159_v30 = vmul.f32 0.25, %v7149_v43 }
 0x217   : > { %v1361_v33 = vmul.f32 %v1297_v25, %v273_v62  ;;  %v2252_v52 = vmul.f32 0.6931472, %v4476_v20  ;;  %v277_v61 = vsub.f32 1.0, %v7149_v43  ;;  %v278_v21 = vsub.f32 1.0, %v7152_v32  ;;  %v7220_v25 = vld [vmem:[%s4783_s15 + $0x1e8] sm:$0xff] }
 0x218   : > { %v1362_v24 = vmul.f32 %v1298_v15, %v274_v1  ;;  %v7167_v4 = vsub.f32 %v1619_v56, %v1683_v22  ;;  %v7169_v54 = vsub.f32 %v1620_v8, %v1684_v28  ;;  %v7172_v60 = vmul.f32 0.25, %v7152_v32  ;;  %v7209_v56 = vld [vmem:[%s4783_s15 + $0x1e0] sm:$0xff] }
 0x219   : > { %v7174_v48 = vpop.eup %4477  ;;  %v1425_v39 = vadd.f32 %v1361_v33, %v1233_v50  ;;  %4485 = vlog2.f32 %v723_v49  ;;  %v7178_v42 = vmul.f32 0.75, %v277_v61  ;;  %v7182_v62 = vmul.f32 0.75, %v278_v21 }
 0x21a   : > { %v7184_v45 = vpop.eup %4479  ;;  %v1426_v1 = vadd.f32 %v1362_v24, %v1234_v9  ;;  %v2249_v29 = vsel %vm7123_vm5, %v2246_v16, %v2243_v57  ;;  %v2262_v31 = vmul.f32 -0.5, %v7120_v14  ;;  %v7190_v38 = vadd.f32 1.0, %v7174_v48 }
 0x21b   : > { %v1489_v53 = vsub.f32 1.0, %v1425_v39  ;;  %v2258_v26 = vsel %vm7133_vm6, %v2255_v23, %v2252_v52  ;;  %4487 = vlog2.f32 %v724_v10  ;;  %v7195_v2 = vadd.f32 1.0, %v7184_v45 }
 0x21c   : > { %v1490_v27 = vsub.f32 1.0, %v1426_v1  ;;  %vm1043_vm7 = vcmp.ge.f32.partialorder %v7025_v37, 0.0  ;;  %v2271_v6 = vmul.f32 -0.5, %v7129_v47  ;;  %4489 = vrcp.f32 %v7190_v38 }
 0x21d   : > { %v1621_v5 = vmax.f32 %v7094_v13, 0.0  ;;  %v1553_v34 = vmul.f32 %v1489_v53, %v1489_v53  ;;  %v2385_v16 = vadd.f32 %v2249_v29, %v7114_v59  ;;  %vm1044_vm8 = vcmp.ge.f32.partialorder %v7028_v44, 0.0 }
 0x21e   : > { %4491 = vrcp.f32 %v7195_v2  ;;  %v1685_v36 = vmul.f32 %v7149_v43, %v7094_v13  ;;  %v4482_v63 = vpop.eup %4481  ;;  %v1554_v23 = vmul.f32 %v1490_v27, %v1490_v27  ;;  %v2386_v40 = vadd.f32 %v2258_v26, %v7116_v51 }
 0x21f   : > { %v2263_v11 = vadd.f32 1.0, %v2262_v31  ;;  %v1622_v18 = vmax.f32 %v7081_v55, 0.0  ;;  %v4484_v8 = vpop.eup %4483  ;;  %v2449_v59 = vmul.f32 %v1553_v34, %v7072_v17  ;;  %v851_v20 = vmul.f32 %v4482_v63, %v723_v49 }
 0x220   : > { %v2265_v58 = vand.u32 2147483647, %v7120_v14  ;;  %v2274_v22 = vand.u32 2147483647, %v7129_v47  ;;  %v2450_v28 = vmul.f32 %v1554_v23, %v7074_v7  ;;  %v852_v0 = vmul.f32 %v4484_v8, %v724_v10 }
 0x221   : > { %v2272_v50 = vadd.f32 1.0, %v2271_v6  ;;  %v7217_v51 = vmul.f32 %v7152_v32, %v7081_v55  ;;  %v2513_v9 = vmul.f32 %v2449_v59, %v2385_v16  ;;  %v915_v15 = vsub.f32 2.0, %v851_v20 }
 0x222   : > { %v7222_v57 = vsub.f32 %v1621_v5, %v1685_v36  ;;  %v471_v17 = vand.u32 2147483647, %v7209_v56  ;;  %v2514_v49 = vmul.f32 %v2450_v28, %v2386_v40  ;;  %v916_v33 = vsub.f32 2.0, %v852_v0 }
 0x223   : > { %v2264_v52 = vmul.f32 %v7120_v14, %v2263_v11  ;;  %4493 = vlog2.f32 %v7190_v38  ;;  %v4486_v7 = vpop.eup %4485  ;;  %v979_v10 = vmul.f32 %v4482_v63, %v915_v15  ;;  %vm7227_vm10 = vcmp.lt.f32.partialorder %v2265_v58, 0.0004427343 }
 0x224   : > { %vm7231_vm11 = vcmp.lt.f32.partialorder %v2274_v22, 0.0004427343  ;;  %v472_v1 = vand.u32 2147483647, %v7220_v25  ;;  %v2632_v29 = vsel %vm2523_vm9, %v2514_v49, 0.0  ;;  %v980_v31 = vmul.f32 %v4484_v8, %v916_v33 }
 0x225   : > { %v2273_v53 = vmul.f32 %v7129_v47, %v2272_v50  ;;  %vm1045_vm12 = vcmp.ge.f32.partialorder %v7094_v13, 0.0  ;;  %v2280_v26 = vmul.f32 -0.5, %v7174_v48  ;;  %v4488_v27 = vpop.eup %4487  ;;  %v2633_v6 = vadd.f32 %v2632_v29, %v2513_v9 }
 0x226   : > { %v1107_v5 = vmul.f32 %v7120_v14, %v979_v10  ;;  %vm1046_vm13 = vcmp.ge.f32.partialorder %v7081_v55, 0.0  ;;  %4495 = vlog2.f32 %v7195_v2  ;;  %v535_v34 = vsub.f32 0.0, %v471_v17  ;;  %v4490_v16 = vpop.eup %4489 }
 0x227   : > { %v1108_v36 = vmul.f32 %v7129_v47, %v980_v31  ;;  %v2261_v63 = vmul.f32 0.6931472, %v4486_v7  ;;  %v2283_v23 = vand.u32 2147483647, %v7174_v48  ;;  %v2289_v40 = vmul.f32 -0.5, %v7184_v45  ;;  %2634 = vadd.xlane.f32.xlu1 %v2633_v6 }
 0x228   : > { %v4492_v11 = vpop.eup %4491  ;;  %v1171_v8 = vsel %vm1043_vm7, %v979_v10, %v1107_v5  ;;  %v853_v14 = vmul.f32 %v4490_v16, %v7190_v38  ;;  %v536_v59 = vsub.f32 0.0, %v472_v1  ;;  %v659_v20 = vmul.f32 1.442695, %v535_v34 }
 0x229   : > { %v1172_v58 = vsel %vm1044_vm8, %v980_v31, %v1108_v36  ;;  %v1235_v22 = vmul.f32 %v1171_v8, %v7088_v41  ;;  %v1299_v47 = vsub.f32 1.0, %v1171_v8  ;;  %v854_v28 = vmul.f32 %v4492_v11, %v7195_v2 }
 0x22a   : > { %v1236_v0 = vmul.f32 %v1172_v58, %v7091_v12  ;;  %v1300_v50 = vsub.f32 1.0, %v1172_v58  ;;  %v917_v9 = vsub.f32 2.0, %v853_v14  ;;  %v2281_v15 = vadd.f32 1.0, %v2280_v26 }
 0x22b   : > { %v1363_v37 = vmul.f32 %v1299_v47, %v275_v46  ;;  %v2270_v17 = vmul.f32 0.6931472, %v4488_v27  ;;  %v918_v38 = vsub.f32 2.0, %v854_v28  ;;  %4497 = vpow2.f32 %v659_v20  ;;  %v7303_v28 = vld [vmem:[%s4783_s15 + $0x1f8] sm:$0xff] }
 0x22c   : > { %v1364_v44 = vmul.f32 %v1300_v50, %v276_v3  ;;  %v981_v49 = vmul.f32 %v4490_v16, %v917_v9  ;;  %v2292_v33 = vand.u32 2147483647, %v7184_v45  ;;  %v661_v7 = vmul.f32 1.442695, %v536_v59 }
 0x22d   : > { %v4494_v10 = vpop.eup %4493  ;;  %v1427_v2 = vadd.f32 %v1363_v37, %v1235_v22  ;;  %v2267_v1 = vsel %vm7227_vm10, %v2264_v52, %v2261_v63  ;;  %v982_v29 = vmul.f32 %v4492_v11, %v918_v38  ;;  %vm7261_vm14 = vcmp.lt.f32.partialorder %v2283_v23, 0.0004427343 }
 0x22e   : > { %v1428_v41 = vadd.f32 %v1364_v44, %v1236_v0  ;;  %v1109_v46 = vmul.f32 %v7174_v48, %v981_v49  ;;  %v2290_v26 = vadd.f32 1.0, %v2289_v40  ;;  %4499 = vpow2.f32 %v661_v7 }
 0x22f   : > { %v1491_v12 = vsub.f32 1.0, %v1427_v2  ;;  %v2276_v3 = vsel %vm7231_vm11, %v2273_v53, %v2270_v17  ;;  %v1110_v27 = vmul.f32 %v7184_v45, %v982_v29  ;;  %v2282_v6 = vmul.f32 %v7174_v48, %v2281_v15 }
 0x230   : > { %v4496_v24 = vpop.eup %4495  ;;  %v1492_v52 = vsub.f32 1.0, %v1428_v41  ;;  %v2387_v5 = vadd.f32 %v2267_v1, %v7167_v4  ;;  %v1173_v34 = vsel %vm1045_vm12, %v981_v49, %v1109_v46  ;;  %v2279_v16 = vmul.f32 0.6931472, %v4494_v10 }
 0x231   : > { %v1555_v36 = vmul.f32 %v1491_v12, %v1491_v12  ;;  %v1174_v63 = vsel %vm1046_vm13, %v982_v29, %v1110_v27  ;;  %v1237_v23 = vmul.f32 %v1173_v34, %v7149_v43  ;;  %v1301_v39 = vsub.f32 1.0, %v1173_v34  ;;  %v152_v27 = vld [vmem:[%s4799_s18 + $0x1e8] sm:$0xff] }
 0x232   : > { %v1556_v53 = vmul.f32 %v1492_v52, %v1492_v52  ;;  %v2388_v40 = vadd.f32 %v2276_v3, %v7169_v54  ;;  %v1238_v48 = vmul.f32 %v1174_v63, %v7152_v32  ;;  %v1302_v11 = vsub.f32 1.0, %v1174_v63 }
 0x233   : > { %v2451_v4 = vmul.f32 %v1555_v36, %v7118_v35  ;;  %v1365_v13 = vmul.f32 %v1301_v39, %v277_v61  ;;  %v2288_v8 = vmul.f32 0.6931472, %v4496_v24  ;;  %v2291_v14 = vmul.f32 %v7184_v45, %v2290_v26  ;;  %v7296_v45 = vld [vmem:[%s4783_s15 + $0x1f0] sm:$0xff]  ;;  %v151_v26 = vld [vmem:[%s4799_s18 + $0x1e0] sm:$0xff] }
 0x234   : > { %v2452_v59 = vmul.f32 %v1556_v53, %v7127_v19  ;;  %v1366_v20 = vmul.f32 %v1302_v11, %v278_v21  ;;  %v2285_v54 = vsel %vm7261_vm14, %v2282_v6, %v2279_v16  ;;  %vm7287_vm15 = vcmp.lt.f32.partialorder %v2292_v33, 0.0004427343 }
 0x235   : > { %v7291_v35 = vpop.eup %4497  ;;  %v2515_v43 = vmul.f32 %v2451_v4, %v2387_v5  ;;  %v405_v61 = vadd.f32 %v7178_v42, %v7159_v30  ;;  %v1429_v22 = vadd.f32 %v1365_v13, %v1237_v23  ;;  %v1750_v32 = vsub.f32 %v1622_v18, %v7217_v51 }
 0x236   : > { %v2516_v19 = vmul.f32 %v2452_v59, %v2388_v40  ;;  %v1430_v47 = vadd.f32 %v1366_v20, %v1238_v48  ;;  %v727_v21 = vadd.f32 1.0, %v7291_v35  ;;  %v406_v0 = vadd.f32 %v7182_v62, %v7172_v60 }
 0x237   : > { %v1493_v50 = vsub.f32 1.0, %v1429_v22  ;;  %v2294_v30 = vsel %vm7287_vm15, %v2291_v14, %v2288_v8  ;;  %v2389_v42 = vadd.f32 %v2285_v54, %v7222_v57  ;;  %v473_v55 = vand.u32 2147483647, %v7296_v45 }
 0x238   : > { %v7310_v9 = vpop.eup %4499  ;;  %v2636_v15 = vsel %vm2523_vm9, %v2516_v19, 0.0  ;;  %v1494_v37 = vsub.f32 1.0, %v1430_v47  ;;  %4501 = vrcp.f32 %v727_v21  ;;  %v474_v60 = vand.u32 2147483647, %v7303_v28 }
 0x239   : > { %v2637_v18 = vadd.f32 %v2636_v15, %v2515_v43  ;;  %v1557_v51 = vmul.f32 %v1493_v50, %v1493_v50  ;;  %v728_v17 = vadd.f32 1.0, %v7310_v9  ;;  %v2390_v38 = vadd.f32 %v2294_v30, %v1750_v32 }
 0x23a   : > { %v1558_v62 = vmul.f32 %v1494_v37, %v1494_v37  ;;  %v537_v33 = vsub.f32 0.0, %v473_v55  ;;  %v538_v7 = vsub.f32 0.0, %v474_v60  ;;  %v2298_v24 = vmul.f32 -0.5, %v7291_v35 }
 0x23b   : > { %2638 = vadd.xlane.f32.xlu0 %v2637_v18  ;;  %v2453_v44 = vmul.f32 %v1557_v51, %v405_v61  ;;  %4503 = vrcp.f32 %v728_v17  ;;  %v279_v52 = vsub.f32 1.0, %v151_v26  ;;  %v2307_v34 = vmul.f32 -0.5, %v7310_v9 }
 0x23c   : > { %v2454_v57 = vmul.f32 %v1558_v62, %v406_v0  ;;  %v663_v2 = vmul.f32 1.442695, %v537_v33  ;;  %v665_v1 = vmul.f32 1.442695, %v538_v7  ;;  %4505 = vlog2.f32 %v727_v21 }
 0x23d   : > { %v2517_v49 = vmul.f32 %v2453_v44, %v2389_v42  ;;  %vm1047_vm0 = vcmp.ge.f32.partialorder %v7209_v56, 0.0  ;;  %v215_v36 = vmul.f32 0.25, %v151_v26  ;;  %v280_v63 = vsub.f32 1.0, %v152_v27 }
 0x23e   : > { %v2518_v10 = vmul.f32 %v2454_v57, %v2390_v38  ;;  %4507 = vpow2.f32 %v663_v2  ;;  %v343_v23 = vmul.f32 0.75, %v279_v52  ;;  %vm1048_vm1 = vcmp.ge.f32.partialorder %v7220_v25, 0.0 }
 0x23f   : > { %4509 = vpow2.f32 %v665_v1  ;;  %v1623_v48 = vmax.f32 %v7209_v56, 0.0  ;;  %v2299_v11 = vadd.f32 1.0, %v2298_v24  ;;  %v1624_v8 = vmax.f32 %v7220_v25, 0.0 }
 0x240   : > { %v2640_v29 = vsel %vm2523_vm9, %v2518_v10, 0.0  ;;  %4511 = vlog2.f32 %v728_v17  ;;  %v2301_v14 = vand.u32 2147483647, %v7291_v35  ;;  %v2308_v59 = vadd.f32 1.0, %v2307_v34 }
 0x241   : > { %v2641_v31 = vadd.f32 %v2640_v29, %v2517_v49  ;;  %v1687_v19 = vmul.f32 %v151_v26, %v7209_v56  ;;  %v1688_v47 = vmul.f32 %v152_v27, %v7220_v25  ;;  %v2310_v32 = vand.u32 2147483647, %v7310_v9 }
 0x242   : > { %v4502_v41 = vpop.eup %4501  ;;  %v2300_v30 = vmul.f32 %v7291_v35, %v2299_v11  ;;  %vm7340_vm2 = vcmp.lt.f32.partialorder %v2301_v14, 0.0004427343  ;;  %v2309_v51 = vmul.f32 %v7310_v9, %v2308_v59  ;;  %v344_v60 = vmul.f32 0.75, %v280_v63 }
 0x243   : > { %2642 = vadd.xlane.f32.xlu1 %v2641_v31  ;;  %v855_v46 = vmul.f32 %v4502_v41, %v727_v21  ;;  %vm2311_vm3 = vcmp.lt.f32.partialorder %v2310_v32, 0.0004427343  ;;  %v407_v62 = vadd.f32 %v343_v23, %v215_v36  ;;  %v1752_v57 = vsub.f32 %v1624_v8, %v1688_v47 }
 0x244   : > { %vm1049_vm4 = vcmp.ge.f32.partialorder %v7296_v45, 0.0  ;;  %vm1050_vm5 = vcmp.ge.f32.partialorder %v7303_v28, 0.0  ;;  %v1626_v47 = vmax.f32 %v7303_v28, 0.0  ;;  %vm2652_vm8 = vcmask 7168  }
 0x245   : > { %v4504_v12 = vpop.eup %4503  ;;  %v919_v3 = vsub.f32 2.0, %v855_v46 }
 0x246   : > { %v856_v6 = vmul.f32 %v4504_v12, %v728_v17  ;;  %v4506_v53 = vpop.eup %4505  ;;  %v216_v17 = vmul.f32 0.25, %v152_v27 }
 0x247   : > { %v983_v5 = vmul.f32 %v4502_v41, %v919_v3  ;;  %v2297_v37 = vmul.f32 0.6931472, %v4506_v53 }
 0x248   : > { %v920_v16 = vsub.f32 2.0, %v856_v6  ;;  %v7325_v4 = vpop.eup %4507  ;;  %v408_v10 = vadd.f32 %v344_v60, %v216_v17 }
 0x249   : > { %v1111_v39 = vmul.f32 %v7291_v35, %v983_v5  ;;  %v7329_v20 = vpop.eup %4509  ;;  %v729_v61 = vadd.f32 1.0, %v7325_v4  ;;  %v1751_v35 = vsub.f32 %v1623_v48, %v1687_v19  ;;  %v2303_v49 = vsel %vm7340_vm2, %v2300_v30, %v2297_v37 }
 0x24a   : > { %v984_v40 = vmul.f32 %v4504_v12, %v920_v16  ;;  %v4512_v22 = vpop.eup %4511  ;;  %v730_v21 = vadd.f32 1.0, %v7329_v20  ;;  %v2316_v34 = vmul.f32 -0.5, %v7325_v4  ;;  %v2325_v36 = vmul.f32 -0.5, %v7329_v20 }
 0x24b   : > { %v1175_v13 = vsel %vm1047_vm0, %v983_v5, %v1111_v39  ;;  %4513 = vrcp.f32 %v729_v61  ;;  %v2306_v18 = vmul.f32 0.6931472, %v4512_v22  ;;  %v2391_v1 = vadd.f32 %v2303_v49, %v1751_v35 }
 0x24c   : > { %v1112_v54 = vmul.f32 %v7310_v9, %v984_v40  ;;  %v1239_v58 = vmul.f32 %v1175_v13, %v151_v26  ;;  %v1303_v43 = vsub.f32 1.0, %v1175_v13  ;;  %4515 = vrcp.f32 %v730_v21 }
 0x24d   : > { %v2312_v7 = vsel %vm2311_vm3, %v2309_v51, %v2306_v18  ;;  %4517 = vlog2.f32 %v729_v61  ;;  %v2317_v14 = vadd.f32 1.0, %v2316_v34 }
 0x24e   : > { %v1176_v0 = vsel %vm1048_vm1, %v984_v40, %v1112_v54  ;;  %v1367_v50 = vmul.f32 %v1303_v43, %v279_v52  ;;  %v2392_v31 = vadd.f32 %v2312_v7, %v1752_v57  ;;  %4519 = vlog2.f32 %v730_v21  ;;  %v154_v52 = vld [vmem:[%s4799_s18 + $0x1f8] sm:$0xff] }
 0x24f   : > { %v1240_v42 = vmul.f32 %v1176_v0, %v152_v27  ;;  %v1304_v15 = vsub.f32 1.0, %v1176_v0  ;;  %v153_v27 = vld [vmem:[%s4799_s18 + $0x1f0] sm:$0xff]  ;;  %v282_v48 = vsub.f32 1.0, %v154_v52  ;;  %v2319_v43 = vand.u32 2147483647, %v7325_v4 }
 0x250   : > { %v1431_v55 = vadd.f32 %v1367_v50, %v1239_v58  ;;  %v217_v23 = vmul.f32 0.25, %v153_v27  ;;  %v281_v39 = vsub.f32 1.0, %v153_v27  ;;  %v1625_v58 = vmax.f32 %v7296_v45, 0.0 }
 0x251   : > { %v1368_v25 = vmul.f32 %v1304_v15, %v280_v63  ;;  %v1689_v32 = vmul.f32 %v153_v27, %v7296_v45  ;;  %v2318_v56 = vmul.f32 %v7325_v4, %v2317_v14  ;;  %vm7363_vm6 = vcmp.lt.f32.partialorder %v2319_v43, 0.0004427343 }
 0x252   : > { %v1495_v38 = vsub.f32 1.0, %v1431_v55  ;;  %v345_v13 = vmul.f32 0.75, %v281_v39  ;;  %v218_v60 = vmul.f32 0.25, %v154_v52 }
 0x253   : > { %v1432_v44 = vadd.f32 %v1368_v25, %v1240_v42  ;;  %v1690_v42 = vmul.f32 %v154_v52, %v7303_v28  ;;  %v346_v25 = vmul.f32 0.75, %v282_v48  ;;  %v1753_v35 = vsub.f32 %v1625_v58, %v1689_v32 }
 0x254   : > { %v1559_v33 = vmul.f32 %v1495_v38, %v1495_v38 }
 0x255   : > { %v1496_v2 = vsub.f32 1.0, %v1432_v44  ;;  %v4514_v41 = vpop.eup %4513  ;;  %v1754_v44 = vsub.f32 %v1626_v47, %v1690_v42  ;;  %v410_v7 = vadd.f32 %v346_v25, %v218_v60 }
 0x256   : > { %v2455_v9 = vmul.f32 %v1559_v33, %v407_v62  ;;  %v4516_v46 = vpop.eup %4515  ;;  %v857_v12 = vmul.f32 %v4514_v41, %v729_v61  ;;  %v2326_v61 = vadd.f32 1.0, %v2325_v36 }
 0x257   : > { %v1560_v29 = vmul.f32 %v1496_v2, %v1496_v2  ;;  %v858_v6 = vmul.f32 %v4516_v46, %v730_v21  ;;  %v4518_v59 = vpop.eup %4517  ;;  %v2328_v21 = vand.u32 2147483647, %v7329_v20 }
 0x258   : > { %v2519_v3 = vmul.f32 %v2455_v9, %v2391_v1  ;;  %v921_v5 = vsub.f32 2.0, %v857_v12  ;;  %v4520_v22 = vpop.eup %4519  ;;  %v2315_v55 = vmul.f32 0.6931472, %v4518_v59  ;;  %v2327_v45 = vmul.f32 %v7329_v20, %v2326_v61 }
 0x259   : > { %v2456_v26 = vmul.f32 %v1560_v29, %v408_v10  ;;  %v922_v16 = vsub.f32 2.0, %v858_v6  ;;  %v2324_v17 = vmul.f32 0.6931472, %v4520_v22  ;;  %vm2329_vm7 = vcmp.lt.f32.partialorder %v2328_v21, 0.0004427343  ;;  %v2535_v6 = vpop.xlane.xlu1 %2534 }
 0x25a   : > { %v985_v53 = vmul.f32 %v4514_v41, %v921_v5  ;;  %v2321_v57 = vsel %vm7363_vm6, %v2318_v56, %v2315_v55 }
 0x25b   : > { %v2520_v24 = vmul.f32 %v2456_v26, %v2392_v31  ;;  %v986_v11 = vmul.f32 %v4516_v46, %v922_v16  ;;  %v2330_v33 = vsel %vm2329_vm7, %v2327_v45, %v2324_v17  ;;  %v2393_v1 = vadd.f32 %v2321_v57, %v1753_v35 }
 0x25c   : > { %v1113_v8 = vmul.f32 %v7325_v4, %v985_v53  ;;  %v409_v4 = vadd.f32 %v345_v13, %v217_v23  ;;  %v2656_v16 = vsel %vm2652_vm8, %v2535_v6, 0.0 }
 0x25d   : > { %v2644_v63 = vsel %vm2523_vm9, %v2520_v24, 0.0  ;;  %v1114_v54 = vmul.f32 %v7329_v20, %v986_v11  ;;  %v2394_v20 = vadd.f32 %v2330_v33, %v1754_v44  ;;  %v2539_v34 = vpop.xlane.xlu1 %2538 }
 0x25e   : > { %v2645_v40 = vadd.f32 %v2644_v63, %v2519_v3  ;;  %v1177_v19 = vsel %vm1049_vm4, %v985_v53, %v1113_v8  ;;  %v2527_v3 = vpop.xlane.xlu0 %2526  ;;  %v2658_v63 = vsel %vm2652_vm8, %v2539_v34, 0.0 }
 0x25f   : > { %v1178_v0 = vsel %vm1050_vm5, %v986_v11, %v1114_v54  ;;  %v1241_v50 = vmul.f32 %v1177_v19, %v153_v27  ;;  %v1305_v30 = vsub.f32 1.0, %v1177_v19 }
 0x260   : > { %2646 = vadd.xlane.f32.xlu0 %v2645_v40  ;;  %v1242_v15 = vmul.f32 %v1178_v0, %v154_v52  ;;  %v1306_v37 = vsub.f32 1.0, %v1178_v0  ;;  %v2653_v52 = vsel %vm2652_vm8, %v2527_v3, 0.0 }
 0x261   : > { %v1369_v18 = vmul.f32 %v1305_v30, %v281_v39  ;;  %v2547_v40 = vpop.xlane.xlu1 %2546 }
 0x262   : > { %v1370_v62 = vmul.f32 %v1306_v37, %v282_v48  ;;  %v2531_v27 = vpop.xlane.xlu0 %2530  ;;  %v2662_v11 = vsel %vm2652_vm8, %v2547_v40, 0.0 }
 0x263   : > { %v1433_v38 = vadd.f32 %v1369_v18, %v1241_v50  ;;  %v2654_v24 = vsel %vm2652_vm8, %v2531_v27, 0.0 }
 0x264   : > { %v1434_v28 = vadd.f32 %v1370_v62, %v1242_v15  ;;  %v2655_v5 = vadd.f32 %v2654_v24, %v2653_v52 }
 0x265   : > { %v1497_v49 = vsub.f32 1.0, %v1433_v38  ;;  %v2555_v59 = vpop.xlane.xlu1 %2554 }
 0x266   : > { %v1498_v10 = vsub.f32 1.0, %v1434_v28  ;;  %v2657_v36 = vadd.f32 %v2656_v16, %v2655_v5  ;;  %v2543_v23 = vpop.xlane.xlu0 %2542  ;;  %v2666_v58 = vsel %vm2652_vm8, %v2555_v59, 0.0 }
 0x267   : > { %v1561_v2 = vmul.f32 %v1497_v49, %v1497_v49  ;;  %v2660_v53 = vsel %vm2652_vm8, %v2543_v23, 0.0 }
 0x268   : > { %v1562_v9 = vmul.f32 %v1498_v10, %v1498_v10  ;;  %v2659_v39 = vadd.f32 %v2658_v63, %v2657_v36 }
 0x269   : > { %v2457_v29 = vmul.f32 %v1561_v2, %v409_v4  ;;  %v2563_v19 = vpop.xlane.xlu1 %2562 }
 0x26a   : > { %v2458_v31 = vmul.f32 %v1562_v9, %v410_v7  ;;  %v2661_v48 = vadd.f32 %v2660_v53, %v2659_v39  ;;  %v2551_v13 = vpop.xlane.xlu0 %2550  ;;  %v2670_v32 = vsel %vm2652_vm8, %v2563_v19, 0.0 }
 0x26b   : > { %v2521_v41 = vmul.f32 %v2457_v29, %v2393_v1  ;;  %v2664_v14 = vsel %vm2652_vm8, %v2551_v13, 0.0 }
 0x26c   : > { %v2522_v46 = vmul.f32 %v2458_v31, %v2394_v20  ;;  %v2663_v8 = vadd.f32 %v2662_v11, %v2661_v48 }
 0x26d   : > { %v2571_v30 = vpop.xlane.xlu1 %2570 }
 0x26e   : > { %v2648_v26 = vsel %vm2523_vm9, %v2522_v46, 0.0  ;;  %v2665_v54 = vadd.f32 %v2664_v14, %v2663_v8  ;;  %v2559_v43 = vpop.xlane.xlu0 %2558  ;;  %v2674_v15 = vsel %vm2652_vm8, %v2571_v30, 0.0 }
 0x26f   : > { %v2649_v12 = vadd.f32 %v2648_v26, %v2521_v41  ;;  %v2668_v22 = vsel %vm2652_vm8, %v2559_v43, 0.0 }
 0x270   : > { %v2667_v61 = vadd.f32 %v2666_v58, %v2665_v54 }
 0x271   : > { %2650 = vadd.xlane.f32.xlu1 %v2649_v12  ;;  %v2579_v18 = vpop.xlane.xlu1 %2578 }
 0x272   : > { %v2669_v47 = vadd.f32 %v2668_v22, %v2667_v61  ;;  %v2567_v21 = vpop.xlane.xlu0 %2566  ;;  %v2678_v17 = vsel %vm2652_vm8, %v2579_v18, 0.0 }
 0x273   : > { %v2672_v50 = vsel %vm2652_vm8, %v2567_v21, 0.0 }
 0x274   : > { %v2671_v0 = vadd.f32 %v2670_v32, %v2669_v47 }
 0x275   : > { %v2587_v62 = vpop.xlane.xlu1 %2586 }
 0x276   : > { %v2673_v42 = vadd.f32 %v2672_v50, %v2671_v0  ;;  %v2575_v37 = vpop.xlane.xlu0 %2574  ;;  %v2682_v35 = vsel %vm2652_vm8, %v2587_v62, 0.0 }
 0x277   : > { %v2676_v56 = vsel %vm2652_vm8, %v2575_v37, 0.0 }
 0x278   : > { %v2675_v55 = vadd.f32 %v2674_v15, %v2673_v42 }
 0x279   : > { %v2595_v4 = vpop.xlane.xlu1 %2594 }
 0x27a   : > { %v2677_v51 = vadd.f32 %v2676_v56, %v2675_v55  ;;  %v2583_v45 = vpop.xlane.xlu0 %2582  ;;  %v2686_v33 = vsel %vm2652_vm8, %v2595_v4, 0.0  ;;  %v7432_v4 = vld [vmem:[%s8796_s0 + $0x428] sm:$0xff] (%p14_p0) }
 0x27b   : > { %v2680_v25 = vsel %vm2652_vm8, %v2583_v45, 0.0  ;;  %vm3212_vm0 = vcmp.ge.f32.partialorder (%p14_p0), %v7432_v4, 0.0 }
 0x27c   : > { %v2679_v60 = vadd.f32 %v2678_v17, %v2677_v51  ;;  %v8958_v17 = vld [vmem:[#allocation5_spill] sm:$0xff] }
 0x27d   : > { %v2603_v1 = vpop.xlane.xlu1 %2602 }
 0x27e   : > { %v2681_v38 = vadd.f32 %v2680_v25, %v2679_v60  ;;  %v2591_v28 = vpop.xlane.xlu0 %2590  ;;  %v2690_v20 = vsel %vm2652_vm8, %v2603_v1, 0.0  ;;  %v7415_v60 = vld [vmem:[%s8796_s0 + $0x400] sm:$0xff] (%p14_p0)  ;;  %v7420_v25 = vld [vmem:[%s8796_s0 + $0x408] sm:$0xff] (%p14_p0) }
 0x27f   : > { %v2684_v57 = vsel %vm2652_vm8, %v2591_v28, 0.0  ;;  %v2919_v62 = vand.u32 (%p14_p0), 2147483647, %v7415_v60  ;;  %v7444_v1 = vld [vmem:[%s8797_s1 + $0x408] sm:$0xff] (%p14_p0)  ;;  %vm3207_vm10 = vcmp.ge.f32.partialorder (%p14_p0), %v7415_v60, 0.0  ;;  %vm3208_vm11 = vcmp.ge.f32.partialorder (%p14_p0), %v7420_v25, 0.0 }
 0x280   : > { %v2683_v44 = vadd.f32 %v2682_v35, %v2681_v38  ;;  %v2920_v38 = vand.u32 (%p14_p0), 2147483647, %v7420_v25 }
 0x281   : > { %v2611_v46 = vpop.xlane.xlu1 %2610  ;;  %v2951_v35 = vsub.f32 (%p14_p0), 0.0, %v2919_v62 }
 0x282   : > { %v2685_v49 = vadd.f32 %v2684_v57, %v2683_v44  ;;  %v2599_v7 = vpop.xlane.xlu0 %2598  ;;  %v2694_v12 = vsel %vm2652_vm8, %v2611_v46, 0.0  ;;  %v2952_v28 = vsub.f32 (%p14_p0), 0.0, %v2920_v38  ;;  %v7427_v44 = vld [vmem:[%s8796_s0 + $0x420] sm:$0xff] (%p14_p0) }
 0x283   : > { %v2688_v2 = vsel %vm2652_vm8, %v2599_v7, 0.0  ;;  %v2983_v57 = vmul.f32 (%p14_p0), 1.442695, %v2951_v35  ;;  %v7438_v7 = vld [vmem:[%s8797_s1 + $0x400] sm:$0xff] (%p14_p0)  ;;  %vm3211_vm15 = vcmp.ge.f32.partialorder (%p14_p0), %v7427_v44, 0.0 }
 0x284   : > { %v2687_v10 = vadd.f32 %v2686_v33, %v2685_v49  ;;  %v2985_v49 = vmul.f32 (%p14_p0), 1.442695, %v2952_v28  ;;  %v2923_v33 = vand.u32 (%p14_p0), 2147483647, %v7427_v44  ;;  %v2791_v46 = vmul.f32 (%p14_p0), 0.25, %v7438_v7 }
 0x285   : > { %v2619_v24 = vpop.xlane.xlu1 %2618  ;;  %4521 = vpow2.f32 (%p14_p0), %v2983_v57  ;;  %v7545_v57 = vld [vmem:[%s8796_s0 + $0x430] sm:$0xff] (%p14_p0) }
 0x286   : > { %v2689_v9 = vadd.f32 %v2688_v2, %v2687_v10  ;;  %v2607_v29 = vpop.xlane.xlu0 %2606  ;;  %v2698_v5 = vsel %vm2652_vm8, %v2619_v24, 0.0  ;;  %4523 = vpow2.f32 (%p14_p0), %v2985_v49  ;;  %v2924_v10 = vand.u32 (%p14_p0), 2147483647, %v7432_v4  ;;  %8963 = vst [vmem:[#allocation9_spill] sm:$0xff] (%p14_p0), %v7545_v57 }
 0x287   : > { %v2692_v41 = vsel %vm2652_vm8, %v2607_v29, 0.0  ;;  %v2955_v2 = vsub.f32 (%p14_p0), 0.0, %v2923_v33  ;;  %v8814_v29 = vsub.f32 (%p14_p0), 1.0, %v7438_v7 }
 0x288   : > { %v2691_v31 = vadd.f32 %v2690_v20, %v2689_v9  ;;  %v2956_v9 = vsub.f32 (%p14_p0), 0.0, %v2924_v10  ;;  %v7449_v20 = vld [vmem:[%s8796_s0 + $0x410] sm:$0xff] (%p14_p0) }
 0x289   :  { %v2855_v24 = vmul.f32 (%p14_p0), 0.75, %v8814_v29  ;;  %vm3209_vm2 = vcmp.ge.f32.partialorder (%p14_p0), %v7449_v20, 0.0 }
 0x28a   : > { %v2693_v26 = vadd.f32 %v2692_v41, %v2691_v31  ;;  %v2615_v3 = vpop.xlane.xlu0 %2614  ;;  %v2991_v31 = vmul.f32 (%p14_p0), 1.442695, %v2955_v2  ;;  %v7455_v41 = vld [vmem:[%s8796_s0 + $0x418] sm:$0xff] (%p14_p0) }
 0x28b   : > { %v2696_v6 = vsel %vm2652_vm8, %v2615_v3, 0.0  ;;  %v7467_v3 = vld [vmem:[%s8797_s1 + $0x428] sm:$0xff] (%p14_p0)  ;;  %vm3210_vm3 = vcmp.ge.f32.partialorder (%p14_p0), %v7455_v41, 0.0 }
 0x28c   : > { %v2695_v27 = vadd.f32 %v2694_v12, %v2693_v26  ;;  %v2792_v26 = vmul.f32 (%p14_p0), 0.25, %v7444_v1  ;;  %v7462_v12 = vld [vmem:[%s8797_s1 + $0x420] sm:$0xff] (%p14_p0)  ;;  %4525 = vpow2.f32 (%p14_p0), %v2991_v31 }
 0x28d   : > { %v2627_v63 = vpop.xlane.xlu1 %2626 }
 0x28e   : > { %v2697_v52 = vadd.f32 %v2696_v6, %v2695_v27  ;;  %v2623_v34 = vpop.xlane.xlu0 %2622  ;;  %v2702_v39 = vsel %vm2652_vm8, %v2627_v63, 0.0  ;;  %v2993_v27 = vmul.f32 (%p14_p0), 1.442695, %v2956_v9  ;;  %v8813_v6 = vsub.f32 (%p14_p0), 1.0, %v7444_v1 }
 0x28f   : > { %v2700_v36 = vsel %vm2652_vm8, %v2623_v34, 0.0  ;;  %v3496_v34 = vmax.f32 (%p14_p0), %v7420_v25, 0.0  ;;  %v8812_v63 = vsub.f32 (%p14_p0), 1.0, %v7462_v12 }
 0x290   : > { %v2699_v16 = vadd.f32 %v2698_v5, %v2697_v52  ;;  %v2921_v52 = vand.u32 (%p14_p0), 2147483647, %v7449_v20  ;;  %v3495_v5 = vmax.f32 (%p14_p0), %v7415_v60, 0.0  ;;  %4527 = vpow2.f32 (%p14_p0), %v2993_v27  ;;  %v7569_v27 = vld [vmem:[%s8796_s0 + $0x438] sm:$0xff] (%p14_p0) }
 0x291   :  { %8964 = vst [vmem:[#allocation10_spill] sm:$0xff] (%p14_p0), %v7569_v27 }
 0x292   : > { %v2701_v23 = vadd.f32 %v2700_v36, %v2699_v16  ;;  %v2922_v16 = vand.u32 (%p14_p0), 2147483647, %v7455_v41  ;;  %v2856_v36 = vmul.f32 (%p14_p0), 0.75, %v8813_v6 }
 0x294   : > { %v2703_v40 = vadd.f32 %v2702_v39, %v2701_v23  ;;  %v8811_v23 = vsub.f32 (%p14_p0), 1.0, %v7467_v3  ;;  %v2953_v39 = vsub.f32 (%p14_p0), 0.0, %v2921_v52 }
 0x29e   : > { %v2631_v53 = vpop.xlane.xlu0 %2630 }
 0x29f   : > { %v2704_v48 = vsel %vm2652_vm8, %v2631_v53, 0.0  ;;  %v3527_v53 = vmul.f32 (%p14_p0), %v7438_v7, %v7415_v60 }
 0x2a0   : > { %v2705_v13 = vadd.f32 %v2704_v48, %v2703_v40  ;;  %v3528_v40 = vmul.f32 (%p14_p0), %v7444_v1, %v7420_v25  ;;  %v2795_v48 = vmul.f32 (%p14_p0), 0.25, %v7462_v12 }
 0x2b4   : > { %v2635_v11 = vpop.xlane.xlu1 %2634 }
 0x2b5   : > { %v2706_v8 = vsel %vm2652_vm8, %v2635_v11, 0.0  ;;  %v2954_v11 = vsub.f32 (%p14_p0), 0.0, %v2922_v16 }
 0x2b6   : > { %v2707_v59 = vadd.f32 %v2706_v8, %v2705_v13  ;;  %v7485_v13 = vpop.eup (%p14_p0), %4521  ;;  %v2796_v8 = vmul.f32 (%p14_p0), 0.25, %v7467_v3 }
 0x2b7   :  { %v3594_v33 = vmul.f32 (%p14_p0), -0.5, %v7485_v13  ;;  %v3597_v9 = vand.u32 (%p14_p0), 2147483647, %v7485_v13 }
 0x2b9   :  { %vm7589_vm12 = vcmp.lt.f32.partialorder (%p14_p0), %v3597_v9, 0.0004427343 }
 0x2c8   : > { %v2639_v14 = vpop.xlane.xlu0 %2638 }
 0x2c9   : > { %v2708_v54 = vsel %vm2652_vm8, %v2639_v14, 0.0  ;;  %v2859_v14 = vmul.f32 (%p14_p0), 0.75, %v8812_v63 }
 0x2ca   : > { %v2709_v43 = vadd.f32 %v2708_v54, %v2707_v59  ;;  %v2860_v59 = vmul.f32 (%p14_p0), 0.75, %v8811_v23  ;;  %v2987_v54 = vmul.f32 (%p14_p0), 1.442695, %v2953_v39  ;;  %v3595_v39 = vadd.f32 (%p14_p0), 1.0, %v3594_v33 }
 0x2cc   :  { %4529 = vpow2.f32 (%p14_p0), %v2987_v54 }
 0x2d0   : > { %v2643_v58 = vpop.xlane.xlu1 %2642 }
 0x2d1   : > { %v2710_v61 = vsel %vm2652_vm8, %v2643_v58, 0.0  ;;  %v7492_v58 = vpop.eup (%p14_p0), %4523 }
 0x2d2   : > { %v2711_v19 = vadd.f32 %v2710_v61, %v2709_v43  ;;  %v7494_v43 = vadd.f32 (%p14_p0), %v2855_v24, %v2791_v46  ;;  %v3047_v61 = vadd.f32 (%p14_p0), 1.0, %v7485_v13  ;;  %v7533_v62 = vpop.eup (%p14_p0), %4525  ;;  %v3603_v31 = vmul.f32 (%p14_p0), -0.5, %v7492_v58 }
 0x2d3   :  { %v7547_v49 = vpop.eup (%p14_p0), %4527  ;;  %v7551_v10 = vadd.f32 (%p14_p0), 1.0, %v7533_v62  ;;  %v3630_v24 = vmul.f32 (%p14_p0), -0.5, %v7533_v62 }
 0x2d4   :  { %4531 = vrcp.f32 (%p14_p0), %v3047_v61  ;;  %v7560_v46 = vadd.f32 (%p14_p0), 1.0, %v7547_v49  ;;  %v3639_v16 = vmul.f32 (%p14_p0), -0.5, %v7547_v49 }
 0x2ed   : > { %v2647_v22 = vpop.xlane.xlu0 %2646 }
 0x2ee   : > { %v2712_v47 = vsel %vm2652_vm8, %v2647_v22, 0.0  ;;  %v3499_v22 = vmax.f32 (%p14_p0), %v7427_v44, 0.0 }
 0x2ef   : > { %v2713_v32 = vadd.f32 %v2712_v47, %v2711_v19  ;;  %v3531_v19 = vmul.f32 (%p14_p0), %v7462_v12, %v7427_v44  ;;  %v7501_v47 = vadd.f32 (%p14_p0), 1.0, %v7492_v58 }
 0x2f1   :  { %4533 = vrcp.f32 (%p14_p0), %v7501_v47 }
 0x2f2   :  { %4535 = vlog2.f32 (%p14_p0), %v3047_v61 }
 0x2f3   :  { %4537 = vlog2.f32 (%p14_p0), %v7501_v47 }
 0x2fe   : > { %v2651_v21 = vpop.xlane.xlu1 %2650 }
 0x2ff   : > { %v2714_v0 = vsel %vm2652_vm8, %v2651_v21, 0.0  ;;  %v3532_v21 = vmul.f32 (%p14_p0), %v7467_v3, %v7432_v4 }
 0x300   : > { %v2715_v50 = vadd.f32 %v2714_v0, %v2713_v32  ;;  %v3500_v32 = vmax.f32 (%p14_p0), %v7432_v4, 0.0 }
 0x302   : > { %2716 = vadd.xlane.f32.xlu0 %v2715_v50  ;;  %v7511_v50 = vadd.f32 (%p14_p0), %v2856_v36, %v2792_v26  ;;  %v7536_v38 = vsub.f32 (%p14_p0), %v3500_v32, %v3532_v21 }
 0x38f   : > { %v2717_v30 = vpop.xlane.xlu0 %2716 }
 0x390   : > { %v2718_v42 = vrot.slane %v2717_v30, 4 }
 0x392   : > { %v2719_v15 = vadd.f32 %v2718_v42, %v2717_v30  ;;  %v7513_v30 = vsub.f32 (%p14_p0), %v3495_v5, %v3527_v53  ;;  %v7518_v42 = vld [vmem:[%s8797_s1 + $0x418] sm:$0xff] (%p14_p0)  ;;  %v2925_v5 = vand.u32 (%p14_p0), 2147483647, %v7545_v57 }
 0x393   :  { %v7539_v35 = vmul.f32 (%p14_p0), 0.25, %v7518_v42  ;;  %v8809_v28 = vsub.f32 (%p14_p0), 1.0, %v7518_v42 }
 0x394   : > { %v2720_v37 = vrot.slane %v2719_v15, 2  ;;  %v2957_v21 = vsub.f32 (%p14_p0), 0.0, %v2925_v5 }
 0x395   :  { %v7564_v26 = vmul.f32 (%p14_p0), 0.75, %v8809_v28 }
 0x396   : > { %v2721_v55 = vadd.f32 %v2720_v37, %v2719_v15  ;;  %v2989_v15 = vmul.f32 (%p14_p0), 1.442695, %v2954_v11  ;;  %v7521_v37 = vsub.f32 (%p14_p0), %v3496_v34, %v3528_v40  ;;  %v3606_v34 = vand.u32 (%p14_p0), 2147483647, %v7492_v58 }
 0x397   :  { %v2926_v40 = vand.u32 (%p14_p0), 2147483647, %v7569_v27 }
 0x398   : > { %v2722_v56 = vrot.slane %v2721_v55, 1  ;;  %4539 = vpow2.f32 (%p14_p0), %v2989_v15  ;;  %vm7602_vm13 = vcmp.lt.f32.partialorder (%p14_p0), %v3606_v34, 0.0004427343  ;;  %v3642_v34 = vand.u32 (%p14_p0), 2147483647, %v7547_v49 }
 0x399   :  { %4541 = vrcp.f32 (%p14_p0), %v7551_v10  ;;  %v2958_v28 = vsub.f32 (%p14_p0), 0.0, %v2926_v40  ;;  %v2995_v40 = vmul.f32 (%p14_p0), 1.442695, %v2957_v21 }
 0x39a   : > { %v2723_v18 = vadd.f32 %v2722_v56, %v2721_v55  ;;  %v7523_v55 = vadd.f32 (%p14_p0), %v2859_v14, %v2795_v48  ;;  %v7525_v56 = vadd.f32 (%p14_p0), %v2860_v59, %v2796_v8  ;;  %4543 = vrcp.f32 (%p14_p0), %v7560_v46  ;;  %v7586_v48 = vpop.eup (%p14_p0), %4529 }
 0x39b   :  { %4545 = vlog2.f32 (%p14_p0), %v7551_v10  ;;  %v3604_v8 = vadd.f32 (%p14_p0), 1.0, %v3603_v31  ;;  %v3633_v14 = vand.u32 (%p14_p0), 2147483647, %v7533_v62  ;;  %v7596_v59 = vmul.f32 (%p14_p0), %v7518_v42, %v7455_v41  ;;  %v4532_v54 = vpop.eup (%p14_p0), %4531 }
 0x39c   : > { %4116 = vpush %v2723_v18  ;;  %v7527_v18 = vsub.f32 (%p14_p0), %v3499_v22, %v3531_v19  ;;  %v3631_v22 = vadd.f32 (%p14_p0), 1.0, %v3630_v24  ;;  %v7599_v19 = vadd.f32 (%p14_p0), 1.0, %v7586_v48  ;;  %v3612_v32 = vmul.f32 (%p14_p0), -0.5, %v7586_v48  ;;  %v4534_v15 = vpop.eup (%p14_p0), %4533 }
 0x39d   :  { %v3111_v33 = vmul.f32 (%p14_p0), %v4532_v54, %v3047_v61  ;;  %4547 = vlog2.f32 (%p14_p0), %v7560_v46  ;;  %v3640_v31 = vadd.f32 (%p14_p0), 1.0, %v3639_v16  ;;  %v4536_v36 = vpop.eup (%p14_p0), %4535  ;;  %v3112_v52 = vmul.f32 (%p14_p0), %v4534_v15, %v7501_v47 }
 0x39e   :  { %v3596_v24 = vmul.f32 (%p14_p0), %v7485_v13, %v3595_v39  ;;  %4549 = vrcp.f32 (%p14_p0), %v7599_v19  ;;  %v7611_v5 = vmul.f32 (%p14_p0), %v7492_v58, %v3604_v8  ;;  %vm7613_vm14 = vcmp.lt.f32.partialorder (%p14_p0), %v3633_v14, 0.0004427343 }
 0x39f   :  { %v3143_v23 = vsub.f32 (%p14_p0), 2.0, %v3111_v33  ;;  %v3144_v63 = vsub.f32 (%p14_p0), 2.0, %v3112_v52  ;;  %v7622_v47 = vmul.f32 (%p14_p0), %v7533_v62, %v3631_v22  ;;  %v3613_v39 = vadd.f32 (%p14_p0), 1.0, %v3612_v32 }
 0x3a0   :  { %v3593_v6 = vmul.f32 (%p14_p0), 0.6931472, %v4536_v36  ;;  %v7626_v8 = vmul.f32 (%p14_p0), %v7547_v49, %v3640_v31  ;;  %4551 = vlog2.f32 (%p14_p0), %v7599_v19  ;;  %v7633_v22 = vmul.f32 (%p14_p0), 1.442695, %v2958_v28 }
 0x3a1   :  { %v3175_v33 = vmul.f32 (%p14_p0), %v4532_v54, %v3143_v23  ;;  %vm7650_vm1 = vcmp.lt.f32.partialorder (%p14_p0), %v3642_v34, 0.0004427343 }
 0x3a3   :  { %v3239_v23 = vmul.f32 (%p14_p0), %v7485_v13, %v3175_v33  ;;  %v3599_v13 = vsel (%p14_p0), %vm7589_vm12, %v3596_v24, %v3593_v6 }
 0x3a4   :  { %v3879_v34 = vadd.f32 (%p14_p0), %v3599_v13, %v7513_v30 }
 0x3a5   :  { %v3271_v28 = vsel (%p14_p0), %vm3207_vm10, %v3175_v33, %v3239_v23  ;;  %v8974_v23 = vsub.f32 (%p14_p0), 1.0, %v7444_v1 }
 0x3a6   :  { %v3303_v52 = vmul.f32 (%p14_p0), %v3271_v28, %v7438_v7 }
 0x3cc   :  { %16 = sbr.rel (!%p14_p0) target bundleno = 1 (0x1), region = 37 }
 0x3cd   : > { %s4117_s19 = spop %4116 }
 0x3ce   : > { %v2725_v51 = vstv %s4117_s19 }
 0x3cf   : > { %v7404_v0 = vadd.f32 %v8958_v17, %v2725_v51  }
 0x3d1   : > { %8959 = vst [vmem:[#allocation8_spill] sm:$0xff] %v7404_v0  ;;  %v8961_v45 = vmov %v7404_v0 }
 0x3d2   : > { %v8962_v0 = vmov %v8961_v45  ;;  %v3176_v45 = vmul.f32 (%p14_p0), %v4534_v15, %v3144_v63  ;;  %v7641_v63 = vmul.f32 (%p14_p0), %v7586_v48, %v3613_v39 }
 0x3d3   :  { %v7509_v0 = vld [vmem:[%s8797_s1 + $0x410] sm:$0xff] }
 0x3d4   :  { %v7530_v51 = vmul.f32 0.25, %v7509_v0  ;;  %v8810_v17 = vsub.f32 1.0, %v7509_v0  ;;  %v7583_v53 = vmul.f32 %v7509_v0, %v7449_v20  ;;  %v3240_v31 = vmul.f32 %v7492_v58, %v3176_v45 }
 0x3d5   :  { %v3335_v58 = vsub.f32 1.0, %v3271_v28 }
 0x3d6   :  { %v7555_v2 = vmul.f32 0.75, %v8810_v17  ;;  %v4538_v17 = vpop.eup %4537 }
 0x3d7   :  { %v7618_v16 = vpop.eup %4539  ;;  %v3602_v36 = vmul.f32 0.6931472, %v4538_v17 }
 0x3d8   :  { %v7629_v14 = vadd.f32 1.0, %v7618_v16  ;;  %v4542_v29 = vpop.eup %4541  ;;  %v3621_v24 = vmul.f32 -0.5, %v7618_v16 }
 0x3d9   :  { %v4544_v32 = vpop.eup %4543  ;;  %v3115_v54 = vmul.f32 %v4542_v29, %v7551_v10  ;;  %v3272_v10 = vsel %vm3208_vm11, %v3176_v45, %v3240_v31  ;;  %v8973_v45 = vsub.f32 1.0, %v7438_v7  ;;  %v3624_v31 = vand.u32 2147483647, %v7618_v16 }
 0x3da   :  { %4553 = vrcp.f32 %v7629_v14  ;;  %v4546_v21 = vpop.eup %4545  ;;  %v3116_v27 = vmul.f32 %v4544_v32, %v7560_v46  ;;  %v3304_v39 = vmul.f32 %v3272_v10, %v7444_v1  ;;  %v3336_v11 = vsub.f32 1.0, %v3272_v10 }
 0x3db   :  { %4555 = vpow2.f32 %v2995_v40  ;;  %v3147_v17 = vsub.f32 2.0, %v3115_v54  ;;  %v3629_v15 = vmul.f32 0.6931472, %v4546_v21  ;;  %v4548_v60 = vpop.eup %4547  ;;  %v3367_v25 = vmul.f32 %v3335_v58, %v8973_v45 }
 0x3dc   :  { %v3148_v57 = vsub.f32 2.0, %v3116_v27  ;;  %v4550_v40 = vpop.eup %4549  ;;  %v3608_v27 = vsel %vm7602_vm13, %v7611_v5, %v3602_v36  ;;  %v3368_v54 = vmul.f32 %v3336_v11, %v8974_v23  ;;  %4557 = vlog2.f32 %v7629_v14 }
 0x3dd   :  { %v3179_v6 = vmul.f32 %v4542_v29, %v3147_v17  ;;  %v3113_v29 = vmul.f32 %v4550_v40, %v7599_v19  ;;  %v3399_v28 = vadd.f32 %v3367_v25, %v3303_v52  ;;  %v3635_v9 = vsel %vm7613_vm14, %v7622_v47, %v3629_v15 }
 0x3de   :  { %v3180_v33 = vmul.f32 %v4544_v32, %v3148_v57  ;;  %v3400_v30 = vadd.f32 %v3368_v54, %v3304_v39  ;;  %v3638_v57 = vmul.f32 0.6931472, %v4548_v60  ;;  %v3880_v10 = vadd.f32 %v3608_v27, %v7521_v37 }
 0x3df   :  { %v3243_v21 = vmul.f32 %v7533_v62, %v3179_v6  ;;  %v3145_v5 = vsub.f32 2.0, %v3113_v29  ;;  %v4552_v62 = vpop.eup %4551  ;;  %v3431_v19 = vsub.f32 1.0, %v3399_v28  ;;  %v8975_v58 = vsub.f32 1.0, %v7462_v12 }
 0x3e0   :  { %v3244_v7 = vmul.f32 %v7547_v49, %v3180_v33  ;;  %v3432_v47 = vsub.f32 1.0, %v3400_v30  ;;  %v8976_v11 = vsub.f32 1.0, %v7467_v3  ;;  %v3622_v25 = vadd.f32 1.0, %v3621_v24 }
 0x3e1   :  { %v3275_v1 = vsel %vm3211_vm15, %v3179_v6, %v3243_v21  ;;  %v3177_v17 = vmul.f32 %v4550_v40, %v3145_v5  ;;  %v3463_v15 = vmul.f32 %v3431_v19, %v3431_v19  ;;  %v3883_v23 = vadd.f32 %v3635_v9, %v7527_v18 }
 0x3e2   :  { %v3276_v52 = vsel %vm3212_vm0, %v3180_v33, %v3244_v7  ;;  %v3307_v49 = vmul.f32 %v3275_v1, %v7462_v12  ;;  %v3339_v32 = vsub.f32 1.0, %v3275_v1  ;;  %v3464_v39 = vmul.f32 %v3432_v47, %v3432_v47 }
 0x3e3   :  { %v3308_v36 = vmul.f32 %v3276_v52, %v7467_v3  ;;  %v3340_v13 = vsub.f32 1.0, %v3276_v52  ;;  %v3241_v45 = vmul.f32 %v7586_v48, %v3177_v17  ;;  %v3911_v33 = vmul.f32 %v3463_v15, %v7494_v43 }
 0x3e4   :  { %v4554_v61 = vpop.eup %4553  ;;  %v3371_v60 = vmul.f32 %v3339_v32, %v8975_v58  ;;  %v3912_v37 = vmul.f32 %v3464_v39, %v7511_v50  ;;  %v3644_v12 = vsel %vm7650_vm1, %v7626_v8, %v3638_v57  ;;  %v3611_v24 = vmul.f32 0.6931472, %v4552_v62 }
 0x3e5   :  { %v7680_v44 = vpop.eup %4555  ;;  %v3114_v4 = vmul.f32 %v4554_v61, %v7629_v14  ;;  %v3372_v6 = vmul.f32 %v3340_v13, %v8976_v11  ;;  %v3273_v3 = vsel %vm3209_vm2, %v3177_v17, %v3241_v45  ;;  %v3943_v14 = vmul.f32 %v3911_v33, %v3879_v34 }
 0x3e6   :  { %v3403_v40 = vadd.f32 %v3371_v60, %v3307_v49  ;;  %v3944_v28 = vmul.f32 %v3912_v37, %v3880_v10  ;;  %v3305_v7 = vmul.f32 %v3273_v3, %v7509_v0  ;;  %v3337_v18 = vsub.f32 1.0, %v3273_v3  ;;  %v4558_v9 = vpop.eup %4557 }
 0x3e7   :  { %v3146_v54 = vsub.f32 2.0, %v3114_v4  ;;  %v3404_v27 = vadd.f32 %v3372_v6, %v3308_v36  ;;  %4559 = vpow2.f32 %v7633_v22  ;;  %v3053_v8 = vadd.f32 1.0, %v7680_v44 }
 0x3e8   :  { %v3435_v21 = vsub.f32 1.0, %v3403_v40  ;;  %v3976_v46 = vsel %vm2523_vm9, %v3944_v28, 0.0  ;;  %v3884_v34 = vadd.f32 %v3644_v12, %v7536_v38  ;;  %v8977_v57 = vsub.f32 1.0, %v7509_v0  ;;  %v7762_v12 = vld [vmem:[%s8797_s1 + $0x438] sm:$0xff]  ;;  %v7790_v0 = vld [vmem:[%s8797_s1 + $0x440] sm:$0xff] }
 0x3e9   :  { %v3178_v29 = vmul.f32 %v4554_v61, %v3146_v54  ;;  %v3436_v43 = vsub.f32 1.0, %v3404_v27  ;;  %v3977_v62 = vadd.f32 %v3976_v46, %v3943_v14  ;;  %4561 = vrcp.f32 %v3053_v8  ;;  %v2765_v27 = vld [vmem:[%s8797_s1 + $0x430] sm:$0xff] }
 0x3ea   :  { %v3467_v30 = vmul.f32 %v3435_v21, %v3435_v21  ;;  %v3369_v5 = vmul.f32 %v3337_v18, %v8977_v57  ;;  %v8978_v38 = vand.u32 2147483647, %v7586_v48  ;;  %v3620_v36 = vmul.f32 0.6931472, %v4558_v9 }
 0x3eb   :  { %v3242_v50 = vmul.f32 %v7618_v16, %v3178_v29  ;;  %v3468_v1 = vmul.f32 %v3436_v43, %v3436_v43  ;;  %3978 = vadd.xlane.f32.xlu0 %v3977_v62  ;;  %v8981_v17 = vsub.f32 1.0, %v7518_v42  ;;  %vm7721_vm5 = vcmp.lt.f32.partialorder %v3624_v31, 0.0004427343  ;;  %v7778_v62 = vld [vmem:[%s8796_s0 + $0x458] sm:$0xff] }
 0x3ec   :  { %v3915_v19 = vmul.f32 %v3467_v30, %v7523_v55  ;;  %v3401_v61 = vadd.f32 %v3369_v5, %v3305_v7  ;;  %vm7712_vm4 = vcmp.lt.f32.partialorder %v8978_v38, 0.0004427343  ;;  %v3623_v55 = vmul.f32 %v7618_v16, %v3622_v25  ;;  %v7773_v5 = vld [vmem:[%s8796_s0 + $0x450] sm:$0xff] }
 0x3ed   :  { %v3274_v52 = vsel %vm3210_vm3, %v3178_v29, %v3242_v50  ;;  %v3916_v49 = vmul.f32 %v3468_v1, %v7525_v56  ;;  %v2889_v48 = vadd.f32 %v7555_v2, %v7530_v51  ;;  %v8984_v58 = vmax.f32 %v7449_v20, 0.0  ;;  %v7740_v51 = vld [vmem:[%s8796_s0 + $0x440] sm:$0xff]  ;;  %v7745_v20 = vld [vmem:[%s8796_s0 + $0x448] sm:$0xff] }
 0x3ee   :  { %v3306_v22 = vmul.f32 %v3274_v52, %v7518_v42  ;;  %v3338_v32 = vsub.f32 1.0, %v3274_v52  ;;  %v3947_v47 = vmul.f32 %v3915_v19, %v3883_v23  ;;  %v3433_v56 = vsub.f32 1.0, %v3401_v61 }
 0x3ef   :  { %v3948_v13 = vmul.f32 %v3916_v49, %v3884_v34  ;;  %v3561_v60 = vsub.f32 %v8984_v58, %v7583_v53  ;;  %v8985_v4 = vmax.f32 %v7455_v41, 0.0  ;;  %v3617_v16 = vsel %vm7712_vm4, %v7641_v63, %v3611_v24 }
 0x3f0   :  { %v3370_v15 = vmul.f32 %v3338_v32, %v8981_v17  ;;  %v3465_v6 = vmul.f32 %v3433_v56, %v3433_v56  ;;  %v3626_v2 = vsel %vm7721_vm5, %v3623_v55, %v3620_v36  ;;  %v2890_v53 = vadd.f32 %v7564_v26, %v7539_v35 }
 0x3f1   :  { %v3562_v39 = vsub.f32 %v8985_v4, %v7596_v59  ;;  %v3984_v42 = vsel %vm2523_vm9, %v3948_v13, 0.0  ;;  %v7751_v31 = vpop.eup %4559  ;;  %v3881_v63 = vadd.f32 %v3617_v16, %v3561_v60  ;;  %v2927_v25 = vand.u32 2147483647, %v7740_v51 }
 0x3f2   :  { %v3402_v11 = vadd.f32 %v3370_v15, %v3306_v22  ;;  %v3985_v41 = vadd.f32 %v3984_v42, %v3947_v47  ;;  %v3913_v45 = vmul.f32 %v3465_v6, %v2889_v48  ;;  %v2928_v33 = vand.u32 2147483647, %v7745_v20  ;;  %v8987_v22 = vld [vmem:[#allocation10_spill] sm:$0xff]  ;;  %v7803_v6 = vld [vmem:[%s8797_s1 + $0x448] sm:$0xff] }
 0x3f3   :  { %v3882_v23 = vadd.f32 %v3626_v2, %v3562_v39  ;;  %v3054_v54 = vadd.f32 1.0, %v7751_v31  ;;  %v4562_v37 = vpop.eup %4561  ;;  %v2959_v35 = vsub.f32 0.0, %v2927_v25  ;;  %v2829_v24 = vsub.f32 1.0, %v2765_v27 }
 0x3f4   :  { %v3434_v59 = vsub.f32 1.0, %v3402_v11  ;;  %3986 = vadd.xlane.f32.xlu1 %v3985_v41  ;;  %v3117_v3 = vmul.f32 %v4562_v37, %v3053_v8  ;;  %v3945_v14 = vmul.f32 %v3913_v45, %v3881_v63  ;;  %v2960_v21 = vsub.f32 0.0, %v2928_v33 }
 0x3f5   :  { %4563 = vrcp.f32 %v3054_v54  ;;  %v2797_v43 = vmul.f32 0.25, %v2765_v27  ;;  %v2830_v7 = vsub.f32 1.0, %v7762_v12  ;;  %v2999_v18 = vmul.f32 1.442695, %v2959_v35 }
 0x3f6   :  { %v3466_v40 = vmul.f32 %v3434_v59, %v3434_v59  ;;  %4565 = vlog2.f32 %v3053_v8  ;;  %v3149_v28 = vsub.f32 2.0, %v3117_v3  ;;  %v3001_v9 = vmul.f32 1.442695, %v2960_v21  ;;  %v8986_v8 = vld [vmem:[#allocation9_spill] sm:$0xff] }
 0x3f7   :  { %v2798_v50 = vmul.f32 0.25, %v7762_v12  ;;  %v2861_v46 = vmul.f32 0.75, %v2829_v24  ;;  %v2862_v57 = vmul.f32 0.75, %v2830_v7  ;;  %vm3213_vm6 = vcmp.ge.f32.partialorder %v8986_v8, 0.0 }
 0x3f8   :  { %v3914_v26 = vmul.f32 %v3466_v40, %v2890_v53  ;;  %v3181_v1 = vmul.f32 %v4562_v37, %v3149_v28  ;;  %4567 = vpow2.f32 %v2999_v18  ;;  %v3648_v52 = vmul.f32 -0.5, %v7680_v44 }
 0x3f9   :  { %4569 = vpow2.f32 %v3001_v9  ;;  %v3501_v49 = vmax.f32 %v8986_v8, 0.0  ;;  %v3502_v32 = vmax.f32 %v8987_v22, 0.0  ;;  %v3533_v61 = vmul.f32 %v2765_v27, %v8986_v8 }
 0x3fa   :  { %v3946_v29 = vmul.f32 %v3914_v26, %v3882_v23  ;;  %v3245_v19 = vmul.f32 %v7680_v44, %v3181_v1  ;;  %v3534_v47 = vmul.f32 %v7762_v12, %v8987_v22  ;;  %4571 = vlog2.f32 %v3054_v54 }
 0x3fb   :  { %v2929_v36 = vand.u32 2147483647, %v7773_v5  ;;  %v2930_v55 = vand.u32 2147483647, %v7778_v62  ;;  %v7794_v13 = vadd.f32 %v2861_v46, %v2797_v43  ;;  %v7796_v17 = vadd.f32 %v2862_v57, %v2798_v50 }
 0x3fc   :  { %v3980_v30 = vsel %vm2523_vm9, %v3946_v29, 0.0  ;;  %v3277_v38 = vsel %vm3213_vm6, %v3181_v1, %v3245_v19  ;;  %vm3214_vm7 = vcmp.ge.f32.partialorder %v8987_v22, 0.0  ;;  %v3649_v10 = vadd.f32 1.0, %v3648_v52 }
 0x3fd   :  { %v3981_v34 = vadd.f32 %v3980_v30, %v3945_v14  ;;  %v3341_v15 = vsub.f32 1.0, %v3277_v38  ;;  %v3651_v48 = vand.u32 2147483647, %v7680_v44  ;;  %v2961_v58 = vsub.f32 0.0, %v2929_v36 }
 0x3fe   :  { %v2962_v60 = vsub.f32 0.0, %v2930_v55  ;;  %v3309_v42 = vmul.f32 %v3277_v38, %v2765_v27  ;;  %v2831_v16 = vsub.f32 1.0, %v7790_v0  ;;  %v3565_v41 = vsub.f32 %v3501_v49, %v3533_v61  ;;  %v7851_v61 = vld [vmem:[%s8797_s1 + $0x458] sm:$0xff] }
 0x3ff   :  { %3982 = vadd.xlane.f32.xlu0 %v3981_v34  ;;  %v4564_v56 = vpop.eup %4563  ;;  %v3373_v11 = vmul.f32 %v3341_v15, %v2829_v24  ;;  %v7806_v2 = vsub.f32 %v3502_v32, %v3534_v47  ;;  %v3003_v53 = vmul.f32 1.442695, %v2961_v58  ;;  %v3657_v45 = vmul.f32 -0.5, %v7751_v31  ;;  %v7830_v24 = vld [vmem:[%s8797_s1 + $0x450] sm:$0xff] }
 0x400   :  { %v4566_v4 = vpop.eup %4565  ;;  %v3118_v39 = vmul.f32 %v4564_v56, %v3054_v54  ;;  %v3005_v59 = vmul.f32 1.442695, %v2962_v60  ;;  %v2799_v25 = vmul.f32 0.25, %v7790_v0  ;;  %v2863_v33 = vmul.f32 0.75, %v2831_v16 }
 0x401   :  { %v3647_v40 = vmul.f32 0.6931472, %v4566_v4  ;;  %v3650_v23 = vmul.f32 %v7680_v44, %v3649_v10  ;;  %v2832_v54 = vsub.f32 1.0, %v7803_v6  ;;  %4573 = vpow2.f32 %v3003_v53 }
 0x402   :  { %v3150_v63 = vsub.f32 2.0, %v3118_v39  ;;  %v7814_v37 = vpop.eup %4567  ;;  %v3405_v35 = vadd.f32 %v3373_v11, %v3309_v42  ;;  %vm7816_vm10 = vcmp.lt.f32.partialorder %v3651_v48, 0.0004427343  ;;  %4575 = vpow2.f32 %v3005_v59  ;;  %v7881_v42 = vld [vmem:[%s8796_s0 + $0x468] sm:$0xff] }
 0x403   :  { %v7820_v3 = vpop.eup %4569  ;;  %v3660_v14 = vand.u32 2147483647, %v7751_v31  ;;  %v2800_v21 = vmul.f32 0.25, %v7803_v6  ;;  %v2864_v44 = vmul.f32 0.75, %v2832_v54  ;;  %v3055_v29 = vadd.f32 1.0, %v7814_v37 }
 0x404   :  { %v3182_v27 = vmul.f32 %v4564_v56, %v3150_v63  ;;  %v3658_v43 = vadd.f32 1.0, %v3657_v45  ;;  %v7833_v18 = vadd.f32 %v2863_v33, %v2799_v25  ;;  %v3056_v9 = vadd.f32 1.0, %v7820_v3  ;;  %v4572_v30 = vpop.eup %4571 }
 0x405   :  { %v3653_v50 = vsel %vm7816_vm10, %v3650_v23, %v3647_v40  ;;  %4577 = vrcp.f32 %v3055_v29  ;;  %v3503_v46 = vmax.f32 %v7740_v51, 0.0  ;;  %v3535_v1 = vmul.f32 %v7790_v0, %v7740_v51 }
 0x406   :  { %v3246_v28 = vmul.f32 %v7751_v31, %v3182_v27  ;;  %v3437_v57 = vsub.f32 1.0, %v3405_v35  ;;  %4579 = vrcp.f32 %v3056_v9  ;;  %v2833_v8 = vsub.f32 1.0, %v7830_v24 }
 0x407   :  { %v3504_v49 = vmax.f32 %v7745_v20, 0.0  ;;  %v3536_v32 = vmul.f32 %v7803_v6, %v7745_v20  ;;  %v3656_v47 = vmul.f32 0.6931472, %v4572_v30  ;;  %v3659_v22 = vmul.f32 %v7751_v31, %v3658_v43 }
 0x408   :  { %v3278_v34 = vsel %vm3214_vm7, %v3182_v27, %v3246_v28  ;;  %v2801_v38 = vmul.f32 0.25, %v7830_v24  ;;  %v2865_v36 = vmul.f32 0.75, %v2833_v8  ;;  %vm7859_vm11 = vcmp.lt.f32.partialorder %v3660_v14, 0.0004427343 }
 0x409   :  { %v3310_v19 = vmul.f32 %v3278_v34, %v7762_v12  ;;  %v3342_v52 = vsub.f32 1.0, %v3278_v34  ;;  %v3885_v56 = vadd.f32 %v3653_v50, %v3565_v41  ;;  %v7863_v10 = vadd.f32 %v2864_v44, %v2800_v21 }
 0x40a   :  { %v3469_v48 = vmul.f32 %v3437_v57, %v3437_v57  ;;  %v7865_v58 = vsub.f32 %v3503_v46, %v3535_v1  ;;  %4581 = vlog2.f32 %v3055_v29  ;;  %v2834_v31 = vsub.f32 1.0, %v7851_v61 }
 0x40b   :  { %v3374_v55 = vmul.f32 %v3342_v52, %v2830_v7  ;;  %v7868_v60 = vpop.eup %4573  ;;  %v7870_v39 = vsub.f32 %v3504_v49, %v3536_v32  ;;  %4583 = vlog2.f32 %v3056_v9  ;;  %v2802_v12 = vmul.f32 0.25, %v7851_v61  ;;  %v7876_v7 = vld [vmem:[%s8796_s0 + $0x460] sm:$0xff] }
 0x40c   :  { %v7883_v11 = vpop.eup %4575  ;;  %v3662_v41 = vsel %vm7859_vm11, %v3659_v22, %v3656_v47  ;;  %v2866_v53 = vmul.f32 0.75, %v2834_v31  ;;  %v7889_v59 = vadd.f32 %v2865_v36, %v2801_v38  ;;  %v7892_v63 = vadd.f32 1.0, %v7868_v60 }
 0x40d   :  { %v3406_v4 = vadd.f32 %v3374_v55, %v3310_v19  ;;  %vm3215_vm12 = vcmp.ge.f32.partialorder %v7740_v51, 0.0  ;;  %v3666_v25 = vmul.f32 -0.5, %v7814_v37  ;;  %v3675_v33 = vmul.f32 -0.5, %v7820_v3 }
 0x40e   :  { %v3058_v40 = vadd.f32 1.0, %v7883_v11  ;;  %v3917_v23 = vmul.f32 %v3469_v48, %v7794_v13  ;;  %vm3216_vm13 = vcmp.ge.f32.partialorder %v7745_v20, 0.0  ;;  %4585 = vrcp.f32 %v7892_v63 }
 0x40f   :  { %v3438_v45 = vsub.f32 1.0, %v3406_v4  ;;  %v2931_v27 = vand.u32 2147483647, %v7876_v7  ;;  %v2932_v35 = vand.u32 2147483647, %v7881_v42  ;;  %v4578_v26 = vpop.eup %4577  ;;  %v3886_v21 = vadd.f32 %v3662_v41, %v7806_v2 }
 0x410   :  { %v3669_v44 = vand.u32 2147483647, %v7814_v37  ;;  %4587 = vrcp.f32 %v3058_v40  ;;  %v4580_v28 = vpop.eup %4579  ;;  %v3119_v43 = vmul.f32 %v4578_v26, %v3055_v29  ;;  %v7905_v30 = vadd.f32 %v2866_v53, %v2802_v12 }
 0x411   :  { %v3470_v14 = vmul.f32 %v3438_v45, %v3438_v45  ;;  %v3505_v13 = vmax.f32 %v7773_v5, 0.0  ;;  %v7910_v50 = vmul.f32 %v7830_v24, %v7773_v5  ;;  %v3120_v1 = vmul.f32 %v4580_v28, %v3056_v9 }
 0x412   :  { %v3667_v34 = vadd.f32 1.0, %v3666_v25  ;;  %v3676_v57 = vadd.f32 1.0, %v3675_v33  ;;  %v3949_v19 = vmul.f32 %v3917_v23, %v3885_v56  ;;  %v3151_v2 = vsub.f32 2.0, %v3119_v43 }
 0x413   :  { %v3918_v46 = vmul.f32 %v3470_v14, %v7796_v17  ;;  %v2963_v52 = vsub.f32 0.0, %v2931_v27  ;;  %v2964_v49 = vsub.f32 0.0, %v2932_v35  ;;  %v3152_v47 = vsub.f32 2.0, %v3120_v1  ;;  %v7978_v35 = vld [vmem:[%s8796_s0 + $0x470] sm:$0xff] }
 0x414   :  { %vm7913_vm14 = vcmp.lt.f32.partialorder %v3669_v44, 0.0004427343  ;;  %v3678_v22 = vand.u32 2147483647, %v7820_v3  ;;  %v4582_v38 = vpop.eup %4581  ;;  %v3183_v36 = vmul.f32 %v4578_v26, %v3151_v2  ;;  %4589 = vlog2.f32 %v7892_v63 }
 0x415   :  { %v3950_v32 = vmul.f32 %v3918_v46, %v3886_v21  ;;  %v3007_v17 = vmul.f32 1.442695, %v2963_v52  ;;  %v3009_v9 = vmul.f32 1.442695, %v2964_v49  ;;  %v4584_v55 = vpop.eup %4583  ;;  %v3184_v56 = vmul.f32 %v4580_v28, %v3152_v47 }
 0x416   :  { %v3668_v48 = vmul.f32 %v7814_v37, %v3667_v34  ;;  %4591 = vlog2.f32 %v3058_v40  ;;  %v3247_v12 = vmul.f32 %v7814_v37, %v3183_v36  ;;  %v3677_v41 = vmul.f32 %v7820_v3, %v3676_v57 }
 0x417   :  { %v3988_v15 = vsel %vm2523_vm9, %v3950_v32, 0.0  ;;  %vm3217_vm15 = vcmp.ge.f32.partialorder %v7773_v5, 0.0  ;;  %4593 = vpow2.f32 %v3007_v17  ;;  %v3248_v53 = vmul.f32 %v7820_v3, %v3184_v56  ;;  %v8008_v5 = vld [vmem:[%s8797_s1 + $0x468] sm:$0xff] }
 0x418   :  { %v3989_v4 = vadd.f32 %v3988_v15, %v3949_v19  ;;  %vm3218_vm0 = vcmp.ge.f32.partialorder %v7778_v62, 0.0  ;;  %v3684_v45 = vmul.f32 -0.5, %v7868_v60  ;;  %v3693_v25 = vmul.f32 -0.5, %v7883_v11  ;;  %v4586_v33 = vpop.eup %4585 }
 0x419   :  { %4595 = vpow2.f32 %v3009_v9  ;;  %v3279_v23 = vsel %vm3215_vm12, %v3183_v36, %v3247_v12  ;;  %v3665_v37 = vmul.f32 0.6931472, %v4582_v38  ;;  %v3674_v27 = vmul.f32 0.6931472, %v4584_v55 }
 0x41a   :  { %3990 = vadd.xlane.f32.xlu1 %v3989_v4  ;;  %vm7930_vm1 = vcmp.lt.f32.partialorder %v3678_v22, 0.0004427343  ;;  %v4588_v26 = vpop.eup %4587  ;;  %v3280_v3 = vsel %vm3216_vm13, %v3184_v56, %v3248_v53  ;;  %v3311_v14 = vmul.f32 %v3279_v23, %v7790_v0  ;;  %v3343_v21 = vsub.f32 1.0, %v3279_v23 }
 0x41b   :  { %v3121_v44 = vmul.f32 %v4586_v33, %v7892_v63  ;;  %v3312_v28 = vmul.f32 %v3280_v3, %v7803_v6  ;;  %v3344_v43 = vsub.f32 1.0, %v3280_v3  ;;  %v3122_v51 = vmul.f32 %v4588_v26, %v3058_v40 }
 0x41c   :  { %v3687_v46 = vand.u32 2147483647, %v7868_v60  ;;  %v3375_v1 = vmul.f32 %v3343_v21, %v2831_v16  ;;  %v3685_v57 = vadd.f32 1.0, %v3684_v45  ;;  %v3694_v19 = vadd.f32 1.0, %v3693_v25 }
 0x41d   :  { %v3153_v34 = vsub.f32 2.0, %v3121_v44  ;;  %v3376_v20 = vmul.f32 %v3344_v43, %v2832_v54  ;;  %v3154_v2 = vsub.f32 2.0, %v3122_v51  ;;  %v3506_v52 = vmax.f32 %v7778_v62, 0.0 }
 0x41e   :  { %v3538_v63 = vmul.f32 %v7851_v61, %v7778_v62  ;;  %v3407_v49 = vadd.f32 %v3375_v1, %v3311_v14  ;;  %v3671_v40 = vsel %vm7913_vm14, %v3668_v48, %v3665_v37  ;;  %v3680_v0 = vsel %vm7930_vm1, %v3677_v41, %v3674_v27  ;;  %v4590_v32 = vpop.eup %4589 }
 0x41f   :  { %v3185_v16 = vmul.f32 %v4586_v33, %v3153_v34  ;;  %v3408_v47 = vadd.f32 %v3376_v20, %v3312_v28  ;;  %v3186_v22 = vmul.f32 %v4588_v26, %v3154_v2  ;;  %vm7951_vm2 = vcmp.lt.f32.partialorder %v3687_v46, 0.0004427343 }
 0x420   :  { %v3696_v54 = vand.u32 2147483647, %v7883_v11  ;;  %v4592_v38 = vpop.eup %4591  ;;  %v3439_v36 = vsub.f32 1.0, %v3407_v49  ;;  %v3686_v29 = vmul.f32 %v7868_v60, %v3685_v57  ;;  %v3695_v9 = vmul.f32 %v7883_v11, %v3694_v19 }
 0x421   :  { %v3249_v17 = vmul.f32 %v7868_v60, %v3185_v16  ;;  %v7959_v55 = vpop.eup %4593  ;;  %v3440_v15 = vsub.f32 1.0, %v3408_v47  ;;  %v3887_v56 = vadd.f32 %v3671_v40, %v7865_v58  ;;  %v3888_v48 = vadd.f32 %v3680_v0, %v7870_v39 }
 0x422   :  { %v3250_v4 = vmul.f32 %v7883_v11, %v3186_v22  ;;  %v3471_v41 = vmul.f32 %v3439_v36, %v3439_v36  ;;  %v3683_v45 = vmul.f32 0.6931472, %v4590_v32  ;;  %v3059_v60 = vadd.f32 1.0, %v7959_v55 }
 0x423   :  { %v7964_v12 = vpop.eup %4595  ;;  %v3281_v53 = vsel %vm3217_vm15, %v3185_v16, %v3249_v17  ;;  %v3472_v25 = vmul.f32 %v3440_v15, %v3440_v15  ;;  %v3692_v3 = vmul.f32 0.6931472, %v4592_v38  ;;  %vm7985_vm3 = vcmp.lt.f32.partialorder %v3696_v54, 0.0004427343 }
 0x424   :  { %v3282_v33 = vsel %vm3218_vm0, %v3186_v22, %v3250_v4  ;;  %v3313_v23 = vmul.f32 %v3281_v53, %v7830_v24  ;;  %v3345_v58 = vsub.f32 1.0, %v3281_v53  ;;  %v3919_v39 = vmul.f32 %v3471_v41, %v7833_v18  ;;  %v7995_v24 = vld [vmem:[%s8797_s1 + $0x460] sm:$0xff] }
 0x425   :  { %v3314_v11 = vmul.f32 %v3282_v33, %v7851_v61  ;;  %v3346_v37 = vsub.f32 1.0, %v3282_v33  ;;  %v3060_v27 = vadd.f32 1.0, %v7964_v12  ;;  %v3920_v26 = vmul.f32 %v3472_v25, %v7863_v10  ;;  %v8041_v25 = vld [vmem:[%s8796_s0 + $0x480] sm:$0xff] }
 0x426   :  { %v3377_v62 = vmul.f32 %v3345_v58, %v2833_v8  ;;  %4597 = vrcp.f32 %v3059_v60  ;;  %v3951_v14 = vmul.f32 %v3919_v39, %v3887_v56  ;;  %v3569_v10 = vsub.f32 %v3505_v13, %v7910_v50  ;;  %v8000_v8 = vld [vmem:[%s8796_s0 + $0x478] sm:$0xff] }
 0x427   :  { %v3378_v18 = vmul.f32 %v3346_v37, %v2834_v31  ;;  %4599 = vrcp.f32 %v3060_v27  ;;  %v3952_v44 = vmul.f32 %v3920_v26, %v3888_v48  ;;  %v2933_v61 = vand.u32 2147483647, %v7978_v35  ;;  %v8051_v39 = vld [vmem:[%s8797_s1 + $0x478] sm:$0xff] }
 0x428   :  { %v3409_v28 = vadd.f32 %v3377_v62, %v3313_v23  ;;  %v3570_v43 = vsub.f32 %v3506_v52, %v3538_v63  ;;  %v3689_v51 = vsel %vm7951_vm2, %v3686_v29, %v3683_v45  ;;  %v2803_v13 = vmul.f32 0.25, %v7995_v24  ;;  %v8036_v45 = vld [vmem:[%s8797_s1 + $0x470] sm:$0xff] }
 0x429   :  { %v3410_v31 = vadd.f32 %v3378_v18, %v3314_v11  ;;  %v3992_v50 = vsel %vm2523_vm9, %v3952_v44, 0.0  ;;  %v3698_v1 = vsel %vm7985_vm3, %v3695_v9, %v3692_v3  ;;  %v2804_v34 = vmul.f32 0.25, %v8008_v5  ;;  %v8056_v11 = vld [vmem:[%s8796_s0 + $0x488] sm:$0xff] }
 0x42a   :  { %v3441_v46 = vsub.f32 1.0, %v3409_v28  ;;  %v3993_v57 = vadd.f32 %v3992_v50, %v3951_v14  ;;  %v2835_v20 = vsub.f32 1.0, %v7995_v24  ;;  %v2934_v2 = vand.u32 2147483647, %v8000_v8 }
 0x42b   :  { %v3442_v19 = vsub.f32 1.0, %v3410_v31  ;;  %v3889_v63 = vadd.f32 %v3689_v51, %v3569_v10  ;;  %v2836_v49 = vsub.f32 1.0, %v8008_v5  ;;  %v2965_v40 = vsub.f32 0.0, %v2933_v61 }
 0x42c   :  { %v3473_v52 = vmul.f32 %v3441_v46, %v3441_v46  ;;  %3994 = vadd.xlane.f32.xlu0 %v3993_v57  ;;  %v3890_v16 = vadd.f32 %v3698_v1, %v3570_v43  ;;  %v2867_v32 = vmul.f32 0.75, %v2835_v20  ;;  %v2966_v47 = vsub.f32 0.0, %v2934_v2 }
 0x42d   :  { %v3474_v0 = vmul.f32 %v3442_v19, %v3442_v19  ;;  %v2868_v6 = vmul.f32 0.75, %v2836_v49  ;;  %4601 = vlog2.f32 %v3059_v60  ;;  %v3011_v54 = vmul.f32 1.442695, %v2965_v40 }
 0x42e   :  { %v3921_v22 = vmul.f32 %v3473_v52, %v7889_v59  ;;  %vm3219_vm4 = vcmp.ge.f32.partialorder %v7876_v7, 0.0  ;;  %4603 = vlog2.f32 %v3060_v27  ;;  %v3013_v36 = vmul.f32 1.442695, %v2966_v47 }
 0x42f   :  { %v3922_v38 = vmul.f32 %v3474_v0, %v7905_v30  ;;  %vm3220_vm5 = vcmp.ge.f32.partialorder %v7881_v42, 0.0  ;;  %v3702_v9 = vmul.f32 -0.5, %v7959_v55  ;;  %4605 = vpow2.f32 %v3011_v54 }
 0x430   :  { %v4598_v17 = vpop.eup %4597  ;;  %v3953_v29 = vmul.f32 %v3921_v22, %v3889_v63  ;;  %v3507_v48 = vmax.f32 %v7876_v7, 0.0  ;;  %4607 = vpow2.f32 %v3013_v36  ;;  %v8028_v4 = vadd.f32 %v2867_v32, %v2803_v13 }
 0x431   :  { %v4600_v15 = vpop.eup %4599  ;;  %v3954_v59 = vmul.f32 %v3922_v38, %v3890_v16  ;;  %v3123_v56 = vmul.f32 %v4598_v17, %v3059_v60  ;;  %v8030_v30 = vadd.f32 %v2868_v6, %v2804_v34  ;;  %v3508_v53 = vmax.f32 %v7881_v42, 0.0 }
 0x432   :  { %v3124_v41 = vmul.f32 %v4600_v15, %v3060_v27  ;;  %v3539_v23 = vmul.f32 %v7995_v24, %v7876_v7  ;;  %v3540_v58 = vmul.f32 %v8008_v5, %v7881_v42  ;;  %v3703_v26 = vadd.f32 1.0, %v3702_v9 }
 0x433   :  { %v3996_v60 = vsel %vm2523_vm9, %v3954_v59, 0.0  ;;  %v3155_v33 = vsub.f32 2.0, %v3123_v56  ;;  %v3711_v62 = vmul.f32 -0.5, %v7964_v12  ;;  %v3705_v14 = vand.u32 2147483647, %v7959_v55 }
 0x434   :  { %v3997_v37 = vadd.f32 %v3996_v60, %v3953_v29  ;;  %v3156_v27 = vsub.f32 2.0, %v3124_v41  ;;  %v2837_v18 = vsub.f32 1.0, %v8036_v45  ;;  %v2935_v21 = vand.u32 2147483647, %v8041_v25 }
 0x435   :  { %v3187_v3 = vmul.f32 %v4598_v17, %v3155_v33  ;;  %v2805_v28 = vmul.f32 0.25, %v8036_v45  ;;  %v2838_v10 = vsub.f32 1.0, %v8051_v39  ;;  %v2936_v61 = vand.u32 2147483647, %v8056_v11 }
 0x436   :  { %3998 = vadd.xlane.f32.xlu1 %v3997_v37  ;;  %v3188_v44 = vmul.f32 %v4600_v15, %v3156_v27  ;;  %v3571_v43 = vsub.f32 %v3507_v48, %v3539_v23  ;;  %v2806_v51 = vmul.f32 0.25, %v8051_v39  ;;  %v2869_v13 = vmul.f32 0.75, %v2837_v18 }
 0x437   :  { %v3251_v31 = vmul.f32 %v7959_v55, %v3187_v3  ;;  %v4602_v50 = vpop.eup %4601  ;;  %v3704_v1 = vmul.f32 %v7959_v55, %v3703_v26  ;;  %v3712_v34 = vadd.f32 1.0, %v3711_v62  ;;  %v2870_v57 = vmul.f32 0.75, %v2838_v10  ;;  %v8121_v26 = vld [vmem:[%s8796_s0 + $0x490] sm:$0xff]  ;;  %v8126_v62 = vld [vmem:[%s8796_s0 + $0x498] sm:$0xff] }
 0x438   :  { %v3252_v46 = vmul.f32 %v7964_v12, %v3188_v44  ;;  %v4604_v19 = vpop.eup %4603  ;;  %vm8075_vm6 = vcmp.lt.f32.partialorder %v3705_v14, 0.0004427343  ;;  %v3714_v63 = vand.u32 2147483647, %v7964_v12  ;;  %v2967_v40 = vsub.f32 0.0, %v2935_v21  ;;  %v8131_v21 = vld [vmem:[%s8797_s1 + $0x488] sm:$0xff] }
 0x439   :  { %v3283_v2 = vsel %vm3219_vm4, %v3187_v3, %v3251_v31  ;;  %v8080_v0 = vpop.eup %4605  ;;  %v2968_v47 = vsub.f32 0.0, %v2936_v61  ;;  %v3701_v54 = vmul.f32 0.6931472, %v4602_v50  ;;  %v3710_v17 = vmul.f32 0.6931472, %v4604_v19 }
 0x43a   :  { %v3284_v55 = vsel %vm3220_vm5, %v3188_v44, %v3252_v46  ;;  %v3315_v16 = vmul.f32 %v3283_v2, %v7995_v24  ;;  %v3347_v32 = vsub.f32 1.0, %v3283_v2  ;;  %v8085_v22 = vpop.eup %4607  ;;  %v3061_v38 = vadd.f32 1.0, %v8080_v0 }
 0x43b   :  { %v3316_v7 = vmul.f32 %v3284_v55, %v8008_v5  ;;  %v3348_v6 = vsub.f32 1.0, %v3284_v55  ;;  %v3713_v29 = vmul.f32 %v7964_v12, %v3712_v34  ;;  %v3062_v42 = vadd.f32 1.0, %v8085_v22 }
 0x43c   :  { %v3379_v36 = vmul.f32 %v3347_v32, %v2835_v20  ;;  %vm8095_vm7 = vcmp.lt.f32.partialorder %v3714_v63, 0.0004427343  ;;  %4609 = vrcp.f32 %v3061_v38  ;;  %v3015_v59 = vmul.f32 1.442695, %v2967_v40 }
 0x43d   :  { %v3380_v9 = vmul.f32 %v3348_v6, %v2836_v49  ;;  %v3572_v48 = vsub.f32 %v3508_v53, %v3540_v58  ;;  %4611 = vrcp.f32 %v3062_v42  ;;  %v3017_v41 = vmul.f32 1.442695, %v2968_v47  ;;  %v8112_v53 = vld [vmem:[%s8797_s1 + $0x480] sm:$0xff] }
 0x43e   :  { %v3411_v56 = vadd.f32 %v3379_v36, %v3315_v16  ;;  %v3707_v20 = vsel %vm8075_vm6, %v3704_v1, %v3701_v54  ;;  %v8101_v12 = vadd.f32 %v2869_v13, %v2805_v28  ;;  %v8103_v60 = vadd.f32 %v2870_v57, %v2806_v51 }
 0x43f   :  { %v3412_v24 = vadd.f32 %v3380_v9, %v3316_v7  ;;  %v3716_v49 = vsel %vm8095_vm7, %v3713_v29, %v3710_v17  ;;  %v3509_v33 = vmax.f32 %v7978_v35, 0.0  ;;  %v3510_v23 = vmax.f32 %v8000_v8, 0.0 }
 0x440   :  { %v3443_v5 = vsub.f32 1.0, %v3411_v56  ;;  %v3541_v37 = vmul.f32 %v8036_v45, %v7978_v35  ;;  %v3542_v27 = vmul.f32 %v8051_v39, %v8000_v8  ;;  %4613 = vpow2.f32 %v3015_v59 }
 0x441   :  { %v3444_v58 = vsub.f32 1.0, %v3412_v24  ;;  %v3891_v14 = vadd.f32 %v3707_v20, %v3571_v43  ;;  %v2807_v44 = vmul.f32 0.25, %v8112_v53  ;;  %4615 = vpow2.f32 %v3017_v41 }
 0x442   :  { %v3475_v3 = vmul.f32 %v3443_v5, %v3443_v5  ;;  %v3892_v61 = vadd.f32 %v3716_v49, %v3572_v48  ;;  %v2808_v31 = vmul.f32 0.25, %v8131_v21  ;;  %v2839_v51 = vsub.f32 1.0, %v8112_v53 }
 0x443   :  { %v3476_v28 = vmul.f32 %v3444_v58, %v3444_v58  ;;  %4617 = vlog2.f32 %v3061_v38  ;;  %v2937_v50 = vand.u32 2147483647, %v8121_v26  ;;  %v2938_v43 = vand.u32 2147483647, %v8126_v62 }
 0x444   :  { %v3923_v13 = vmul.f32 %v3475_v3, %v8028_v4  ;;  %vm3221_vm10 = vcmp.ge.f32.partialorder %v7978_v35, 0.0  ;;  %v8141_v1 = vsub.f32 %v3509_v33, %v3541_v37  ;;  %v2840_v34 = vsub.f32 1.0, %v8131_v21 }
 0x445   :  { %v3924_v46 = vmul.f32 %v3476_v28, %v8030_v30  ;;  %v2871_v57 = vmul.f32 0.75, %v2839_v51  ;;  %vm3222_vm11 = vcmp.ge.f32.partialorder %v8000_v8, 0.0  ;;  %4619 = vlog2.f32 %v3062_v42 }
 0x446   :  { %v3955_v19 = vmul.f32 %v3923_v13, %v3891_v14  ;;  %v2969_v4 = vsub.f32 0.0, %v2937_v50  ;;  %v2970_v2 = vsub.f32 0.0, %v2938_v43  ;;  %v4610_v52 = vpop.eup %4609  ;;  %v8147_v40 = vsub.f32 %v3510_v23, %v3542_v27  ;;  %v8189_v13 = vld [vmem:[%s8797_s1 + $0x490] sm:$0xff] }
 0x447   :  { %v3956_v63 = vmul.f32 %v3924_v46, %v3892_v61  ;;  %v3720_v30 = vmul.f32 -0.5, %v8080_v0  ;;  %v2872_v55 = vmul.f32 0.75, %v2840_v34  ;;  %v4612_v16 = vpop.eup %4611  ;;  %v3125_v32 = vmul.f32 %v4610_v52, %v3061_v38 }
 0x448   :  { %v3729_v47 = vmul.f32 -0.5, %v8085_v22  ;;  %v3019_v7 = vmul.f32 1.442695, %v2969_v4  ;;  %v3021_v6 = vmul.f32 1.442695, %v2970_v2  ;;  %v3126_v36 = vmul.f32 %v4612_v16, %v3062_v42 }
 0x449   :  { %v4000_v54 = vsel %vm2523_vm9, %v3956_v63, 0.0  ;;  %v8154_v17 = vadd.f32 %v2871_v57, %v2807_v44  ;;  %v3511_v29 = vmax.f32 %v8041_v25, 0.0  ;;  %v3157_v15 = vsub.f32 2.0, %v3125_v32  ;;  %v8205_v63 = vld [vmem:[%s8797_s1 + $0x498] sm:$0xff] }
 0x44a   :  { %v4001_v9 = vadd.f32 %v4000_v54, %v3955_v19  ;;  %v3723_v59 = vand.u32 2147483647, %v8080_v0  ;;  %4621 = vpow2.f32 %v3019_v7  ;;  %v8158_v56 = vpop.eup %4613  ;;  %v3158_v48 = vsub.f32 2.0, %v3126_v36 }
 0x44b   :  { %v3721_v38 = vadd.f32 1.0, %v3720_v30  ;;  %v3732_v41 = vand.u32 2147483647, %v8085_v22  ;;  %4623 = vpow2.f32 %v3021_v6  ;;  %v8161_v24 = vpop.eup %4615  ;;  %v3189_v42 = vmul.f32 %v4610_v52, %v3157_v15 }
 0x44c   :  { %4002 = vadd.xlane.f32.xlu0 %v4001_v9  ;;  %v3730_v20 = vadd.f32 1.0, %v3729_v47  ;;  %v3063_v5 = vadd.f32 1.0, %v8158_v56  ;;  %v3543_v49 = vmul.f32 %v8112_v53, %v8041_v25  ;;  %v3190_v33 = vmul.f32 %v4612_v16, %v3158_v48 }
 0x44d   :  { %v8166_v23 = vadd.f32 %v2872_v55, %v2808_v31  ;;  %v8169_v58 = vadd.f32 1.0, %v8161_v24  ;;  %v3512_v37 = vmax.f32 %v8056_v11, 0.0  ;;  %v4618_v27 = vpop.eup %4617  ;;  %v3253_v3 = vmul.f32 %v8080_v0, %v3189_v42 }
 0x44e   :  { %vm8173_vm12 = vcmp.lt.f32.partialorder %v3723_v59, 0.0004427343  ;;  %4625 = vrcp.f32 %v3063_v5  ;;  %v3544_v44 = vmul.f32 %v8131_v21, %v8056_v11  ;;  %v3254_v28 = vmul.f32 %v8085_v22, %v3190_v33 }
 0x44f   :  { %v3722_v61 = vmul.f32 %v8080_v0, %v3721_v38  ;;  %vm8181_vm13 = vcmp.lt.f32.partialorder %v3732_v41, 0.0004427343  ;;  %4627 = vrcp.f32 %v8169_v58  ;;  %v4620_v50 = vpop.eup %4619  ;;  %v3285_v43 = vsel %vm3221_vm10, %v3189_v42, %v3253_v3 }
 0x450   :  { %v3731_v46 = vmul.f32 %v8085_v22, %v3730_v20  ;;  %v8194_v57 = vsub.f32 %v3511_v29, %v3543_v49  ;;  %v8197_v0 = vmul.f32 0.25, %v8189_v13  ;;  %v3286_v19 = vsel %vm3222_vm11, %v3190_v33, %v3254_v28  ;;  %v8251_v28 = vld [vmem:[%s8796_s0 + $0x4a0] sm:$0xff] }
 0x451   :  { %v3317_v4 = vmul.f32 %v3285_v43, %v8036_v45  ;;  %v3349_v2 = vsub.f32 1.0, %v3285_v43  ;;  %v3719_v52 = vmul.f32 0.6931472, %v4618_v27  ;;  %v3318_v35 = vmul.f32 %v3286_v19, %v8051_v39 }
 0x452   :  { %v3350_v22 = vsub.f32 1.0, %v3286_v19  ;;  %v8208_v30 = vsub.f32 %v3512_v37, %v3544_v44  ;;  %v8211_v55 = vmul.f32 0.25, %v8205_v63  ;;  %v3728_v16 = vmul.f32 0.6931472, %v4620_v50 }
 0x453   :  { %v3381_v8 = vmul.f32 %v3349_v2, %v2837_v18  ;;  %4629 = vlog2.f32 %v3063_v5  ;;  %v3738_v32 = vmul.f32 -0.5, %v8158_v56  ;;  %v2841_v6 = vsub.f32 1.0, %v8189_v13 }
 0x454   :  { %v8216_v47 = vpop.eup %4621  ;;  %v3382_v7 = vmul.f32 %v3350_v22, %v2838_v10  ;;  %4631 = vlog2.f32 %v8169_v58  ;;  %v2842_v54 = vsub.f32 1.0, %v8205_v63  ;;  %v3725_v45 = vsel %vm8173_vm12, %v3722_v61, %v3719_v52 }
 0x455   :  { %v8223_v36 = vpop.eup %4623  ;;  %v3413_v29 = vadd.f32 %v3381_v8, %v3317_v4  ;;  %v3747_v18 = vmul.f32 -0.5, %v8161_v24  ;;  %v8229_v9 = vadd.f32 1.0, %v8216_v47  ;;  %vm3223_vm14 = vcmp.ge.f32.partialorder %v8041_v25, 0.0 }
 0x456   :  { %v3414_v15 = vadd.f32 %v3382_v7, %v3318_v35  ;;  %v8234_v39 = vmul.f32 0.75, %v2841_v6  ;;  %v8237_v10 = vadd.f32 1.0, %v8223_v36  ;;  %v3513_v59 = vmax.f32 %v8121_v26, 0.0 }
 0x457   :  { %v3445_v48 = vsub.f32 1.0, %v3413_v29  ;;  %v3734_v38 = vsel %vm8181_vm13, %v3731_v46, %v3728_v16  ;;  %vm3224_vm15 = vcmp.ge.f32.partialorder %v8056_v11, 0.0  ;;  %v3739_v41 = vadd.f32 1.0, %v3738_v32 }
 0x458   :  { %4633 = vrcp.f32 %v8229_v9  ;;  %v4626_v42 = vpop.eup %4625  ;;  %v3446_v20 = vsub.f32 1.0, %v3414_v15  ;;  %v3893_v49 = vadd.f32 %v3725_v45, %v8141_v1  ;;  %v3741_v33 = vand.u32 2147483647, %v8158_v56 }
 0x459   :  { %4635 = vrcp.f32 %v8237_v10  ;;  %v4628_v37 = vpop.eup %4627  ;;  %v3477_v27 = vmul.f32 %v3445_v48, %v3445_v48  ;;  %v3127_v3 = vmul.f32 %v4626_v42, %v3063_v5  ;;  %v3748_v14 = vadd.f32 1.0, %v3747_v18 }
 0x45a   :  { %v3750_v44 = vand.u32 2147483647, %v8161_v24  ;;  %v3478_v61 = vmul.f32 %v3446_v20, %v3446_v20  ;;  %v3894_v31 = vadd.f32 %v3734_v38, %v8147_v40  ;;  %v3128_v1 = vmul.f32 %v4628_v37, %v8169_v58  ;;  %v8272_v40 = vld [vmem:[%s8796_s0 + $0x4a8] sm:$0xff] }
 0x45b   :  { %v3514_v50 = vmax.f32 %v8126_v62, 0.0  ;;  %v3925_v43 = vmul.f32 %v3477_v27, %v8101_v12  ;;  %v3159_v46 = vsub.f32 2.0, %v3127_v3  ;;  %v8258_v5 = vmul.f32 %v8158_v56, %v3739_v41 }
 0x45c   :  { %v8262_v19 = vmul.f32 %v8189_v13, %v8121_v26  ;;  %v3926_v4 = vmul.f32 %v3478_v61, %v8103_v60  ;;  %v3160_v2 = vsub.f32 2.0, %v3128_v1  ;;  %vm8265_vm0 = vcmp.lt.f32.partialorder %v3741_v33, 0.0004427343 }
 0x45d   :  { %v2939_v12 = vand.u32 2147483647, %v8251_v28  ;;  %v4630_v58 = vpop.eup %4629  ;;  %v3957_v35 = vmul.f32 %v3925_v43, %v3893_v49  ;;  %v3191_v22 = vmul.f32 %v4626_v42, %v3159_v46  ;;  %v3749_v8 = vmul.f32 %v8161_v24, %v3748_v14 }
 0x45e   :  { %vm8276_vm1 = vcmp.lt.f32.partialorder %v3750_v44, 0.0004427343  ;;  %v4632_v60 = vpop.eup %4631  ;;  %v3958_v32 = vmul.f32 %v3926_v4, %v3894_v31  ;;  %v3192_v7 = vmul.f32 %v4628_v37, %v3160_v2  ;;  %4637 = vlog2.f32 %v8229_v9 }
 0x45f   :  { %v3756_v29 = vmul.f32 -0.5, %v8216_v47  ;;  %v3255_v45 = vmul.f32 %v8158_v56, %v3191_v22  ;;  %vm3225_vm2 = vcmp.ge.f32.partialorder %v8121_v26, 0.0  ;;  %v3759_v18 = vand.u32 2147483647, %v8216_v47 }
 0x460   :  { %4639 = vlog2.f32 %v8237_v10  ;;  %v2940_v15 = vand.u32 2147483647, %v8272_v40  ;;  %v4004_v48 = vsel %vm2523_vm9, %v3958_v32, 0.0  ;;  %v3256_v38 = vmul.f32 %v8161_v24, %v3192_v7 }
 0x461   :  { %v3737_v41 = vmul.f32 0.6931472, %v4630_v58  ;;  %vm3226_vm3 = vcmp.ge.f32.partialorder %v8126_v62, 0.0  ;;  %v2971_v42 = vsub.f32 0.0, %v2939_v12  ;;  %v4005_v49 = vadd.f32 %v4004_v48, %v3957_v35 }
 0x462   :  { %v4634_v20 = vpop.eup %4633  ;;  %v3287_v56 = vsel %vm3223_vm14, %v3191_v22, %v3255_v45  ;;  %v3746_v33 = vmul.f32 0.6931472, %v4632_v60  ;;  %v2972_v37 = vsub.f32 0.0, %v2940_v15  ;;  %v3288_v3 = vsel %vm3224_vm15, %v3192_v7, %v3256_v38 }
 0x463   :  { %v4636_v27 = vpop.eup %4635  ;;  %v3319_v14 = vmul.f32 %v3287_v56, %v8112_v53  ;;  %v3351_v44 = vsub.f32 1.0, %v3287_v56  ;;  %v3129_v24 = vmul.f32 %v4634_v20, %v8229_v9  ;;  %4006 = vadd.xlane.f32.xlu1 %v4005_v49  ;;  %v3320_v61 = vmul.f32 %v3288_v3, %v8131_v21 }
 0x464   :  { %v3352_v31 = vsub.f32 1.0, %v3288_v3  ;;  %v3130_v1 = vmul.f32 %v4636_v27, %v8237_v10  ;;  %v3023_v43 = vmul.f32 1.442695, %v2971_v42  ;;  %v3765_v4 = vmul.f32 -0.5, %v8223_v36 }
 0x465   :  { %v3383_v25 = vmul.f32 %v3351_v44, %v2839_v51  ;;  %v3161_v46 = vsub.f32 2.0, %v3129_v24  ;;  %v3025_v11 = vmul.f32 1.442695, %v2972_v37  ;;  %v3757_v58 = vadd.f32 1.0, %v3756_v29 }
 0x466   :  { %v3384_v2 = vmul.f32 %v3352_v31, %v2840_v34  ;;  %v3162_v12 = vsub.f32 2.0, %v3130_v1  ;;  %4641 = vpow2.f32 %v3023_v43  ;;  %v3546_v22 = vmul.f32 %v8205_v63, %v8126_v62 }
 0x467   :  { %v3415_v9 = vadd.f32 %v3383_v25, %v3319_v14  ;;  %v3193_v35 = vmul.f32 %v4634_v20, %v3161_v46  ;;  %4643 = vpow2.f32 %v3025_v11  ;;  %v3743_v53 = vsel %vm8265_vm0, %v8258_v5, %v3737_v41  ;;  %v8366_v46 = vld [vmem:[%s8797_s1 + $0x4a0] sm:$0xff] }
 0x468   :  { %v3416_v10 = vadd.f32 %v3384_v2, %v3320_v61  ;;  %v3752_v51 = vsel %vm8276_vm1, %v3749_v8, %v3746_v33  ;;  %v3194_v60 = vmul.f32 %v4636_v27, %v3162_v12  ;;  %v4638_v21 = vpop.eup %4637  ;;  %vm8311_vm4 = vcmp.lt.f32.partialorder %v3759_v18, 0.0004427343  ;;  %v8371_v2 = vld [vmem:[%s8796_s0 + $0x4b8] sm:$0xff] }
 0x469   :  { %v3447_v34 = vsub.f32 1.0, %v3415_v9  ;;  %v3257_v32 = vmul.f32 %v8216_v47, %v3193_v35  ;;  %v3768_v29 = vand.u32 2147483647, %v8223_v36  ;;  %v3758_v5 = vmul.f32 %v8216_v47, %v3757_v58 }
 0x46a   :  { %v4640_v45 = vpop.eup %4639  ;;  %v3448_v15 = vsub.f32 1.0, %v3416_v10  ;;  %v3258_v48 = vmul.f32 %v8223_v36, %v3194_v60  ;;  %v3766_v52 = vadd.f32 1.0, %v3765_v4  ;;  %v3895_v8 = vadd.f32 %v3743_v53, %v8194_v57 }
 0x46b   :  { %v3479_v16 = vmul.f32 %v3447_v34, %v3447_v34  ;;  %v3896_v38 = vadd.f32 %v3752_v51, %v8208_v30  ;;  %v3289_v18 = vsel %vm3225_vm2, %v3193_v35, %v3257_v32  ;;  %v3755_v37 = vmul.f32 0.6931472, %v4638_v21  ;;  %v8377_v35 = vld [vmem:[%s8797_s1 + $0x4a8] sm:$0xff] }
 0x46c   :  { %v3480_v41 = vmul.f32 %v3448_v15, %v3448_v15  ;;  %v3290_v42 = vsel %vm3226_vm3, %v3194_v60, %v3258_v48  ;;  %v3321_v20 = vmul.f32 %v3289_v18, %v8189_v13  ;;  %v3353_v49 = vsub.f32 1.0, %v3289_v18 }
 0x46d   :  { %v3927_v56 = vmul.f32 %v3479_v16, %v8154_v17  ;;  %v3322_v47 = vmul.f32 %v3290_v42, %v8205_v63  ;;  %v3354_v33 = vsub.f32 1.0, %v3290_v42  ;;  %v3764_v27 = vmul.f32 0.6931472, %v4640_v45  ;;  %v8396_v16 = vld [vmem:[%s8796_s0 + $0x4c0] sm:$0xff]  ;;  %v8424_v17 = vld [vmem:[%s8797_s1 + $0x4b8] sm:$0xff] }
 0x46e   :  { %v3928_v57 = vmul.f32 %v3480_v41, %v8166_v23  ;;  %v3385_v30 = vmul.f32 %v3353_v49, %v2841_v6  ;;  %v3767_v3 = vmul.f32 %v8223_v36, %v3766_v52  ;;  %v2874_v44 = vmul.f32 0.75, %v2842_v54 }
 0x46f   :  { %v3959_v14 = vmul.f32 %v3927_v56, %v3895_v8  ;;  %v3386_v24 = vmul.f32 %v3354_v33, %v2842_v54  ;;  %vm8335_vm5 = vcmp.lt.f32.partialorder %v3768_v29, 0.0004427343  ;;  %v2905_v13 = vadd.f32 %v8234_v39, %v8197_v0  ;;  %v8356_v0 = vld [vmem:[%s8796_s0 + $0x4b0] sm:$0xff]  ;;  %v8401_v8 = vld [vmem:[%s8796_s0 + $0x4c8] sm:$0xff] }
 0x470   :  { %v8339_v61 = vpop.eup %4641  ;;  %v3960_v23 = vmul.f32 %v3928_v57, %v3896_v38  ;;  %v3417_v6 = vadd.f32 %v3385_v30, %v3321_v20  ;;  %v3577_v36 = vsub.f32 %v3513_v59, %v8262_v19  ;;  %v3578_v63 = vsub.f32 %v3514_v50, %v3546_v22 }
 0x471   :  { %v8346_v31 = vpop.eup %4643  ;;  %v3418_v1 = vadd.f32 %v3386_v24, %v3322_v47  ;;  %v3761_v54 = vsel %vm8311_vm4, %v3758_v5, %v3755_v37  ;;  %v3067_v43 = vadd.f32 1.0, %v8339_v61  ;;  %v3770_v59 = vsel %vm8335_vm5, %v3767_v3, %v3764_v27  ;;  %v8419_v24 = vld [vmem:[%s8797_s1 + $0x4b0] sm:$0xff] }
 0x472   :  { %v4008_v39 = vsel %vm2523_vm9, %v3960_v23, 0.0  ;;  %v3449_v26 = vsub.f32 1.0, %v3417_v6  ;;  %v3068_v19 = vadd.f32 1.0, %v8346_v31  ;;  %v2906_v50 = vadd.f32 %v2874_v44, %v8211_v55 }
 0x473   :  { %v4009_v62 = vadd.f32 %v4008_v39, %v3959_v14  ;;  %v3450_v25 = vsub.f32 1.0, %v3418_v1  ;;  %4645 = vrcp.f32 %v3067_v43  ;;  %v3897_v11 = vadd.f32 %v3761_v54, %v3577_v36 }
 0x474   :  { %v3481_v4 = vmul.f32 %v3449_v26, %v3449_v26  ;;  %4647 = vrcp.f32 %v3068_v19  ;;  %v2941_v12 = vand.u32 2147483647, %v8356_v0  ;;  %v3898_v55 = vadd.f32 %v3770_v59, %v3578_v63 }
 0x475   :  { %4010 = vadd.xlane.f32.xlu0 %v4009_v62  ;;  %v3482_v58 = vmul.f32 %v3450_v25, %v3450_v25  ;;  %v2843_v22 = vsub.f32 1.0, %v8366_v46  ;;  %v2942_v53 = vand.u32 2147483647, %v8371_v2  ;;  %v2811_v60 = vmul.f32 0.25, %v8366_v46 }
 0x476   :  { %v3929_v9 = vmul.f32 %v3481_v4, %v2905_v13  ;;  %v2973_v34 = vsub.f32 0.0, %v2941_v12  ;;  %v2844_v7 = vsub.f32 1.0, %v8377_v35  ;;  %v8386_v45 = vmul.f32 0.25, %v8377_v35 }
 0x477   :  { %v3930_v10 = vmul.f32 %v3482_v58, %v2906_v50  ;;  %v2875_v21 = vmul.f32 0.75, %v2843_v22  ;;  %v2974_v29 = vsub.f32 0.0, %v2942_v53  ;;  %4649 = vlog2.f32 %v3067_v43 }
 0x478   :  { %v3961_v51 = vmul.f32 %v3929_v9, %v3897_v11  ;;  %v3027_v15 = vmul.f32 1.442695, %v2973_v34  ;;  %v8391_v5 = vmul.f32 0.75, %v2844_v7  ;;  %4651 = vlog2.f32 %v3068_v19 }
 0x479   :  { %v3962_v32 = vmul.f32 %v3930_v10, %v3898_v55  ;;  %v3029_v52 = vmul.f32 1.442695, %v2974_v29  ;;  %v8403_v18 = vadd.f32 %v2875_v21, %v2811_v60  ;;  %v3774_v41 = vmul.f32 -0.5, %v8339_v61 }
 0x47a   :  { %4653 = vpow2.f32 %v3027_v15  ;;  %vm3227_vm6 = vcmp.ge.f32.partialorder %v8251_v28, 0.0  ;;  %vm3228_vm7 = vcmp.ge.f32.partialorder %v8272_v40, 0.0  ;;  %v3783_v20 = vmul.f32 -0.5, %v8346_v31 }
 0x47b   :  { %v4012_v48 = vsel %vm2523_vm9, %v3962_v32, 0.0  ;;  %4655 = vpow2.f32 %v3029_v52  ;;  %v3515_v47 = vmax.f32 %v8251_v28, 0.0  ;;  %v2943_v33 = vand.u32 2147483647, %v8396_v16 }
 0x47c   :  { %v4013_v38 = vadd.f32 %v4012_v48, %v3961_v51  ;;  %v2944_v37 = vand.u32 2147483647, %v8401_v8  ;;  %v3516_v30 = vmax.f32 %v8272_v40, 0.0  ;;  %v3547_v27 = vmul.f32 %v8366_v46, %v8251_v28 }
 0x47d   :  { %v4646_v42 = vpop.eup %4645  ;;  %v3777_v3 = vand.u32 2147483647, %v8339_v61  ;;  %v3775_v44 = vadd.f32 1.0, %v3774_v41  ;;  %v2975_v23 = vsub.f32 0.0, %v2943_v33  ;;  %v3548_v36 = vmul.f32 %v8377_v35, %v8272_v40 }
 0x47e   :  { %v4648_v49 = vpop.eup %4647  ;;  %4014 = vadd.xlane.f32.xlu1 %v4013_v38  ;;  %v3131_v56 = vmul.f32 %v4646_v42, %v3067_v43  ;;  %v2976_v13 = vsub.f32 0.0, %v2944_v37  ;;  %v3784_v1 = vadd.f32 1.0, %v3783_v20  ;;  %v2813_v63 = vmul.f32 0.25, %v8419_v24 }
 0x47f   :  { %v3132_v57 = vmul.f32 %v4648_v49, %v3068_v19  ;;  %v3786_v43 = vand.u32 2147483647, %v8346_v31  ;;  %v3031_v39 = vmul.f32 1.442695, %v2975_v23  ;;  %v2814_v19 = vmul.f32 0.25, %v8424_v17 }
 0x480   :  { %v3163_v14 = vsub.f32 2.0, %v3131_v56  ;;  %v3033_v26 = vmul.f32 1.442695, %v2976_v13  ;;  %v2845_v62 = vsub.f32 1.0, %v8419_v24  ;;  %v2846_v50 = vsub.f32 1.0, %v8424_v17 }
 0x481   :  { %v3164_v6 = vsub.f32 2.0, %v3132_v57  ;;  %v4650_v25 = vpop.eup %4649  ;;  %v3776_v11 = vmul.f32 %v8339_v61, %v3775_v44  ;;  %vm8435_vm10 = vcmp.lt.f32.partialorder %v3777_v3, 0.0004427343  ;;  %4657 = vpow2.f32 %v3031_v39 }
 0x482   :  { %v3195_v54 = vmul.f32 %v4646_v42, %v3163_v14  ;;  %v4652_v58 = vpop.eup %4651  ;;  %v3785_v9 = vmul.f32 %v8346_v31, %v3784_v1  ;;  %v2877_v10 = vmul.f32 0.75, %v2845_v62  ;;  %4659 = vpow2.f32 %v3033_v26 }
 0x483   :  { %v3196_v59 = vmul.f32 %v4648_v49, %v3164_v6  ;;  %vm8447_vm11 = vcmp.lt.f32.partialorder %v3786_v43, 0.0004427343  ;;  %v2878_v60 = vmul.f32 0.75, %v2846_v50  ;;  %v3517_v21 = vmax.f32 %v8356_v0, 0.0  ;;  %v8511_v43 = vld [vmem:[%s8796_s0 + $0x4d0] sm:$0xff] }
 0x484   :  { %v3259_v4 = vmul.f32 %v8339_v61, %v3195_v54  ;;  %v8443_v53 = vpop.eup %4653  ;;  %v3773_v52 = vmul.f32 0.6931472, %v4650_v25  ;;  %v3782_v42 = vmul.f32 0.6931472, %v4652_v58  ;;  %v3549_v40 = vmul.f32 %v8419_v24, %v8356_v0 }
 0x485   :  { %v3260_v55 = vmul.f32 %v8346_v31, %v3196_v59  ;;  %v8454_v34 = vpop.eup %4655  ;;  %v3069_v28 = vadd.f32 1.0, %v8443_v53  ;;  %v3518_v49 = vmax.f32 %v8371_v2, 0.0  ;;  %v3550_v56 = vmul.f32 %v8424_v17, %v8371_v2 }
 0x486   :  { %v3291_v51 = vsel %vm3227_vm6, %v3195_v54, %v3259_v4  ;;  %v3070_v38 = vadd.f32 1.0, %v8454_v34  ;;  %v2908_v33 = vadd.f32 %v8391_v5, %v8386_v45  ;;  %v3779_v3 = vsel %vm8435_vm10, %v3776_v11, %v3773_v52 }
 0x487   :  { %v3292_v31 = vsel %vm3228_vm7, %v3196_v59, %v3260_v55  ;;  %v3323_v32 = vmul.f32 %v3291_v51, %v8366_v46  ;;  %v3355_v29 = vsub.f32 1.0, %v3291_v51  ;;  %4661 = vrcp.f32 %v3069_v28  ;;  %v8528_v55 = vld [vmem:[%s8796_s0 + $0x4d8] sm:$0xff] }
 0x488   :  { %v3324_v15 = vmul.f32 %v3292_v31, %v8377_v35  ;;  %v3356_v48 = vsub.f32 1.0, %v3292_v31  ;;  %4663 = vrcp.f32 %v3070_v38  ;;  %v3579_v46 = vsub.f32 %v3515_v47, %v3547_v27  ;;  %v8491_v47 = vld [vmem:[%s8797_s1 + $0x4c8] sm:$0xff] }
 0x489   :  { %v3387_v41 = vmul.f32 %v3355_v29, %v2843_v22  ;;  %v3580_v22 = vsub.f32 %v3516_v30, %v3548_v36  ;;  %v8475_v14 = vadd.f32 %v2877_v10, %v2813_v63  ;;  %v8477_v35 = vadd.f32 %v2878_v60, %v2814_v19 }
 0x48a   :  { %v3388_v20 = vmul.f32 %v3356_v48, %v2844_v7  ;;  %v8482_v7 = vld [vmem:[%s8797_s1 + $0x4c0] sm:$0xff]  ;;  %v3788_v45 = vsel %vm8447_vm11, %v3785_v9, %v3782_v42  ;;  %v8486_v5 = vsub.f32 %v3517_v21, %v3549_v40  ;;  %v8498_v13 = vsub.f32 %v3518_v49, %v3550_v56 }
 0x48b   :  { %v3419_v37 = vadd.f32 %v3387_v41, %v3323_v32  ;;  %v8494_v30 = vmul.f32 0.25, %v8482_v7  ;;  %v8496_v27 = vpop.eup %4657  ;;  %4665 = vlog2.f32 %v3069_v28  ;;  %v8501_v6 = vmul.f32 0.25, %v8491_v47 }
 0x48c   :  { %v3420_v57 = vadd.f32 %v3388_v20, %v3324_v15  ;;  %v8503_v36 = vpop.eup %4659  ;;  %v3899_v63 = vadd.f32 %v3779_v3, %v3579_v46  ;;  %4667 = vlog2.f32 %v3070_v38  ;;  %v8506_v54 = vadd.f32 1.0, %v8496_v27 }
 0x48d   :  { %v3451_v44 = vsub.f32 1.0, %v3419_v37  ;;  %v3900_v26 = vadd.f32 %v3788_v45, %v3580_v22  ;;  %v3792_v59 = vmul.f32 -0.5, %v8443_v53  ;;  %v8515_v19 = vadd.f32 1.0, %v8503_v36 }
 0x48e   :  { %v3452_v23 = vsub.f32 1.0, %v3420_v57  ;;  %vm3229_vm12 = vcmp.ge.f32.partialorder %v8356_v0, 0.0  ;;  %v2847_v4 = vsub.f32 1.0, %v8482_v7  ;;  %v2848_v11 = vsub.f32 1.0, %v8491_v47 }
 0x48f   :  { %v3483_v1 = vmul.f32 %v3451_v44, %v3451_v44  ;;  %4669 = vrcp.f32 %v8506_v54  ;;  %vm3230_vm13 = vcmp.ge.f32.partialorder %v8371_v2, 0.0  ;;  %v3801_v58 = vmul.f32 -0.5, %v8454_v34 }
 0x490   :  { %v3484_v39 = vmul.f32 %v3452_v23, %v3452_v23  ;;  %4671 = vrcp.f32 %v8515_v19  ;;  %v8533_v51 = vmul.f32 0.75, %v2847_v4  ;;  %v8537_v61 = vmul.f32 0.75, %v2848_v11 }
 0x491   :  { %v3931_v25 = vmul.f32 %v3483_v1, %v8403_v18  ;;  %v2945_v18 = vand.u32 2147483647, %v8511_v43  ;;  %v4662_v9 = vpop.eup %4661  ;;  %v3519_v60 = vmax.f32 %v8396_v16, 0.0  ;;  %v3793_v29 = vadd.f32 1.0, %v3792_v59 }
 0x492   :  { %v3932_v12 = vmul.f32 %v3484_v39, %v2908_v33  ;;  %v4664_v21 = vpop.eup %4663  ;;  %v3133_v32 = vmul.f32 %v4662_v9, %v3069_v28  ;;  %v3795_v15 = vand.u32 2147483647, %v8443_v53  ;;  %v3804_v52 = vand.u32 2147483647, %v8454_v34 }
 0x493   :  { %v3963_v10 = vmul.f32 %v3931_v25, %v3899_v63  ;;  %v3134_v48 = vmul.f32 %v4664_v21, %v3070_v38  ;;  %v3520_v41 = vmax.f32 %v8401_v8, 0.0  ;;  %v2946_v42 = vand.u32 2147483647, %v8528_v55 }
 0x494   :  { %v3964_v31 = vmul.f32 %v3932_v12, %v3900_v26  ;;  %v3165_v20 = vsub.f32 2.0, %v3133_v32  ;;  %v3802_v49 = vadd.f32 1.0, %v3801_v58  ;;  %v2977_v56 = vsub.f32 0.0, %v2945_v18 }
 0x495   :  { %v3166_v37 = vsub.f32 2.0, %v3134_v48  ;;  %4673 = vlog2.f32 %v8506_v54  ;;  %v2978_v28 = vsub.f32 0.0, %v2946_v42  ;;  %v4666_v46 = vpop.eup %4665  ;;  %v3794_v38 = vmul.f32 %v8443_v53, %v3793_v29 }
 0x496   :  { %v4016_v40 = vsel %vm2523_vm9, %v3964_v31, 0.0  ;;  %v3197_v22 = vmul.f32 %v4662_v9, %v3165_v20  ;;  %vm8547_vm14 = vcmp.lt.f32.partialorder %v3795_v15, 0.0004427343  ;;  %v3035_v3 = vmul.f32 1.442695, %v2977_v56  ;;  %v4668_v44 = vpop.eup %4667 }
 0x497   :  { %v4017_v33 = vadd.f32 %v4016_v40, %v3963_v10  ;;  %v3198_v45 = vmul.f32 %v4664_v21, %v3166_v37  ;;  %vm8551_vm15 = vcmp.lt.f32.partialorder %v3804_v52, 0.0004427343  ;;  %vm3231_vm0 = vcmp.ge.f32.partialorder %v8396_v16, 0.0 }
 0x498   :  { %4675 = vlog2.f32 %v8515_v19  ;;  %v3037_v1 = vmul.f32 1.442695, %v2978_v28  ;;  %v3261_v63 = vmul.f32 %v8443_v53, %v3197_v22  ;;  %v3803_v39 = vmul.f32 %v8454_v34, %v3802_v49 }
 0x499   :  { %4018 = vadd.xlane.f32.xlu0 %v4017_v33  ;;  %vm3232_vm1 = vcmp.ge.f32.partialorder %v8401_v8, 0.0  ;;  %v3810_v26 = vmul.f32 -0.5, %v8496_v27  ;;  %4677 = vpow2.f32 %v3035_v3  ;;  %v4670_v59 = vpop.eup %4669  ;;  %v3262_v25 = vmul.f32 %v8454_v34, %v3198_v45 }
 0x49a   :  { %v3813_v12 = vand.u32 2147483647, %v8496_v27  ;;  %v3819_v58 = vmul.f32 -0.5, %v8503_v36  ;;  %4679 = vpow2.f32 %v3037_v1  ;;  %v4672_v18 = vpop.eup %4671  ;;  %v3293_v9 = vsel %vm3229_vm12, %v3197_v22, %v3261_v63 }
 0x49b   :  { %v3791_v53 = vmul.f32 0.6931472, %v4666_v46  ;;  %v3800_v10 = vmul.f32 0.6931472, %v4668_v44  ;;  %v3135_v21 = vmul.f32 %v4670_v59, %v8506_v54  ;;  %v3294_v31 = vsel %vm3230_vm13, %v3198_v45, %v3262_v25 }
 0x49c   :  { %v3325_v32 = vmul.f32 %v3293_v9, %v8419_v24  ;;  %v3357_v29 = vsub.f32 1.0, %v3293_v9  ;;  %v3136_v34 = vmul.f32 %v4672_v18, %v8515_v19  ;;  %v3326_v15 = vmul.f32 %v3294_v31, %v8424_v17 }
 0x49d   :  { %v3358_v48 = vsub.f32 1.0, %v3294_v31  ;;  %v3167_v52 = vsub.f32 2.0, %v3135_v21  ;;  %v3811_v42 = vadd.f32 1.0, %v3810_v26  ;;  %v3551_v54 = vmul.f32 %v8482_v7, %v8396_v16  ;;  %v8635_v16 = vld [vmem:[%s8796_s0 + $0x4e8] sm:$0xff] }
 0x49e   :  { %v3389_v0 = vmul.f32 %v3357_v29, %v2845_v62  ;;  %v3168_v40 = vsub.f32 2.0, %v3136_v34  ;;  %v3820_v20 = vadd.f32 1.0, %v3819_v58  ;;  %v3797_v49 = vsel %vm8547_vm14, %v3794_v38, %v3791_v53 }
 0x49f   :  { %v3390_v2 = vmul.f32 %v3358_v48, %v2846_v50  ;;  %v3199_v19 = vmul.f32 %v4670_v59, %v3167_v52  ;;  %v3552_v56 = vmul.f32 %v8491_v47, %v8401_v8  ;;  %v4674_v33 = vpop.eup %4673  ;;  %v3806_v24 = vsel %vm8551_vm15, %v3803_v39, %v3800_v10 }
 0x4a0   :  { %v3421_v37 = vadd.f32 %v3389_v0, %v3325_v32  ;;  %v3200_v62 = vmul.f32 %v4672_v18, %v3168_v40  ;;  %v3822_v28 = vand.u32 2147483647, %v8503_v36  ;;  %v3812_v17 = vmul.f32 %v8496_v27, %v3811_v42 }
 0x4a1   :  { %v3422_v46 = vadd.f32 %v3390_v2, %v3326_v15  ;;  %v3263_v22 = vmul.f32 %v8496_v27, %v3199_v19  ;;  %vm8587_vm2 = vcmp.lt.f32.partialorder %v3813_v12, 0.0004427343  ;;  %v3901_v3 = vadd.f32 %v3797_v49, %v8486_v5 }
 0x4a2   :  { %v4676_v38 = vpop.eup %4675  ;;  %v3453_v57 = vsub.f32 1.0, %v3421_v37  ;;  %v3264_v44 = vmul.f32 %v8503_v36, %v3200_v62  ;;  %v3821_v45 = vmul.f32 %v8503_v36, %v3820_v20  ;;  %v3902_v63 = vadd.f32 %v3806_v24, %v8498_v13  ;;  %v2785_v24 = vld [vmem:[%s8797_s1 + $0x4d0] sm:$0xff] }
 0x4a3   :  { %v8594_v23 = vpop.eup %4677  ;;  %v3454_v1 = vsub.f32 1.0, %v3422_v46  ;;  %v3295_v27 = vsel %vm3231_vm0, %v3199_v19, %v3263_v22  ;;  %v3809_v39 = vmul.f32 0.6931472, %v4674_v33  ;;  %v3818_v10 = vmul.f32 0.6931472, %v4676_v38 }
 0x4a4   :  { %v8599_v26 = vpop.eup %4679  ;;  %v3485_v59 = vmul.f32 %v3453_v57, %v3453_v57  ;;  %v3296_v25 = vsel %vm3232_vm1, %v3200_v62, %v3264_v44  ;;  %v3327_v5 = vmul.f32 %v3295_v27, %v8482_v7  ;;  %v3359_v12 = vsub.f32 1.0, %v3295_v27 }
 0x4a5   :  { %v3486_v58 = vmul.f32 %v3454_v1, %v3454_v1  ;;  %v3328_v36 = vmul.f32 %v3296_v25, %v8491_v47  ;;  %v3360_v18 = vsub.f32 1.0, %v3296_v25  ;;  %v3073_v9 = vadd.f32 1.0, %v8594_v23 }
 0x4a6   :  { %v3933_v13 = vmul.f32 %v3485_v59, %v8475_v14  ;;  %v3391_v53 = vmul.f32 %v3359_v12, %v2847_v4  ;;  %v3074_v21 = vadd.f32 1.0, %v8599_v26  ;;  %vm8613_vm3 = vcmp.lt.f32.partialorder %v3822_v28, 0.0004427343  ;;  %v8620_v14 = vld [vmem:[%s8796_s0 + $0x4e0] sm:$0xff]  ;;  %v2786_v28 = vld [vmem:[%s8797_s1 + $0x4d8] sm:$0xff] }
 0x4a7   :  { %v3934_v31 = vmul.f32 %v3486_v58, %v8477_v35  ;;  %v3392_v32 = vmul.f32 %v3360_v18, %v2848_v11  ;;  %4681 = vrcp.f32 %v3073_v9  ;;  %v3583_v34 = vsub.f32 %v3519_v60, %v3551_v54  ;;  %v8660_v59 = vld [vmem:[%s8796_s0 + $0x4f8] sm:$0xff] }
 0x4a8   :  { %v3965_v7 = vmul.f32 %v3933_v13, %v3901_v3  ;;  %v3423_v4 = vadd.f32 %v3391_v53, %v3327_v5  ;;  %4683 = vrcp.f32 %v3074_v21  ;;  %v3584_v47 = vsub.f32 %v3520_v41, %v3552_v56 }
 0x4a9   :  { %v3966_v35 = vmul.f32 %v3934_v31, %v3902_v63  ;;  %v3424_v15 = vadd.f32 %v3392_v32, %v3328_v36  ;;  %v3815_v11 = vsel %vm8587_vm2, %v3812_v17, %v3809_v39  ;;  %v2911_v48 = vadd.f32 %v8533_v51, %v8494_v30 }
 0x4aa   :  { %v3455_v52 = vsub.f32 1.0, %v3423_v4  ;;  %v3824_v42 = vsel %vm8613_vm3, %v3821_v45, %v3818_v10  ;;  %v2947_v60 = vand.u32 2147483647, %v8620_v14  ;;  %v2912_v41 = vadd.f32 %v8537_v61, %v8501_v6  ;;  %v8655_v45 = vld [vmem:[%s8796_s0 + $0x4f0] sm:$0xff] }
 0x4ab   :  { %v4020_v8 = vsel %vm2523_vm9, %v3966_v35, 0.0  ;;  %v3456_v0 = vsub.f32 1.0, %v3424_v15  ;;  %v3903_v30 = vadd.f32 %v3815_v11, %v3583_v34  ;;  %v3904_v20 = vadd.f32 %v3824_v42, %v3584_v47 }
 0x4ac   :  { %v4021_v40 = vadd.f32 %v4020_v8, %v3965_v7  ;;  %v3487_v54 = vmul.f32 %v3455_v52, %v3455_v52  ;;  %v2948_v2 = vand.u32 2147483647, %v8635_v16  ;;  %v2979_v19 = vsub.f32 0.0, %v2947_v60 }
 0x4ad   :  { %v3488_v51 = vmul.f32 %v3456_v0, %v3456_v0  ;;  %4685 = vlog2.f32 %v3073_v9  ;;  %v8648_v17 = vmul.f32 0.25, %v2785_v24  ;;  %v3828_v38 = vmul.f32 -0.5, %v8594_v23 }
 0x4ae   :  { %4022 = vadd.xlane.f32.xlu1 %v4021_v40  ;;  %v3935_v49 = vmul.f32 %v3487_v54, %v2911_v48  ;;  %v2980_v33 = vsub.f32 0.0, %v2948_v2  ;;  %4687 = vlog2.f32 %v3074_v21  ;;  %v3039_v6 = vmul.f32 1.442695, %v2979_v19 }
 0x4af   :  { %v3936_v56 = vmul.f32 %v3488_v51, %v2912_v41  ;;  %v2849_v3 = vsub.f32 1.0, %v2785_v24  ;;  %v2818_v63 = vmul.f32 0.25, %v2786_v28  ;;  %v2850_v27 = vsub.f32 1.0, %v2786_v28 }
 0x4b0   :  { %v3967_v37 = vmul.f32 %v3935_v49, %v3903_v30  ;;  %v3041_v46 = vmul.f32 1.442695, %v2980_v33  ;;  %4689 = vpow2.f32 %v3039_v6  ;;  %v3831_v12 = vand.u32 2147483647, %v8594_v23 }
 0x4b1   :  { %v4682_v61 = vpop.eup %4681  ;;  %v3968_v62 = vmul.f32 %v3936_v56, %v3904_v20  ;;  %v2881_v25 = vmul.f32 0.75, %v2849_v3  ;;  %v3837_v58 = vmul.f32 -0.5, %v8599_v26  ;;  %vm3233_vm4 = vcmp.ge.f32.partialorder %v8511_v43, 0.0 }
 0x4b2   :  { %v4684_v22 = vpop.eup %4683  ;;  %v3137_v50 = vmul.f32 %v4682_v61, %v3073_v9  ;;  %4691 = vpow2.f32 %v3041_v46  ;;  %v3829_v18 = vadd.f32 1.0, %v3828_v38  ;;  %v2949_v9 = vand.u32 2147483647, %v8655_v45 }
 0x4b3   :  { %v4024_v57 = vsel %vm2523_vm9, %v3968_v62, 0.0  ;;  %v3138_v44 = vmul.f32 %v4684_v22, %v3074_v21  ;;  %vm3234_vm5 = vcmp.ge.f32.partialorder %v8528_v55, 0.0  ;;  %v3521_v53 = vmax.f32 %v8511_v43, 0.0 }
 0x4b4   :  { %v4025_v1 = vadd.f32 %v4024_v57, %v3967_v37  ;;  %v3169_v39 = vsub.f32 2.0, %v3137_v50  ;;  %v2950_v10 = vand.u32 2147483647, %v8660_v59  ;;  %v3522_v31 = vmax.f32 %v8528_v55, 0.0 }
 0x4b5   :  { %v3170_v5 = vsub.f32 2.0, %v3138_v44  ;;  %v3553_v32 = vmul.f32 %v2785_v24, %v8511_v43  ;;  %v2981_v29 = vsub.f32 0.0, %v2949_v9  ;;  %v3554_v34 = vmul.f32 %v2786_v28, %v8528_v55 }
 0x4b6   :  { %4026 = vadd.xlane.f32.xlu0 %v4025_v1  ;;  %v3201_v36 = vmul.f32 %v4682_v61, %v3169_v39  ;;  %vm8674_vm6 = vcmp.lt.f32.partialorder %v3831_v12, 0.0004427343  ;;  %v3838_v15 = vadd.f32 1.0, %v3837_v58  ;;  %v3830_v48 = vmul.f32 %v8594_v23, %v3829_v18  ;;  %v2787_v18 = vld [vmem:[%s8797_s1 + $0x4e0] sm:$0xff] }
 0x4b7   :  { %v3202_v13 = vmul.f32 %v4684_v22, %v3170_v5  ;;  %v4686_v7 = vpop.eup %4685  ;;  %v3840_v52 = vand.u32 2147483647, %v8599_v26  ;;  %v3043_v42 = vmul.f32 1.442695, %v2981_v29  ;;  %v2982_v0 = vsub.f32 0.0, %v2950_v10 }
 0x4b8   :  { %v3265_v21 = vmul.f32 %v8594_v23, %v3201_v36  ;;  %v4688_v47 = vpop.eup %4687  ;;  %v3827_v51 = vmul.f32 0.6931472, %v4686_v7  ;;  %v3839_v23 = vmul.f32 %v8599_v26, %v3838_v15  ;;  %v2882_v19 = vmul.f32 0.75, %v2850_v27 }
 0x4b9   :  { %v3266_v4 = vmul.f32 %v8599_v26, %v3202_v13  ;;  %4693 = vpow2.f32 %v3043_v42  ;;  %v3836_v2 = vmul.f32 0.6931472, %v4688_v47  ;;  %vm8690_vm7 = vcmp.lt.f32.partialorder %v3840_v52, 0.0004427343 }
 0x4ba   :  { %v3297_v11 = vsel %vm3233_vm4, %v3201_v36, %v3265_v21  ;;  %v8684_v40 = vpop.eup %4689  ;;  %v3045_v6 = vmul.f32 1.442695, %v2982_v0  ;;  %v3586_v62 = vsub.f32 %v3522_v31, %v3554_v34  ;;  %v2913_v26 = vadd.f32 %v2881_v25, %v8648_v17 }
 0x4bb   :  { %v3298_v60 = vsel %vm3234_vm5, %v3202_v13, %v3266_v4  ;;  %v3329_v8 = vmul.f32 %v3297_v11, %v2785_v24  ;;  %v3361_v41 = vsub.f32 1.0, %v3297_v11  ;;  %v3075_v49 = vadd.f32 1.0, %v8684_v40 }
 0x4bc   :  { %v3330_v54 = vmul.f32 %v3298_v60, %v2786_v28  ;;  %v3362_v30 = vsub.f32 1.0, %v3298_v60  ;;  %v8686_v20 = vpop.eup %4691  ;;  %v3585_v24 = vsub.f32 %v3521_v53, %v3553_v32  ;;  %v3833_v28 = vsel %vm8674_vm6, %v3830_v48, %v3827_v51  ;;  %v2788_v53 = vld [vmem:[%s8797_s1 + $0x4e8] sm:$0xff] }
 0x4bd   :  { %v3393_v43 = vmul.f32 %v3361_v41, %v2849_v3  ;;  %v3076_v33 = vadd.f32 1.0, %v8686_v20  ;;  %4695 = vrcp.f32 %v3075_v49  ;;  %v3842_v22 = vsel %vm8690_vm7, %v3839_v23, %v3836_v2 }
 0x4be   :  { %v3394_v55 = vmul.f32 %v3362_v30, %v2850_v27  ;;  %v2914_v50 = vadd.f32 %v2882_v19, %v2818_v63  ;;  %v3905_v3 = vadd.f32 %v3833_v28, %v3585_v24  ;;  %v3906_v1 = vadd.f32 %v3842_v22, %v3586_v62 }
 0x4bf   :  { %v3425_v37 = vadd.f32 %v3393_v43, %v3329_v8  ;;  %4697 = vrcp.f32 %v3076_v33  ;;  %v3846_v21 = vmul.f32 -0.5, %v8684_v40  ;;  %v2819_v29 = vmul.f32 0.25, %v2787_v18 }
 0x4c0   :  { %v3426_v61 = vadd.f32 %v3394_v55, %v3330_v54  ;;  %4699 = vpow2.f32 %v3045_v6  ;;  %v2851_v7 = vsub.f32 1.0, %v2787_v18  ;;  %v3855_v34 = vmul.f32 -0.5, %v8686_v20 }
 0x4c1   :  { %v3457_v46 = vsub.f32 1.0, %v3425_v37  ;;  %4701 = vlog2.f32 %v3075_v49  ;;  %v2820_v35 = vmul.f32 0.25, %v2788_v53  ;;  %v2852_v15 = vsub.f32 1.0, %v2788_v53 }
 0x4c2   :  { %v3458_v38 = vsub.f32 1.0, %v3426_v61  ;;  %4703 = vlog2.f32 %v3076_v33  ;;  %v2883_v48 = vmul.f32 0.75, %v2851_v7  ;;  %vm3235_vm10 = vcmp.ge.f32.partialorder %v8620_v14, 0.0 }
 0x4c3   :  { %v3489_v57 = vmul.f32 %v3457_v46, %v3457_v46  ;;  %v8700_v39 = vpop.eup %4693  ;;  %v3847_v42 = vadd.f32 1.0, %v3846_v21  ;;  %vm3236_vm11 = vcmp.ge.f32.partialorder %v8635_v16, 0.0  ;;  %v3523_v8 = vmax.f32 %v8620_v14, 0.0 }
 0x4c4   :  { %v3490_v44 = vmul.f32 %v3458_v38, %v3458_v38  ;;  %v3077_v58 = vadd.f32 1.0, %v8700_v39  ;;  %v3524_v54 = vmax.f32 %v8635_v16, 0.0  ;;  %v3849_v30 = vand.u32 2147483647, %v8684_v40 }
 0x4c5   :  { %v3937_v27 = vmul.f32 %v3489_v57, %v2913_v26  ;;  %v3856_v51 = vadd.f32 1.0, %v3855_v34  ;;  %v3555_v23 = vmul.f32 %v2787_v18, %v8620_v14  ;;  %v3858_v19 = vand.u32 2147483647, %v8686_v20 }
 0x4c6   :  { %v3938_v5 = vmul.f32 %v3490_v44, %v2914_v50  ;;  %4705 = vrcp.f32 %v3077_v58  ;;  %v3848_v24 = vmul.f32 %v8684_v40, %v3847_v42  ;;  %vm8726_vm12 = vcmp.lt.f32.partialorder %v3849_v30, 0.0004427343 }
 0x4c7   :  { %v3969_v12 = vmul.f32 %v3937_v27, %v3905_v3  ;;  %v4696_v25 = vpop.eup %4695  ;;  %v2884_v22 = vmul.f32 0.75, %v2852_v15  ;;  %vm8731_vm13 = vcmp.lt.f32.partialorder %v3858_v19, 0.0004427343  ;;  %v3587_v3 = vsub.f32 %v3523_v8, %v3555_v23 }
 0x4c8   :  { %v3970_v17 = vmul.f32 %v3938_v5, %v3906_v1  ;;  %v3139_v9 = vmul.f32 %v4696_v25, %v3075_v49  ;;  %v3556_v49 = vmul.f32 %v2788_v53, %v8635_v16  ;;  %v3857_v16 = vmul.f32 %v8686_v20, %v3856_v51  ;;  %v2789_v1 = vld [vmem:[%s8797_s1 + $0x4f0] sm:$0xff] }
 0x4c9   :  { %v4698_v36 = vpop.eup %4697  ;;  %vm3237_vm14 = vcmp.ge.f32.partialorder %v8655_v45, 0.0  ;;  %v2821_v42 = vmul.f32 0.25, %v2789_v1  ;;  %vm3238_vm15 = vcmp.ge.f32.partialorder %v8660_v59, 0.0 }
 0x4ca   :  { %v4028_v63 = vsel %vm2523_vm9, %v3970_v17, 0.0  ;;  %v3140_v10 = vmul.f32 %v4698_v36, %v3076_v33  ;;  %v3171_v31 = vsub.f32 2.0, %v3139_v9  ;;  %v8711_v32 = vpop.eup %4699  ;;  %v3588_v44 = vsub.f32 %v3524_v54, %v3556_v49 }
 0x4cb   :  { %v4029_v13 = vadd.f32 %v4028_v63, %v3969_v12  ;;  %v3078_v11 = vadd.f32 1.0, %v8711_v32  ;;  %v4702_v41 = vpop.eup %4701  ;;  %v2915_v12 = vadd.f32 %v2883_v48, %v2819_v29  ;;  %v2916_v63 = vadd.f32 %v2884_v22, %v2820_v35 }
 0x4cc   :  { %v3172_v4 = vsub.f32 2.0, %v3140_v10  ;;  %v3203_v47 = vmul.f32 %v4696_v25, %v3171_v31  ;;  %v4704_v43 = vpop.eup %4703  ;;  %v3845_v62 = vmul.f32 0.6931472, %v4702_v41  ;;  %v2853_v9 = vsub.f32 1.0, %v2789_v1  ;;  %v2790_v10 = vld [vmem:[%s8797_s1 + $0x4f8] sm:$0xff]  ;;  %s4753_s1 = smov [#allocation2]  }
 0x4cd   :  { %4030 = vadd.xlane.f32.xlu1 %v4029_v13  ;;  %4707 = vrcp.f32 %v3078_v11  ;;  %v3854_v14 = vmul.f32 0.6931472, %v4704_v43  ;;  %v3864_v31 = vmul.f32 -0.5, %v8700_v39  ;;  %v3873_v34 = vmul.f32 -0.5, %v8711_v32  ;;  %s4090_s7 = sshll.u32 %s4753_s1, 4  ;;  %s4091_s7 = int_to_ptr.vmem [resolvable:$true] %s4090_s7 }
 0x4ce   :  { %v3204_v52 = vmul.f32 %v4698_v36, %v3172_v4  ;;  %v3267_v60 = vmul.f32 %v8684_v40, %v3203_v47  ;;  %4709 = vlog2.f32 %v3077_v58  ;;  %v3851_v5 = vsel %vm8726_vm12, %v3848_v24, %v3845_v62  ;;  %s4713_s9 = scalar_lea.vmem %s4091_s7, 128  ;;  %p4718_p2 = scmp.lt.s32.totalorder %s4091_s7, %s4091_s7 }
 0x4cf   :  { %4711 = vlog2.f32 %v3078_v11  ;;  %v3860_v25 = vsel %vm8731_vm13, %v3857_v16, %v3854_v14  ;;  %v2885_v41 = vmul.f32 0.75, %v2853_v9  ;;  %v3865_v51 = vadd.f32 1.0, %v3864_v31  ;;  %p4714_p1 = scmp.ne.s32.totalorder %s4091_s7, %s4713_s9  ;;  %p4719_p3 = scmp.lt.s32.totalorder %s4713_s9, %s4713_s9 }
 0x4d0   :  { %v3268_v0 = vmul.f32 %v8686_v20, %v3204_v52  ;;  %v3299_v2 = vsel %vm3235_vm10, %v3203_v47, %v3267_v60  ;;  %v4706_v55 = vpop.eup %4705  ;;  %v2854_v60 = vsub.f32 1.0, %v2790_v10  ;;  %v3867_v49 = vand.u32 2147483647, %v8700_v39 }
 0x4d1   :  { %v3331_v33 = vmul.f32 %v3299_v2, %v2787_v18  ;;  %v3363_v37 = vsub.f32 1.0, %v3299_v2  ;;  %v3141_v28 = vmul.f32 %v4706_v55, %v3077_v58  ;;  %v3874_v19 = vadd.f32 1.0, %v3873_v34  ;;  %p4720_p4 = por %p4719_p3, %p4718_p2 }
 0x4d2   :  { %v3300_v56 = vsel %vm3236_vm11, %v3204_v52, %v3268_v0  ;;  %v3876_v24 = vand.u32 2147483647, %v8711_v32  ;;  %v3866_v16 = vmul.f32 %v8700_v39, %v3865_v51  ;;  %vm8759_vm0 = vcmp.lt.f32.partialorder %v3867_v49, 0.0004427343 }
 0x4d3   :  { %v3332_v6 = vmul.f32 %v3300_v56, %v2788_v53  ;;  %v3364_v61 = vsub.f32 1.0, %v3300_v56  ;;  %v3395_v26 = vmul.f32 %v3363_v37, %v2851_v7  ;;  %v3173_v57 = vsub.f32 2.0, %v3141_v28  ;;  %p4721_p5 = pnand %p4720_p4, %p4714_p1 }
 0x4d4   :  { %v3907_v53 = vadd.f32 %v3851_v5, %v3587_v3  ;;  %v3908_v7 = vadd.f32 %v3860_v25, %v3588_v44  ;;  %v3557_v37 = vmul.f32 %v2789_v1, %v8655_v45  ;;  %v3558_v28 = vmul.f32 %v2790_v10, %v8660_v59 }
 0x4d5   :  { %v3396_v50 = vmul.f32 %v3364_v61, %v2852_v15  ;;  %v3427_v40 = vadd.f32 %v3395_v26, %v3331_v33  ;;  %v3205_v20 = vmul.f32 %v4706_v55, %v3173_v57  ;;  %v3526_v33 = vmax.f32 %v8660_v59, 0.0 }
 0x4d6   :  { %v2822_v38 = vmul.f32 0.25, %v2790_v10  ;;  %v2886_v57 = vmul.f32 0.75, %v2854_v60  ;;  %vm3877_vm1 = vcmp.lt.f32.partialorder %v3876_v24, 0.0004427343  ;;  %v2917_v3 = vadd.f32 %v2885_v41, %v2821_v42 }
 0x4d7   :  { %v3428_v27 = vadd.f32 %v3396_v50, %v3332_v6  ;;  %v3459_v17 = vsub.f32 1.0, %v3427_v40  ;;  %v4708_v36 = vpop.eup %4707  ;;  %v3269_v13 = vmul.f32 %v8700_v39, %v3205_v20 }
 0x4d8   :  { %v3142_v21 = vmul.f32 %v4708_v36, %v3078_v11  ;;  %v3525_v11 = vmax.f32 %v8655_v45, 0.0  ;;  %v4710_v43 = vpop.eup %4709  ;;  %v3875_v45 = vmul.f32 %v8711_v32, %v3874_v19 }
 0x4d9   :  { %v3460_v18 = vsub.f32 1.0, %v3428_v27  ;;  %v3491_v58 = vmul.f32 %v3459_v17, %v3459_v17  ;;  %v3301_v4 = vsel %vm3237_vm14, %v3205_v20, %v3269_v13  ;;  %v4712_v55 = vpop.eup %4711  ;;  %v3863_v14 = vmul.f32 0.6931472, %v4710_v43 }
 0x4da   :  { %v3174_v35 = vsub.f32 2.0, %v3142_v21  ;;  %v3333_v47 = vmul.f32 %v3301_v4, %v2789_v1  ;;  %v3365_v48 = vsub.f32 1.0, %v3301_v4  ;;  %v3872_v50 = vmul.f32 0.6931472, %v4712_v55  ;;  %v3987_v21 = vpop.xlane.xlu1 %3986 }
 0x4db   :  { %v3492_v29 = vmul.f32 %v3460_v18, %v3460_v18  ;;  %v3939_v15 = vmul.f32 %v3491_v58, %v2915_v12  ;;  %v3589_v59 = vsub.f32 %v3525_v11, %v3557_v37  ;;  %v3590_v27 = vsub.f32 %v3526_v33, %v3558_v28 }
 0x4dc   :  { %v3206_v0 = vmul.f32 %v4708_v36, %v3174_v35  ;;  %v3397_v54 = vmul.f32 %v3365_v48, %v2853_v9  ;;  %v3869_v39 = vsel %vm8759_vm0, %v3866_v16, %v3863_v14  ;;  %v3878_v5 = vsel %vm3877_vm1, %v3875_v45, %v3872_v50 }
 0x4dd   :  { %v3940_v52 = vmul.f32 %v3492_v29, %v2916_v63  ;;  %v3971_v8 = vmul.f32 %v3939_v15, %v3907_v53  ;;  %v2918_v20 = vadd.f32 %v2886_v57, %v2822_v38  ;;  %v3909_v17 = vadd.f32 %v3869_v39, %v3589_v59  ;;  %v3979_v53 = vpop.xlane.xlu0 %3978 }
 0x4de   :  { %v3270_v2 = vmul.f32 %v8711_v32, %v3206_v0  ;;  %v3429_v23 = vadd.f32 %v3397_v54, %v3333_v47  ;;  %v3910_v63 = vadd.f32 %v3878_v5, %v3590_v27  ;;  %v4041_v29 = vsel %vm2652_vm8, %v3979_v53, 0.0  ;;  %v3991_v4 = vpop.xlane.xlu1 %3990 }
 0x4df   :  { %v3972_v30 = vmul.f32 %v3940_v52, %v3908_v7  ;;  %v4044_v34 = vsel %vm2652_vm8, %v3987_v21, 0.0  ;;  %v4046_v35 = vsel %vm2652_vm8, %v3991_v4, 0.0 }
 0x4e0   :  { %v3302_v61 = vsel %vm3238_vm15, %v3206_v0, %v3270_v2  ;;  %v3461_v62 = vsub.f32 1.0, %v3429_v23 }
 0x4e1   :  { %v4032_v56 = vsel %vm2523_vm9, %v3972_v30, 0.0  ;;  %v3334_v26 = vmul.f32 %v3302_v61, %v2790_v10  ;;  %v3366_v46 = vsub.f32 1.0, %v3302_v61  ;;  %v3983_v10 = vpop.xlane.xlu0 %3982 }
 0x4e2   :  { %v4033_v6 = vadd.f32 %v4032_v56, %v3971_v8  ;;  %v3493_v44 = vmul.f32 %v3461_v62, %v3461_v62  ;;  %v4042_v31 = vsel %vm2652_vm8, %v3983_v10, 0.0  ;;  %v3999_v42 = vpop.xlane.xlu1 %3998 }
 0x4e3   :  { %v3398_v40 = vmul.f32 %v3366_v46, %v2854_v60  ;;  %v4043_v7 = vadd.f32 %v4042_v31, %v4041_v29  ;;  %v4050_v8 = vsel %vm2652_vm8, %v3999_v42, 0.0 }
 0x4e4   :  { %4034 = vadd.xlane.f32.xlu0 %v4033_v6  ;;  %v3941_v25 = vmul.f32 %v3493_v44, %v2917_v3 }
 0x4e5   :  { %v3430_v1 = vadd.f32 %v3398_v40, %v3334_v26  ;;  %v4045_v15 = vadd.f32 %v4044_v34, %v4043_v7  ;;  %v3995_v47 = vpop.xlane.xlu0 %3994 }
 0x4e6   :  { %v3973_v18 = vmul.f32 %v3941_v25, %v3909_v17  ;;  %v4048_v52 = vsel %vm2652_vm8, %v3995_v47, 0.0  ;;  %v9038_v17 = vld [vmem:[#allocation8_spill] sm:$0xff] }
 0x4e7   :  { %v3462_v12 = vsub.f32 1.0, %v3430_v1  ;;  %v4047_v48 = vadd.f32 %v4046_v35, %v4045_v15 }
 0x4e9   :  { %v3494_v36 = vmul.f32 %v3462_v12, %v3462_v12  ;;  %v4049_v60 = vadd.f32 %v4048_v52, %v4047_v48  ;;  %v4003_v41 = vpop.xlane.xlu0 %4002 }
 0x4ea   :  { %v4052_v54 = vsel %vm2652_vm8, %v4003_v41, 0.0 }
 0x4eb   :  { %v3942_v32 = vmul.f32 %v3494_v36, %v2918_v20  ;;  %v4051_v0 = vadd.f32 %v4050_v8, %v4049_v60 }
 0x4ed   :  { %v3974_v9 = vmul.f32 %v3942_v32, %v3910_v63  ;;  %v4053_v11 = vadd.f32 %v4052_v54, %v4051_v0 }
 0x4ef   :  { %v4036_v13 = vsel %vm2523_vm9, %v3974_v9, 0.0 }
 0x4f0   :  { %v4037_v58 = vadd.f32 %v4036_v13, %v3973_v18  ;;  %v4007_v30 = vpop.xlane.xlu1 %4006 }
 0x4f1   :  { %v4054_v51 = vsel %vm2652_vm8, %v4007_v30, 0.0 }
 0x4f2   :  { %4038 = vadd.xlane.f32.xlu1 %v4037_v58  ;;  %v4055_v2 = vadd.f32 %v4054_v51, %v4053_v11 }
 0x502   :  { %v4011_v43 = vpop.xlane.xlu0 %4010 }
 0x503   :  { %v4056_v23 = vsel %vm2652_vm8, %v4011_v43, 0.0 }
 0x504   :  { %v4057_v19 = vadd.f32 %v4056_v23, %v4055_v2 }
 0x50b   :  { %v4015_v49 = vpop.xlane.xlu1 %4014 }
 0x50c   :  { %v4058_v55 = vsel %vm2652_vm8, %v4015_v49, 0.0 }
 0x50d   :  { %v4059_v33 = vadd.f32 %v4058_v55, %v4057_v19 }
 0x526   :  { %v4019_v56 = vpop.xlane.xlu0 %4018 }
 0x527   :  { %v4060_v37 = vsel %vm2652_vm8, %v4019_v56, 0.0 }
 0x528   :  { %v4061_v6 = vadd.f32 %v4060_v37, %v4059_v33 }
 0x53b   :  { %v4023_v24 = vpop.xlane.xlu1 %4022 }
 0x53c   :  { %v4062_v61 = vsel %vm2652_vm8, %v4023_v24, 0.0 }
 0x53d   :  { %v4063_v28 = vadd.f32 %v4062_v61, %v4061_v6 }
 0x543   :  { %v4027_v62 = vpop.xlane.xlu0 %4026 }
 0x544   :  { %v4064_v26 = vsel %vm2652_vm8, %v4027_v62, 0.0 }
 0x545   :  { %v4065_v14 = vadd.f32 %v4064_v26, %v4063_v28 }
 0x55a   :  { %v4031_v46 = vpop.xlane.xlu1 %4030 }
 0x55b   :  { %v4066_v16 = vsel %vm2652_vm8, %v4031_v46, 0.0 }
 0x55c   :  { %v4067_v50 = vadd.f32 %v4066_v16, %v4065_v14 }
 0x571   :  { %v4035_v22 = vpop.xlane.xlu0 %4034 }
 0x572   :  { %v4068_v45 = vsel %vm2652_vm8, %v4035_v22, 0.0 }
 0x573   :  { %v4069_v38 = vadd.f32 %v4068_v45, %v4067_v50 }
 0x57f   :  { %v4039_v57 = vpop.xlane.xlu1 %4038 }
 0x580   :  { %v4070_v40 = vsel %vm2652_vm8, %v4039_v57, 0.0 }
 0x581   :  { %v4071_v3 = vadd.f32 %v4070_v40, %v4069_v38 }
 0x583   :  { %4072 = vadd.xlane.f32.xlu0 %v4071_v3 }
 0x610   :  { %v4073_v44 = vpop.xlane.xlu0 %4072 }
 0x611   :  { %v4074_v59 = vrot.slane %v4073_v44, 4 }
 0x613   :  { %v4075_v1 = vadd.f32 %v4074_v59, %v4073_v44 }
 0x615   :  { %v4076_v27 = vrot.slane %v4075_v1, 2 }
 0x617   :  { %v4077_v39 = vadd.f32 %v4076_v27, %v4075_v1 }
 0x619   :  { %v4078_v5 = vrot.slane %v4077_v39, 1 }
 0x61b   :  { %v4079_v20 = vadd.f32 %v4078_v5, %v4077_v39 }
 0x61d   :  { %4118 = vpush %v4079_v20 }
 0x64e   :  { %s4119_s8 = spop %4118 }
 0x64f   :  { %v4081_v12 = vstv %s4119_s8 }
 0x650   :  { %v4082_v25 = vadd.f32 %v4081_v12, %v9038_v17 }
 0x652   :  { %4083 = vst [vmem:[#allocation2] sm:$0xff] %v4082_v25 }
 0x653   :  { %4724 = shalt.err (!%p4721_p5)
}
 0x654   :  { %s4725_s12 = scalar_lea.hbm %s8798_s2, 128 }
 0x655   :  { %p4726_p6 = scmp.ne.s32.totalorder %s8798_s2, %s4725_s12  ;;  %p4729_p7 = scmp.lt.u32.totalorder %s4725_s12, %s8798_s2 }
 0x657   :  { %p4731_p8 = pnand %p4729_p7, %p4726_p6 }
 0x659   :  { %4734 = shalt.err (!%p4731_p8)
}
 0x65a   :  { %4093 = dma.vmem_to_hbm [thread:$0]  %s4091_s7, 128, %s8798_s2, [#allocation3]  }
 0x65b   :  { %4743 = dma.done.wait [#allocation3], 128  }
 0x65c   :  { %4744 = vsyncadd [#allocation3], 4294967168 }
 0x65d   :  { %4097 = vsyncpa [#allocation3], 1 }

</bundles_post_ra>
